<compile_context>
chip_gen: v7x
topology: tpu7x:2x2x1
jax: 0.10.0
libtpu: 0.0.40
codegen_flags: <defaults>
</compile_context>

<pallas_src>
import jax
import jax.numpy as jnp
from jax.experimental import pallas as pl
from jax.experimental.pallas import tpu as pltpu


# ----------------------------------------------------------------------------
# Fused two-stage SepConvGRU kernel for a single batch element.
# ----------------------------------------------------------------------------
def _sepconv_gru_kernel(h_ref, x_ref,
                        wx1_ref, whzr1_ref, whq1_ref, b1_ref,
                        wx2_ref, whzr2_ref, whq2_ref, b2_ref,
                        out_ref):
    _, H, W, Ch = h_ref.shape
    Cx = x_ref.shape[3]
    HW = H * W

    h = h_ref[0].astype(jnp.float32)        # (H, W, Ch) f32 for the GRU blend
    x_bf = x_ref[0].astype(jnp.bfloat16)    # (H, W, Cx) bf16 for MXU lhs

    def im2col(a, axis):
        # a: (H, W, C).  5-tap "same" (pad=2) im2col along `axis`
        # (axis=1 -> W for the (1,5) convs; axis=0 -> H for the (5,1) convs).
        # Pad once, slice 5 taps, concat along channel -> (H*W, 5*C).
        C = a.shape[2]
        if axis == 1:
            zeros = jnp.zeros((H, 2, C), a.dtype)
            ap = jnp.concatenate([zeros, a, zeros], axis=1)
            taps = [ap[:, k:k + W, :] for k in range(5)]
        else:
            zeros = jnp.zeros((2, W, C), a.dtype)
            ap = jnp.concatenate([zeros, a, zeros], axis=0)
            taps = [ap[k:k + H, :, :] for k in range(5)]
        return jnp.concatenate(taps, axis=-1).reshape(HW, 5 * C)

    def sigmoid(a):
        # exp -> EUP, approx reciprocal -> EUP; keeps the VPU divide-free.
        return pl.reciprocal(1.0 + jnp.exp(-a), approx=True)

    def stage(h_f32, axis, wx_ref, whzr_ref, whq_ref, b_ref):
        # One GRU half-step with the 5-tap conv along `axis`.
        im_x = im2col(x_bf, axis)                          # (HW, 5*Cx) bf16
        im_h = im2col(h_f32.astype(jnp.bfloat16), axis)    # (HW, 5*Ch) bf16

        b = b_ref[...]                                     # (1, 3*Ch) f32

        # Shared x-side contribution for all three gates: (HW, 3*Ch).
        xg = jnp.dot(im_x, wx_ref[...], preferred_element_type=jnp.float32)

        # Fused z||r h-side matmul: (HW, 2*Ch).
        zr = jnp.dot(im_h, whzr_ref[...], preferred_element_type=jnp.float32)
        zr = zr + xg[:, :2 * Ch] + b[:, :2 * Ch]
        z = sigmoid(zr[:, :Ch]).reshape(H, W, Ch)
        r = sigmoid(zr[:, Ch:]).reshape(H, W, Ch)

        # q gate: h-side uses r*h, x-side reuses xg.
        im_rh = im2col((r * h_f32).astype(jnp.bfloat16), axis)
        qpre = jnp.dot(im_rh, whq_ref[...], preferred_element_type=jnp.float32)
        qpre = qpre + xg[:, 2 * Ch:] + b[:, 2 * Ch:]
        q = jnp.tanh(qpre).reshape(H, W, Ch)

        return (1.0 - z) * h_f32 + z * q

    h1 = stage(h, 1, wx1_ref, whzr1_ref, whq1_ref, b1_ref)    # (1,5): along W
    h2 = stage(h1, 0, wx2_ref, whzr2_ref, whq2_ref, b2_ref)   # (5,1): along H

    # Lane-dense store: (H, W*Ch) with W*Ch a multiple of 128.
    out_ref[0] = h2.reshape(H, W * Ch).astype(out_ref.dtype)


# ----------------------------------------------------------------------------
# Host-side weight packing: split each (5, Cin, Ch) gate weight into its
# h-part / x-part, fuse gates, cast to bf16.
# ----------------------------------------------------------------------------
def pack_params(p, hidden_dim):
    Ch = hidden_dim

    def split(w):
        wh = w[:, :Ch, :].reshape(5 * Ch, Ch)     # rows ordered k*Ch + ch
        wx = w[:, Ch:, :].reshape(-1, Ch)         # rows ordered k*Cx + cx
        return wh, wx

    packed = {}
    for s in ("1", "2"):
        whz, wxz = split(p["wz" + s])
        whr, wxr = split(p["wr" + s])
        whq, wxq = split(p["wq" + s])
        packed["wx" + s] = jnp.concatenate(
            [wxz, wxr, wxq], axis=1).astype(jnp.bfloat16)          # (5*Cx, 3*Ch)
        packed["whzr" + s] = jnp.concatenate(
            [whz, whr], axis=1).astype(jnp.bfloat16)               # (5*Ch, 2*Ch)
        packed["whq" + s] = whq.astype(jnp.bfloat16)               # (5*Ch, Ch)
        packed["b" + s] = jnp.concatenate(
            [p["bz" + s], p["br" + s], p["bq" + s]]
        ).reshape(1, 3 * Ch).astype(jnp.float32)                   # (1, 3*Ch)
    return packed


def sepconv_gru_forward(h, x, p):
    B, H, W, Ch = h.shape
    Cx = x.shape[-1]
    pk = pack_params(p, Ch)

    act_h = pl.BlockSpec((1, H, W, Ch), lambda b: (b, 0, 0, 0))
    act_x = pl.BlockSpec((1, H, W, Cx), lambda b: (b, 0, 0, 0))

    def full2d(a):
        return pl.BlockSpec(a.shape, lambda b: (0, 0))

    out = pl.pallas_call(
        _sepconv_gru_kernel,
        out_shape=jax.ShapeDtypeStruct((B, H, W * Ch), h.dtype),
        grid=(B,),
        in_specs=[act_h, act_x,
                  full2d(pk["wx1"]), full2d(pk["whzr1"]),
                  full2d(pk["whq1"]), full2d(pk["b1"]),
                  full2d(pk["wx2"]), full2d(pk["whzr2"]),
                  full2d(pk["whq2"]), full2d(pk["b2"])],
        out_specs=pl.BlockSpec((1, H, W * Ch), lambda b: (b, 0, 0)),
        compiler_params=pltpu.CompilerParams(
            dimension_semantics=("parallel",)),
    )(h, x,
      pk["wx1"], pk["whzr1"], pk["whq1"], pk["b1"],
      pk["wx2"], pk["whzr2"], pk["whq2"], pk["b2"])

    return out.reshape(B, H, W, Ch)


# ----------------------------------------------------------------------------
# Pure-JAX reference (lax.conv, f32) used only as a correctness check.
# ----------------------------------------------------------------------------
def _ref_conv(inp, w, b, horizontal):
    if horizontal:
        kern = w[None, :, :, :]          # (1, 5, Cin, Cout) HWIO
        pad = ((0, 0), (2, 2))
    else:
        kern = w[:, None, :, :]          # (5, 1, Cin, Cout) HWIO
        pad = ((2, 2), (0, 0))
    out = jax.lax.conv_general_dilated(
        inp, kern, window_strides=(1, 1), padding=pad,
        dimension_numbers=("NHWC", "HWIO", "NHWC"))
    return out + b.reshape(1, 1, 1, -1)


def _ref_stage(h, x, wz, wr, wq, bz, br, bq, horizontal):
    hx = jnp.concatenate([h, x], axis=-1)
    z = jax.nn.sigmoid(_ref_conv(hx, wz, bz, horizontal))
    r = jax.nn.sigmoid(_ref_conv(hx, wr, br, horizontal))
    q = jnp.tanh(_ref_conv(jnp.concatenate([r * h, x], axis=-1),
                           wq, bq, horizontal))
    return (1.0 - z) * h + z * q


def sepconv_gru_reference(h, x, p):
    h = _ref_stage(h, x, p["wz1"], p["wr1"], p["wq1"],
                   p["bz1"], p["br1"], p["bq1"], horizontal=True)
    h = _ref_stage(h, x, p["wz2"], p["wr2"], p["wq2"],
                   p["bz2"], p["br2"], p["bq2"], horizontal=False)
    return h


# ----------------------------------------------------------------------------
# Main
# ----------------------------------------------------------------------------
if __name__ == "__main__":
    B, H, W = 2, 8, 16
    hidden_dim, input_dim = 32, 48
    Cin = hidden_dim + input_dim

    key = jax.random.PRNGKey(0)
    keys = jax.random.split(key, 16)

    def w_init(k):
        return 0.1 * jax.random.normal(k, (5, Cin, hidden_dim), jnp.float32)

    def b_init(k):
        return 0.1 * jax.random.normal(k, (hidden_dim,), jnp.float32)

    params = {
        "wz1": w_init(keys[0]), "wr1": w_init(keys[1]), "wq1": w_init(keys[2]),
        "bz1": b_init(keys[3]), "br1": b_init(keys[4]), "bq1": b_init(keys[5]),
        "wz2": w_init(keys[6]), "wr2": w_init(keys[7]), "wq2": w_init(keys[8]),
        "bz2": b_init(keys[9]), "br2": b_init(keys[10]), "bq2": b_init(keys[11]),
    }

    h0 = jax.random.normal(keys[12], (B, H, W, hidden_dim), jnp.float32)
    x0 = jax.random.normal(keys[13], (B, H, W, input_dim), jnp.float32)

    out = jax.block_until_ready(sepconv_gru_forward(h0, x0, params))
    ref = jax.block_until_ready(sepconv_gru_reference(h0, x0, params))

    assert out.shape == (B, H, W, hidden_dim)
    # bf16 MXU inputs + approx reciprocal in sigmoid -> relaxed tolerance.
    assert jnp.allclose(out, ref, atol=5e-2, rtol=5e-2), (
        f"max abs err = {jnp.max(jnp.abs(out - ref))}")

    print("KERNEL_OK")
</pallas_src>

<mosaic_0001>
module attributes {stable_mosaic.version = 11 : i64} {
  func.func @_sepconv_gru_kernel(%arg0: i32, %arg1: memref<1x8x16x32xf32, #tpu.memory_space<vmem>>, %arg2: memref<1x8x16x48xf32, #tpu.memory_space<vmem>>, %arg3: memref<240x96xbf16, #tpu.memory_space<vmem>>, %arg4: memref<160x64xbf16, #tpu.memory_space<vmem>>, %arg5: memref<160x32xbf16, #tpu.memory_space<vmem>>, %arg6: memref<1x96xf32, #tpu.memory_space<vmem>>, %arg7: memref<240x96xbf16, #tpu.memory_space<vmem>>, %arg8: memref<160x64xbf16, #tpu.memory_space<vmem>>, %arg9: memref<160x32xbf16, #tpu.memory_space<vmem>>, %arg10: memref<1x96xf32, #tpu.memory_space<vmem>>, %arg11: memref<1x8x512xf32, #tpu.memory_space<vmem>>) attributes {dimension_semantics = [#tpu.dimension_semantics<parallel>], iteration_bounds = array<i64: 2>, scalar_prefetch = 0 : i64, scratch_operands = 0 : i64, tpu.core_type = #tpu.core_type<tc>, window_params = [{transform_indices = @transform_0, window_bounds = array<i64: 1, 8, 16, 32>}, {transform_indices = @transform_1, window_bounds = array<i64: 1, 8, 16, 48>}, {pipeline_mode = #tpu.pipeline_mode<synchronous>, transform_indices = @transform_2, window_bounds = array<i64: 240, 96>}, {pipeline_mode = #tpu.pipeline_mode<synchronous>, transform_indices = @transform_3, window_bounds = array<i64: 160, 64>}, {pipeline_mode = #tpu.pipeline_mode<synchronous>, transform_indices = @transform_4, window_bounds = array<i64: 160, 32>}, {pipeline_mode = #tpu.pipeline_mode<synchronous>, transform_indices = @transform_5, window_bounds = array<i64: 1, 96>}, {pipeline_mode = #tpu.pipeline_mode<synchronous>, transform_indices = @transform_6, window_bounds = array<i64: 240, 96>}, {pipeline_mode = #tpu.pipeline_mode<synchronous>, transform_indices = @transform_7, window_bounds = array<i64: 160, 64>}, {pipeline_mode = #tpu.pipeline_mode<synchronous>, transform_indices = @transform_8, window_bounds = array<i64: 160, 32>}, {pipeline_mode = #tpu.pipeline_mode<synchronous>, transform_indices = @transform_9, window_bounds = array<i64: 1, 96>}, {transform_indices = @transform_10, window_bounds = array<i64: 1, 8, 512>}]} {
    %c0 = arith.constant 0 : index
    %c0_0 = arith.constant 0 : index
    %c0_1 = arith.constant 0 : index
    %c0_2 = arith.constant 0 : index
    %0 = vector.load %arg1[%c0, %c0_0, %c0_1, %c0_2] : memref<1x8x16x32xf32, #tpu.memory_space<vmem>>, vector<1x8x16x32xf32>
    %1 = vector.shape_cast %0 : vector<1x8x16x32xf32> to vector<8x16x32xf32>
    %c0_3 = arith.constant 0 : index
    %c0_4 = arith.constant 0 : index
    %c0_5 = arith.constant 0 : index
    %c0_6 = arith.constant 0 : index
    %2 = vector.load %arg2[%c0_3, %c0_4, %c0_5, %c0_6] : memref<1x8x16x48xf32, #tpu.memory_space<vmem>>, vector<1x8x16x48xf32>
    %3 = vector.shape_cast %2 : vector<1x8x16x48xf32> to vector<8x16x48xf32>
    %4 = arith.truncf %3 : vector<8x16x48xf32> to vector<8x16x48xbf16>
    %cst = arith.constant 0.000000e+00 : bf16
    %5 = vector.broadcast %cst : bf16 to vector<8x2x48xbf16>
    %6 = tpu.concatenate %5, %4, %5 in 1 : vector<8x2x48xbf16>, vector<8x16x48xbf16>, vector<8x2x48xbf16> -> vector<8x20x48xbf16>
    %7 = vector.extract_strided_slice %6 {offsets = [0, 0, 0], sizes = [8, 16, 48], strides = [1, 1, 1]} : vector<8x20x48xbf16> to vector<8x16x48xbf16>
    %8 = vector.extract_strided_slice %6 {offsets = [0, 1, 0], sizes = [8, 16, 48], strides = [1, 1, 1]} : vector<8x20x48xbf16> to vector<8x16x48xbf16>
    %9 = vector.extract_strided_slice %6 {offsets = [0, 2, 0], sizes = [8, 16, 48], strides = [1, 1, 1]} : vector<8x20x48xbf16> to vector<8x16x48xbf16>
    %10 = vector.extract_strided_slice %6 {offsets = [0, 3, 0], sizes = [8, 16, 48], strides = [1, 1, 1]} : vector<8x20x48xbf16> to vector<8x16x48xbf16>
    %11 = vector.extract_strided_slice %6 {offsets = [0, 4, 0], sizes = [8, 16, 48], strides = [1, 1, 1]} : vector<8x20x48xbf16> to vector<8x16x48xbf16>
    %12 = tpu.concatenate %7, %8, %9, %10, %11 in 2 : vector<8x16x48xbf16>, vector<8x16x48xbf16>, vector<8x16x48xbf16>, vector<8x16x48xbf16>, vector<8x16x48xbf16> -> vector<8x16x240xbf16>
    %13 = vector.shape_cast %12 : vector<8x16x240xbf16> to vector<128x240xbf16>
    %14 = arith.truncf %1 : vector<8x16x32xf32> to vector<8x16x32xbf16>
    %cst_7 = arith.constant 0.000000e+00 : bf16
    %15 = vector.broadcast %cst_7 : bf16 to vector<8x2x32xbf16>
    %16 = tpu.concatenate %15, %14, %15 in 1 : vector<8x2x32xbf16>, vector<8x16x32xbf16>, vector<8x2x32xbf16> -> vector<8x20x32xbf16>
    %17 = vector.extract_strided_slice %16 {offsets = [0, 0, 0], sizes = [8, 16, 32], strides = [1, 1, 1]} : vector<8x20x32xbf16> to vector<8x16x32xbf16>
    %18 = vector.extract_strided_slice %16 {offsets = [0, 1, 0], sizes = [8, 16, 32], strides = [1, 1, 1]} : vector<8x20x32xbf16> to vector<8x16x32xbf16>
    %19 = vector.extract_strided_slice %16 {offsets = [0, 2, 0], sizes = [8, 16, 32], strides = [1, 1, 1]} : vector<8x20x32xbf16> to vector<8x16x32xbf16>
    %20 = vector.extract_strided_slice %16 {offsets = [0, 3, 0], sizes = [8, 16, 32], strides = [1, 1, 1]} : vector<8x20x32xbf16> to vector<8x16x32xbf16>
    %21 = vector.extract_strided_slice %16 {offsets = [0, 4, 0], sizes = [8, 16, 32], strides = [1, 1, 1]} : vector<8x20x32xbf16> to vector<8x16x32xbf16>
    %22 = tpu.concatenate %17, %18, %19, %20, %21 in 2 : vector<8x16x32xbf16>, vector<8x16x32xbf16>, vector<8x16x32xbf16>, vector<8x16x32xbf16>, vector<8x16x32xbf16> -> vector<8x16x160xbf16>
    %23 = vector.shape_cast %22 : vector<8x16x160xbf16> to vector<128x160xbf16>
    %c0_8 = arith.constant 0 : index
    %c0_9 = arith.constant 0 : index
    %24 = vector.load %arg6[%c0_8, %c0_9] : memref<1x96xf32, #tpu.memory_space<vmem>>, vector<1x96xf32>
    %c0_10 = arith.constant 0 : index
    %c0_11 = arith.constant 0 : index
    %25 = vector.load %arg3[%c0_10, %c0_11] : memref<240x96xbf16, #tpu.memory_space<vmem>>, vector<240x96xbf16>
    %cst_12 = arith.constant dense<0.000000e+00> : vector<128x96xf32>
    %26 = tpu.matmul %13, %25, %cst_12 {dimension_numbers = #tpu.dot_dimension_numbers<[1], [0], [0], [1], [0, 0, 1, 1], [], []>} : vector<128x240xbf16>, vector<240x96xbf16>, vector<128x96xf32> -> vector<128x96xf32>
    %c0_13 = arith.constant 0 : index
    %c0_14 = arith.constant 0 : index
    %27 = vector.load %arg4[%c0_13, %c0_14] : memref<160x64xbf16, #tpu.memory_space<vmem>>, vector<160x64xbf16>
    %cst_15 = arith.constant dense<0.000000e+00> : vector<128x64xf32>
    %28 = tpu.matmul %23, %27, %cst_15 {dimension_numbers = #tpu.dot_dimension_numbers<[1], [0], [0], [1], [0, 0, 1, 1], [], []>} : vector<128x160xbf16>, vector<160x64xbf16>, vector<128x64xf32> -> vector<128x64xf32>
    %29 = vector.extract_strided_slice %26 {offsets = [0, 0], sizes = [128, 64], strides = [1, 1]} : vector<128x96xf32> to vector<128x64xf32>
    %30 = arith.addf %28, %29 : vector<128x64xf32>
    %31 = vector.extract_strided_slice %24 {offsets = [0, 0], sizes = [1, 64], strides = [1, 1]} : vector<1x96xf32> to vector<1x64xf32>
    %32 = vector.broadcast %31 : vector<1x64xf32> to vector<128x64xf32>
    %33 = arith.addf %30, %32 : vector<128x64xf32>
    %34 = vector.extract_strided_slice %33 {offsets = [0, 0], sizes = [128, 32], strides = [1, 1]} : vector<128x64xf32> to vector<128x32xf32>
    %cst_16 = arith.constant 0.000000e+00 : f32
    %35 = vector.broadcast %cst_16 : f32 to vector<128x32xf32>
    %36 = arith.subf %35, %34 : vector<128x32xf32>
    %37 = math.exp %36 : vector<128x32xf32>
    %cst_17 = arith.constant 1.000000e+00 : f32
    %38 = vector.broadcast %cst_17 : f32 to vector<128x32xf32>
    %39 = arith.addf %38, %37 : vector<128x32xf32>
    %40 = tpu.reciprocal %39 {approx = true} : vector<128x32xf32> -> vector<128x32xf32>
    %41 = vector.shape_cast %40 : vector<128x32xf32> to vector<8x16x32xf32>
    %42 = vector.extract_strided_slice %33 {offsets = [0, 32], sizes = [128, 32], strides = [1, 1]} : vector<128x64xf32> to vector<128x32xf32>
    %cst_18 = arith.constant 0.000000e+00 : f32
    %43 = vector.broadcast %cst_18 : f32 to vector<128x32xf32>
    %44 = arith.subf %43, %42 : vector<128x32xf32>
    %45 = math.exp %44 : vector<128x32xf32>
    %cst_19 = arith.constant 1.000000e+00 : f32
    %46 = vector.broadcast %cst_19 : f32 to vector<128x32xf32>
    %47 = arith.addf %46, %45 : vector<128x32xf32>
    %48 = tpu.reciprocal %47 {approx = true} : vector<128x32xf32> -> vector<128x32xf32>
    %49 = vector.shape_cast %48 : vector<128x32xf32> to vector<8x16x32xf32>
    %50 = arith.mulf %49, %1 : vector<8x16x32xf32>
    %51 = arith.truncf %50 : vector<8x16x32xf32> to vector<8x16x32xbf16>
    %cst_20 = arith.constant 0.000000e+00 : bf16
    %52 = vector.broadcast %cst_20 : bf16 to vector<8x2x32xbf16>
    %53 = tpu.concatenate %52, %51, %52 in 1 : vector<8x2x32xbf16>, vector<8x16x32xbf16>, vector<8x2x32xbf16> -> vector<8x20x32xbf16>
    %54 = vector.extract_strided_slice %53 {offsets = [0, 0, 0], sizes = [8, 16, 32], strides = [1, 1, 1]} : vector<8x20x32xbf16> to vector<8x16x32xbf16>
    %55 = vector.extract_strided_slice %53 {offsets = [0, 1, 0], sizes = [8, 16, 32], strides = [1, 1, 1]} : vector<8x20x32xbf16> to vector<8x16x32xbf16>
    %56 = vector.extract_strided_slice %53 {offsets = [0, 2, 0], sizes = [8, 16, 32], strides = [1, 1, 1]} : vector<8x20x32xbf16> to vector<8x16x32xbf16>
    %57 = vector.extract_strided_slice %53 {offsets = [0, 3, 0], sizes = [8, 16, 32], strides = [1, 1, 1]} : vector<8x20x32xbf16> to vector<8x16x32xbf16>
    %58 = vector.extract_strided_slice %53 {offsets = [0, 4, 0], sizes = [8, 16, 32], strides = [1, 1, 1]} : vector<8x20x32xbf16> to vector<8x16x32xbf16>
    %59 = tpu.concatenate %54, %55, %56, %57, %58 in 2 : vector<8x16x32xbf16>, vector<8x16x32xbf16>, vector<8x16x32xbf16>, vector<8x16x32xbf16>, vector<8x16x32xbf16> -> vector<8x16x160xbf16>
    %60 = vector.shape_cast %59 : vector<8x16x160xbf16> to vector<128x160xbf16>
    %c0_21 = arith.constant 0 : index
    %c0_22 = arith.constant 0 : index
    %61 = vector.load %arg5[%c0_21, %c0_22] : memref<160x32xbf16, #tpu.memory_space<vmem>>, vector<160x32xbf16>
    %cst_23 = arith.constant dense<0.000000e+00> : vector<128x32xf32>
    %62 = tpu.matmul %60, %61, %cst_23 {dimension_numbers = #tpu.dot_dimension_numbers<[1], [0], [0], [1], [0, 0, 1, 1], [], []>} : vector<128x160xbf16>, vector<160x32xbf16>, vector<128x32xf32> -> vector<128x32xf32>
    %63 = vector.extract_strided_slice %26 {offsets = [0, 64], sizes = [128, 32], strides = [1, 1]} : vector<128x96xf32> to vector<128x32xf32>
    %64 = arith.addf %62, %63 : vector<128x32xf32>
    %65 = vector.extract_strided_slice %24 {offsets = [0, 64], sizes = [1, 32], strides = [1, 1]} : vector<1x96xf32> to vector<1x32xf32>
    %66 = vector.broadcast %65 : vector<1x32xf32> to vector<128x32xf32>
    %67 = arith.addf %64, %66 : vector<128x32xf32>
    %68 = math.tanh %67 : vector<128x32xf32>
    %69 = vector.shape_cast %68 : vector<128x32xf32> to vector<8x16x32xf32>
    %cst_24 = arith.constant 1.000000e+00 : f32
    %70 = vector.broadcast %cst_24 : f32 to vector<8x16x32xf32>
    %71 = arith.subf %70, %41 : vector<8x16x32xf32>
    %72 = arith.mulf %71, %1 : vector<8x16x32xf32>
    %73 = arith.mulf %41, %69 : vector<8x16x32xf32>
    %74 = arith.addf %72, %73 : vector<8x16x32xf32>
    %cst_25 = arith.constant 0.000000e+00 : bf16
    %75 = vector.broadcast %cst_25 : bf16 to vector<2x16x48xbf16>
    %76 = tpu.concatenate %75, %4, %75 in 0 : vector<2x16x48xbf16>, vector<8x16x48xbf16>, vector<2x16x48xbf16> -> vector<12x16x48xbf16>
    %77 = vector.extract_strided_slice %76 {offsets = [0, 0, 0], sizes = [8, 16, 48], strides = [1, 1, 1]} : vector<12x16x48xbf16> to vector<8x16x48xbf16>
    %78 = vector.extract_strided_slice %76 {offsets = [1, 0, 0], sizes = [8, 16, 48], strides = [1, 1, 1]} : vector<12x16x48xbf16> to vector<8x16x48xbf16>
    %79 = vector.extract_strided_slice %76 {offsets = [2, 0, 0], sizes = [8, 16, 48], strides = [1, 1, 1]} : vector<12x16x48xbf16> to vector<8x16x48xbf16>
    %80 = vector.extract_strided_slice %76 {offsets = [3, 0, 0], sizes = [8, 16, 48], strides = [1, 1, 1]} : vector<12x16x48xbf16> to vector<8x16x48xbf16>
    %81 = vector.extract_strided_slice %76 {offsets = [4, 0, 0], sizes = [8, 16, 48], strides = [1, 1, 1]} : vector<12x16x48xbf16> to vector<8x16x48xbf16>
    %82 = tpu.concatenate %77, %78, %79, %80, %81 in 2 : vector<8x16x48xbf16>, vector<8x16x48xbf16>, vector<8x16x48xbf16>, vector<8x16x48xbf16>, vector<8x16x48xbf16> -> vector<8x16x240xbf16>
    %83 = vector.shape_cast %82 : vector<8x16x240xbf16> to vector<128x240xbf16>
    %84 = arith.truncf %74 : vector<8x16x32xf32> to vector<8x16x32xbf16>
    %cst_26 = arith.constant 0.000000e+00 : bf16
    %85 = vector.broadcast %cst_26 : bf16 to vector<2x16x32xbf16>
    %86 = tpu.concatenate %85, %84, %85 in 0 : vector<2x16x32xbf16>, vector<8x16x32xbf16>, vector<2x16x32xbf16> -> vector<12x16x32xbf16>
    %87 = vector.extract_strided_slice %86 {offsets = [0, 0, 0], sizes = [8, 16, 32], strides = [1, 1, 1]} : vector<12x16x32xbf16> to vector<8x16x32xbf16>
    %88 = vector.extract_strided_slice %86 {offsets = [1, 0, 0], sizes = [8, 16, 32], strides = [1, 1, 1]} : vector<12x16x32xbf16> to vector<8x16x32xbf16>
    %89 = vector.extract_strided_slice %86 {offsets = [2, 0, 0], sizes = [8, 16, 32], strides = [1, 1, 1]} : vector<12x16x32xbf16> to vector<8x16x32xbf16>
    %90 = vector.extract_strided_slice %86 {offsets = [3, 0, 0], sizes = [8, 16, 32], strides = [1, 1, 1]} : vector<12x16x32xbf16> to vector<8x16x32xbf16>
    %91 = vector.extract_strided_slice %86 {offsets = [4, 0, 0], sizes = [8, 16, 32], strides = [1, 1, 1]} : vector<12x16x32xbf16> to vector<8x16x32xbf16>
    %92 = tpu.concatenate %87, %88, %89, %90, %91 in 2 : vector<8x16x32xbf16>, vector<8x16x32xbf16>, vector<8x16x32xbf16>, vector<8x16x32xbf16>, vector<8x16x32xbf16> -> vector<8x16x160xbf16>
    %93 = vector.shape_cast %92 : vector<8x16x160xbf16> to vector<128x160xbf16>
    %c0_27 = arith.constant 0 : index
    %c0_28 = arith.constant 0 : index
    %94 = vector.load %arg10[%c0_27, %c0_28] : memref<1x96xf32, #tpu.memory_space<vmem>>, vector<1x96xf32>
    %c0_29 = arith.constant 0 : index
    %c0_30 = arith.constant 0 : index
    %95 = vector.load %arg7[%c0_29, %c0_30] : memref<240x96xbf16, #tpu.memory_space<vmem>>, vector<240x96xbf16>
    %cst_31 = arith.constant dense<0.000000e+00> : vector<128x96xf32>
    %96 = tpu.matmul %83, %95, %cst_31 {dimension_numbers = #tpu.dot_dimension_numbers<[1], [0], [0], [1], [0, 0, 1, 1], [], []>} : vector<128x240xbf16>, vector<240x96xbf16>, vector<128x96xf32> -> vector<128x96xf32>
    %c0_32 = arith.constant 0 : index
    %c0_33 = arith.constant 0 : index
    %97 = vector.load %arg8[%c0_32, %c0_33] : memref<160x64xbf16, #tpu.memory_space<vmem>>, vector<160x64xbf16>
    %cst_34 = arith.constant dense<0.000000e+00> : vector<128x64xf32>
    %98 = tpu.matmul %93, %97, %cst_34 {dimension_numbers = #tpu.dot_dimension_numbers<[1], [0], [0], [1], [0, 0, 1, 1], [], []>} : vector<128x160xbf16>, vector<160x64xbf16>, vector<128x64xf32> -> vector<128x64xf32>
    %99 = vector.extract_strided_slice %96 {offsets = [0, 0], sizes = [128, 64], strides = [1, 1]} : vector<128x96xf32> to vector<128x64xf32>
    %100 = arith.addf %98, %99 : vector<128x64xf32>
    %101 = vector.extract_strided_slice %94 {offsets = [0, 0], sizes = [1, 64], strides = [1, 1]} : vector<1x96xf32> to vector<1x64xf32>
    %102 = vector.broadcast %101 : vector<1x64xf32> to vector<128x64xf32>
    %103 = arith.addf %100, %102 : vector<128x64xf32>
    %104 = vector.extract_strided_slice %103 {offsets = [0, 0], sizes = [128, 32], strides = [1, 1]} : vector<128x64xf32> to vector<128x32xf32>
    %cst_35 = arith.constant 0.000000e+00 : f32
    %105 = vector.broadcast %cst_35 : f32 to vector<128x32xf32>
    %106 = arith.subf %105, %104 : vector<128x32xf32>
    %107 = math.exp %106 : vector<128x32xf32>
    %cst_36 = arith.constant 1.000000e+00 : f32
    %108 = vector.broadcast %cst_36 : f32 to vector<128x32xf32>
    %109 = arith.addf %108, %107 : vector<128x32xf32>
    %110 = tpu.reciprocal %109 {approx = true} : vector<128x32xf32> -> vector<128x32xf32>
    %111 = vector.shape_cast %110 : vector<128x32xf32> to vector<8x16x32xf32>
    %112 = vector.extract_strided_slice %103 {offsets = [0, 32], sizes = [128, 32], strides = [1, 1]} : vector<128x64xf32> to vector<128x32xf32>
    %cst_37 = arith.constant 0.000000e+00 : f32
    %113 = vector.broadcast %cst_37 : f32 to vector<128x32xf32>
    %114 = arith.subf %113, %112 : vector<128x32xf32>
    %115 = math.exp %114 : vector<128x32xf32>
    %cst_38 = arith.constant 1.000000e+00 : f32
    %116 = vector.broadcast %cst_38 : f32 to vector<128x32xf32>
    %117 = arith.addf %116, %115 : vector<128x32xf32>
    %118 = tpu.reciprocal %117 {approx = true} : vector<128x32xf32> -> vector<128x32xf32>
    %119 = vector.shape_cast %118 : vector<128x32xf32> to vector<8x16x32xf32>
    %120 = arith.mulf %119, %74 : vector<8x16x32xf32>
    %121 = arith.truncf %120 : vector<8x16x32xf32> to vector<8x16x32xbf16>
    %cst_39 = arith.constant 0.000000e+00 : bf16
    %122 = vector.broadcast %cst_39 : bf16 to vector<2x16x32xbf16>
    %123 = tpu.concatenate %122, %121, %122 in 0 : vector<2x16x32xbf16>, vector<8x16x32xbf16>, vector<2x16x32xbf16> -> vector<12x16x32xbf16>
    %124 = vector.extract_strided_slice %123 {offsets = [0, 0, 0], sizes = [8, 16, 32], strides = [1, 1, 1]} : vector<12x16x32xbf16> to vector<8x16x32xbf16>
    %125 = vector.extract_strided_slice %123 {offsets = [1, 0, 0], sizes = [8, 16, 32], strides = [1, 1, 1]} : vector<12x16x32xbf16> to vector<8x16x32xbf16>
    %126 = vector.extract_strided_slice %123 {offsets = [2, 0, 0], sizes = [8, 16, 32], strides = [1, 1, 1]} : vector<12x16x32xbf16> to vector<8x16x32xbf16>
    %127 = vector.extract_strided_slice %123 {offsets = [3, 0, 0], sizes = [8, 16, 32], strides = [1, 1, 1]} : vector<12x16x32xbf16> to vector<8x16x32xbf16>
    %128 = vector.extract_strided_slice %123 {offsets = [4, 0, 0], sizes = [8, 16, 32], strides = [1, 1, 1]} : vector<12x16x32xbf16> to vector<8x16x32xbf16>
    %129 = tpu.concatenate %124, %125, %126, %127, %128 in 2 : vector<8x16x32xbf16>, vector<8x16x32xbf16>, vector<8x16x32xbf16>, vector<8x16x32xbf16>, vector<8x16x32xbf16> -> vector<8x16x160xbf16>
    %130 = vector.shape_cast %129 : vector<8x16x160xbf16> to vector<128x160xbf16>
    %c0_40 = arith.constant 0 : index
    %c0_41 = arith.constant 0 : index
    %131 = vector.load %arg9[%c0_40, %c0_41] : memref<160x32xbf16, #tpu.memory_space<vmem>>, vector<160x32xbf16>
    %cst_42 = arith.constant dense<0.000000e+00> : vector<128x32xf32>
    %132 = tpu.matmul %130, %131, %cst_42 {dimension_numbers = #tpu.dot_dimension_numbers<[1], [0], [0], [1], [0, 0, 1, 1], [], []>} : vector<128x160xbf16>, vector<160x32xbf16>, vector<128x32xf32> -> vector<128x32xf32>
    %133 = vector.extract_strided_slice %96 {offsets = [0, 64], sizes = [128, 32], strides = [1, 1]} : vector<128x96xf32> to vector<128x32xf32>
    %134 = arith.addf %132, %133 : vector<128x32xf32>
    %135 = vector.extract_strided_slice %94 {offsets = [0, 64], sizes = [1, 32], strides = [1, 1]} : vector<1x96xf32> to vector<1x32xf32>
    %136 = vector.broadcast %135 : vector<1x32xf32> to vector<128x32xf32>
    %137 = arith.addf %134, %136 : vector<128x32xf32>
    %138 = math.tanh %137 : vector<128x32xf32>
    %139 = vector.shape_cast %138 : vector<128x32xf32> to vector<8x16x32xf32>
    %cst_43 = arith.constant 1.000000e+00 : f32
    %140 = vector.broadcast %cst_43 : f32 to vector<8x16x32xf32>
    %141 = arith.subf %140, %111 : vector<8x16x32xf32>
    %142 = arith.mulf %141, %74 : vector<8x16x32xf32>
    %143 = arith.mulf %111, %139 : vector<8x16x32xf32>
    %144 = arith.addf %142, %143 : vector<8x16x32xf32>
    %145 = vector.shape_cast %144 : vector<8x16x32xf32> to vector<8x512xf32>
    %c0_44 = arith.constant 0 : index
    %c0_45 = arith.constant 0 : index
    %c0_46 = arith.constant 0 : index
    %146 = vector.load %arg11[%c0_44, %c0_45, %c0_46] : memref<1x8x512xf32, #tpu.memory_space<vmem>>, vector<1x8x512xf32>
    %147 = vector.shape_cast %146 : vector<1x8x512xf32> to vector<8x512xf32>
    %148 = vector.shape_cast %145 : vector<8x512xf32> to vector<1x8x512xf32>
    tpu.vector_store %arg11[%c0_44, %c0_45, %c0_46], %148 {strides = array<i32>} : memref<1x8x512xf32, #tpu.memory_space<vmem>>, vector<1x8x512xf32>,
    return
  }
  func.func @transform_0(%arg0: i32) -> (i32, i32, i32, i32) {
    %c0_i32 = arith.constant 0 : i32
    %c0_i32_0 = arith.constant 0 : i32
    %c0_i32_1 = arith.constant 0 : i32
    %c0_i32_2 = arith.constant 0 : i32
    return %arg0, %c0_i32, %c0_i32_0, %c0_i32_1 : i32, i32, i32, i32
  }
  func.func @transform_1(%arg0: i32) -> (i32, i32, i32, i32) {
    %c0_i32 = arith.constant 0 : i32
    %c0_i32_0 = arith.constant 0 : i32
    %c0_i32_1 = arith.constant 0 : i32
    %c0_i32_2 = arith.constant 0 : i32
    return %arg0, %c0_i32, %c0_i32_0, %c0_i32_1 : i32, i32, i32, i32
  }
  func.func @transform_2(%arg0: i32) -> (i32, i32) {
    %c0_i32 = arith.constant 0 : i32
    %c0_i32_0 = arith.constant 0 : i32
    %c0_i32_1 = arith.constant 0 : i32
    return %c0_i32, %c0_i32_0 : i32, i32
  }
  func.func @transform_3(%arg0: i32) -> (i32, i32) {
    %c0_i32 = arith.constant 0 : i32
    %c0_i32_0 = arith.constant 0 : i32
    %c0_i32_1 = arith.constant 0 : i32
    return %c0_i32, %c0_i32_0 : i32, i32
  }
  func.func @transform_4(%arg0: i32) -> (i32, i32) {
    %c0_i32 = arith.constant 0 : i32
    %c0_i32_0 = arith.constant 0 : i32
    %c0_i32_1 = arith.constant 0 : i32
    return %c0_i32, %c0_i32_0 : i32, i32
  }
  func.func @transform_5(%arg0: i32) -> (i32, i32) {
    %c0_i32 = arith.constant 0 : i32
    %c0_i32_0 = arith.constant 0 : i32
    %c0_i32_1 = arith.constant 0 : i32
    return %c0_i32, %c0_i32_0 : i32, i32
  }
  func.func @transform_6(%arg0: i32) -> (i32, i32) {
    %c0_i32 = arith.constant 0 : i32
    %c0_i32_0 = arith.constant 0 : i32
    %c0_i32_1 = arith.constant 0 : i32
    return %c0_i32, %c0_i32_0 : i32, i32
  }
  func.func @transform_7(%arg0: i32) -> (i32, i32) {
    %c0_i32 = arith.constant 0 : i32
    %c0_i32_0 = arith.constant 0 : i32
    %c0_i32_1 = arith.constant 0 : i32
    return %c0_i32, %c0_i32_0 : i32, i32
  }
  func.func @transform_8(%arg0: i32) -> (i32, i32) {
    %c0_i32 = arith.constant 0 : i32
    %c0_i32_0 = arith.constant 0 : i32
    %c0_i32_1 = arith.constant 0 : i32
    return %c0_i32, %c0_i32_0 : i32, i32
  }
  func.func @transform_9(%arg0: i32) -> (i32, i32) {
    %c0_i32 = arith.constant 0 : i32
    %c0_i32_0 = arith.constant 0 : i32
    %c0_i32_1 = arith.constant 0 : i32
    return %c0_i32, %c0_i32_0 : i32, i32
  }
  func.func @transform_10(%arg0: i32) -> (i32, i32, i32) {
    %c0_i32 = arith.constant 0 : i32
    %c0_i32_0 = arith.constant 0 : i32
    %c0_i32_1 = arith.constant 0 : i32
    return %arg0, %c0_i32, %c0_i32_0 : i32, i32, i32
  }
}

</mosaic_0001>

<bundles_post_ra>
// kernel: tpu_custom_call.1
= control target key start
LH: loop header
LB: loop body
LE: loop exit
PB: predicated region body
PF: predicated region fallthrough
CT: control target
= control target key end

     0   :  { %15 = vsyncpa [#allocation3], 0  ;;  %s7166_s0 = inlined_call_operand.vmem [shape: f32[2,8,16,32], index: 0, kind: input, shape index: {}]   ;;  %s7167_s1 = inlined_call_operand.vmem [shape: f32[2,8,16,48], index: 1, kind: input, shape index: {}]   ;;  %s7168_s2 = inlined_call_operand.vmem [shape: bf16[240,96], index: 2, kind: input, shape index: {}]   ;;  %s7169_s3 = inlined_call_operand.vmem [shape: bf16[160,64], index: 3, kind: input, shape index: {}]   ;;  %s7170_s4 = inlined_call_operand.vmem [shape: bf16[160,32], index: 4, kind: input, shape index: {}]   ;;  %s7171_s5 = inlined_call_operand.vmem [shape: f32[1,96], index: 5, kind: input, shape index: {}]   ;;  %s7172_s6 = inlined_call_operand.vmem [shape: bf16[240,96], index: 6, kind: input, shape index: {}]   ;;  %s7173_s7 = inlined_call_operand.vmem [shape: bf16[160,64], index: 7, kind: input, shape index: {}]   ;;  %s7174_s8 = inlined_call_operand.vmem [shape: bf16[160,32], index: 8, kind: input, shape index: {}]   ;;  %s7175_s9 = inlined_call_operand.vmem [shape: f32[1,96], index: 9, kind: input, shape index: {}]   ;;  %s7176_s10 = inlined_call_operand.hbm [shape: f32[2,8,512], index: 10, kind: output, shape index: {}]  }
   0x1   :  { %17 = vsyncpa [#allocation3 + $0x1], 0  ;;  %s4954_s13 = smov 0   ;;  %s4956_s14 = smov 0  }
   0x2   :  { %s4958_s15 = smov 0   ;;  %s4960_s16 = smov 0  }
   0x3 LB: > { %s4975_s17 = sadd.s32 4294967295, %s4888_s16   ;;  %s4342_s18 = sadd.s32 4294967294, %s4888_s16   ;;  %s4888_s16 = sphi %s4960_s16, %s7244_s16   ;;  %s4884_s15 = sphi %s4958_s15, %s7243_s15   ;;  %s4880_s14 = sphi %s4956_s14, %s7242_s14   ;;  %s4876_s13 = sphi %s4954_s13, %s7241_s13  }
   0x4   : > { %s4979_s19 = sadd.s32 1, %s4888_s16   ;;  %s250_s20 = sadd.s32 1, %s4884_s15 }
   0x5   : > { %s247_s21 = ssub.s32 %s4888_s16, %s4979_s19  ;;  %p260_p0 = scmp.ne.s32.totalorder %s4884_s15, %s4880_s14 }
   0x6   : > { %p248_p1 = scmp.eq.s32.totalorder %s247_s21, 0  ;;  %p261_p2 = scmp.eq.s32.totalorder %s4975_s17, 1 }
   0x7   : > { %p266_p3 = scmp.ne.s32.totalorder %s4880_s14, %s4876_s13  ;;  %p267_p4 = scmp.eq.s32.totalorder %s4342_s18, 1 }
   0x8   : > { %s4990_s22 = scalar_select %p248_p1, %s4884_s15, %s250_s20  }
   0x9   : > { %p4992_p5 = por %p261_p2, %p260_p0  ;;  %p4996_p6 = por %p267_p4, %p266_p3 }
   0xa   : > { %p4345_p7 = scmp.ge.s32.totalorder %s4888_s16, 1  ;;  %p325_p8 = scmp.lt.s32.totalorder %s4888_s16, 3 }
   0xc   : > { %p326_p9 = pnand %p4345_p7, %p325_p8 }
   0xe   : > { %329 = sbr.rel (%p326_p9) target bundleno = 1989 (0x7c5), region = 60 }
  0x15   : > { %p368_p10 = scmp.lt.s32.totalorder %s4975_s17, 1  ;;  %v7177_v0 = vmov 0   ;;  %v4542_v1 = vld [vmem:[%s7168_s2] sm:$0xff]   ;;  %v4543_v2 = vld [vmem:[%s7168_s2 + $0x8] sm:$0xff]   ;;  %v4544_v6 = vld [vmem:[%s7168_s2 + $0x10] sm:$0xff]   ;;  %vm435_vm0 = vcmask 1040384  }
  0x16   : > { %1328 = vmatprep.subr.bf16.mxu0 %v7177_v0  ;;  %1529 = vmatprep.subr.bf16.mxu1 %v7177_v0  ;;  %vm574_vm1 = vcmask 1046528   ;;  %vm704_vm2 = vcmask 1045504   ;;  %vm615_vm3 = vsmask.f32 6400  ;;  %vm461_vm4 = vsmask.f32 7424 }
  0x17   : > { %s369_s25 = scalar_select %p368_p10, %s4975_s17, 1  ;;  %1329 = vmatpush1.bf16.msra.mxu0 %v4542_v1  ;;  %v4545_v37 = vld [vmem:[%s7168_s2 + $0x18] sm:$0xff]   ;;  %v4546_v50 = vld [vmem:[%s7168_s2 + $0x20] sm:$0xff]   ;;  %v4548_v1 = vld [vmem:[%s7168_s2 + $0x28] sm:$0xff]   ;;  %vm1133_vm5 = vcmask 261120   ;;  %vm787_vm6 = vcmask 130048  }
  0x18   : > { %1330 = vmatprep.subr.bf16.mxu0 %v7177_v0  ;;  %s7205_s30 = smov 96   ;;  %s7209_s11 = smov 64   ;;  %v4547_v63 = vld [vmem:[%s7169_s3] sm:$0xff]   ;;  %vm804_vm7 = vcmask 523264   ;;  %vm1311_vm8 = vcmask 916480   ;;  %vm762_vm9 = vcmask 785408  }
  0x19   : > { %s4472_s28 = sshll.u32 %s369_s25, 7  ;;  %1530 = vmatpush1.bf16.msra.mxu1 %v4547_v63  ;;  %s7193_s20 = smov 16   ;;  %vm745_vm10 = vcmask 392192  }
  0x1a   : > { %s5015_s18 = scalar_lea.vmem %s7167_s1, %s4472_s28  ;;  %s5020_s26 = scalar_lea.vmem %s7166_s0, %s4472_s28  ;;  %1531 = vmatprep.subr.bf16.mxu1 %v7177_v0 }
  0x1b   : > { %v395_v3 = vld [vmem:[%s5015_s18] sm:$0xff]  ;;  %v396_v4 = vld [vmem:[%s5015_s18 + $0x8] sm:$0xff]  ;;  %v397_v9 = vld [vmem:[%s5015_s18 + $0x10] sm:$0xff]  ;;  %1331 = vmatpush1.bf16.msra.mxu0 %v4543_v2  ;;  %s7207_s21 = smov 32   ;;  %s7191_s27 = smov 48  }
  0x1c   : > { %v379_v5 = vld [vmem:[%s5020_s26] sm:$0xff]  ;;  %v5029_v7 = vpack.c.bf16 %v396_v4, %v395_v3  ;;  %v380_v8 = vld [vmem:[%s5020_s26 + $0x8] sm:$0xff]  ;;  %v398_v10 = vld [vmem:[%s5015_s18 + $0x18] sm:$0xff]  ;;  %1332 = vmatprep.subr.bf16.mxu0 %v7177_v0  ;;  %s7226_s25 = smov 48   ;;  %s7234_s28 = smov 32  }
  0x1d   : > { %v821_v11 = vpack.c.bf16 %v380_v8, %v379_v5  ;;  %v5034_v12 = vpack.c.bf16 %v398_v10, %v397_v9  ;;  %v381_v13 = vld [vmem:[%s5020_s26 + $0x10] sm:$0xff]  ;;  %v382_v14 = vld [vmem:[%s5020_s26 + $0x18] sm:$0xff]  ;;  %v399_v15 = vld [vmem:[%s5015_s18 + $0x20] sm:$0xff]  ;;  %s4898_s12 = smov [#allocation2]  }
  0x1e   : > { %v427_v16 = vrot.slane %v5029_v7, 7  ;;  %v822_v17 = vpack.c.bf16 %v382_v14, %v381_v13  ;;  %v400_v18 = vld [vmem:[%s5015_s18 + $0x28] sm:$0xff] }
  0x1f   : > { %v837_v19 = vrot.slane %v821_v11, 7  ;;  %v428_v20 = vrot.slane %v5034_v12, 7  ;;  %v5049_v24 = vpack.c.bf16 %v400_v18, %v399_v15  ;;  %1333 = vmatpush1.bf16.msra.mxu0 %v4544_v6  ;;  %v4549_v11 = vld [vmem:[%s7169_s3 + $0x8] sm:$0xff]  }
  0x20   : > { %v5044_v21 = vsel %vm435_vm0, 0, %v427_v16  ;;  %v453_v22 = vsel %vm435_vm0, %v427_v16, 0  ;;  %v5047_v23 = vrot.slane %v822_v17, 7  ;;  %1334 = vmatprep.subr.bf16.mxu0 %v7177_v0  ;;  %1532 = vmatpush1.bf16.msra.mxu1 %v4549_v11 }
  0x21   : > { %7213 = vst [vmem:[#allocation5_spill] sm:$0xff] %v5049_v24  ;;  %v575_v25 = vrot.slane %v5044_v21, 1  ;;  %v576_v26 = vrot.slane %v453_v22, 1  ;;  %v5053_v27 = vsel %vm435_vm0, 0, %v837_v19  ;;  %v5056_v28 = vsel %vm435_vm0, %v837_v19, 0  ;;  %1533 = vmatprep.subr.bf16.mxu1 %v7177_v0 }
  0x22   : > { %v981_v29 = vrot.slane %v5053_v27, 1  ;;  %v982_v30 = vrot.slane %v5056_v28, 1  ;;  %v705_v31 = vrot.slane %v5044_v21, 2  ;;  %v706_v32 = vrot.slane %v453_v22, 2 }
  0x23   : > { %v577_v33 = vsel %vm574_vm1, %v575_v25, %v576_v26  ;;  %v5064_v34 = vsel %vm435_vm0, 0, %v428_v20  ;;  %v5067_v35 = vsel %vm435_vm0, %v428_v20, 0  ;;  %v462_v36 = vshrl.u32 %v5044_v21, 16  ;;  %1335 = vmatpush1.bf16.msra.mxu0 %v4545_v37  ;;  %v384_v25 = vld [vmem:[%s5020_s26 + $0x28] sm:$0xff]  ;;  %v4550_v26 = vld [vmem:[%s7168_s2 + $0x30] sm:$0xff]  }
  0x24   : > { %599 = vrot.lane.b32.xlu0 %v577_v33, %s7205_s30  ;;  %v983_v38 = vsel %vm574_vm1, %v981_v29, %v982_v30  ;;  %v707_v39 = vsel %vm704_vm2, %v705_v31, %v706_v32  ;;  %v578_v40 = vrot.slane %v5064_v34, 1  ;;  %v579_v41 = vrot.slane %v5067_v35, 1  ;;  %1336 = vmatprep.subr.bf16.mxu0 %v7177_v0 }
  0x25   : > { %1005 = vrot.lane.b32.xlu1 %v983_v38, %s7209_s11  ;;  %v464_v42 = vshll.u32 %v5044_v21, 16  ;;  %v468_v43 = vshll.u32 %v453_v22, 16  ;;  %v616_v44 = vrot.slane %v462_v36, 1  ;;  %v619_v45 = vshrl.u32 %v453_v22, 16  ;;  %v383_v22 = vld [vmem:[%s5020_s26 + $0x20] sm:$0xff] }
  0x26   : > { %v580_v46 = vsel %vm574_vm1, %v578_v40, %v579_v41  ;;  %v869_v47 = vshrl.u32 %v5053_v27, 16  ;;  %v871_v48 = vshll.u32 %v5053_v27, 16  ;;  %v875_v49 = vshll.u32 %v5056_v28, 16  ;;  %v4551_v40 = vld [vmem:[%s7169_s3 + $0x10] sm:$0xff]  }
  0x27   : > { %v617_v51 = vrot.slane %v464_v42, 2  ;;  %v621_v52 = vrot.slane %v619_v45, 1  ;;  %v622_v53 = vrot.slane %v468_v43, 2  ;;  %v1024_v54 = vshrl.u32 %v5056_v28, 16  ;;  %1337 = vmatpush1.bf16.msra.mxu0 %v4546_v50  ;;  %v4552_v45 = vld [vmem:[%s7168_s2 + $0x38] sm:$0xff]   ;;  %1534 = vmatpush1.bf16.msra.mxu1 %v4551_v40 }
  0x28   : > { %729 = vrot.lane.b32.xlu0 %v707_v39, %s7209_s11  ;;  %v873_v55 = vrot.slane %v871_v48, 1  ;;  %v877_v56 = vrot.slane %v875_v49, 1  ;;  %v1021_v57 = vrot.slane %v869_v47, 1  ;;  %v1022_v58 = vrot.slane %v871_v48, 2  ;;  %1338 = vmatprep.subr.bf16.mxu0 %v7177_v0  ;;  %v401_v39 = vld [vmem:[%s5015_s18 + $0x30] sm:$0xff] }
  0x29   : > { %601 = vrot.lane.b32.xlu1 %v580_v46, %s7205_s30  ;;  %v618_v59 = vor.u32 %v617_v51, %v616_v44  ;;  %v623_v60 = vor.u32 %v622_v53, %v621_v52  ;;  %v1026_v61 = vrot.slane %v1024_v54, 1  ;;  %v1027_v62 = vrot.slane %v875_v49, 2  ;;  %v402_v44 = vld [vmem:[%s5015_s18 + $0x38] sm:$0xff]  ;;  %1535 = vmatprep.subr.bf16.mxu1 %v7177_v0 }
  0x2a   : > { %v874_v2 = vor.u32 %v873_v55, %v869_v47  ;;  %v1023_v3 = vor.u32 %v1022_v58, %v1021_v57  ;;  %v466_v4 = vrot.slane %v464_v42, 1  ;;  %v470_v5 = vrot.slane %v468_v43, 1 }
  0x2b   : > { %v624_v6 = vsel %vm615_vm3, %v618_v59, %v623_v60  ;;  %v1028_v8 = vor.u32 %v1027_v62, %v1026_v61  ;;  %v472_v9 = vshrl.u32 %v5064_v34, 16  ;;  %v474_v10 = vshll.u32 %v5064_v34, 16  ;;  %1339 = vmatpush1.bf16.msra.mxu0 %v4548_v1 }
  0x2c   : > { %688 = vrot.lane.b32.xlu0 %v624_v6, %s7193_s20  ;;  %v878_v13 = vsel %vm461_vm4, %v874_v2, %v877_v56  ;;  %v467_v14 = vor.u32 %v466_v4, %v462_v36  ;;  %v478_v15 = vshll.u32 %v5067_v35, 16  ;;  %v628_v16 = vshrl.u32 %v5067_v35, 16  ;;  %1340 = vmatprep.subr.bf16.mxu0 %v7177_v0  ;;  %v4554_v2 = vld [vmem:[%s7168_s2 + $0x40] sm:$0xff]  }
  0x2d   : > { %949 = vrot.lane.b32.xlu1 %v878_v13, %s7207_s21  ;;  %v1029_v17 = vsel %vm615_vm3, %v1023_v3, %v1028_v8  ;;  %v625_v18 = vrot.slane %v472_v9, 1  ;;  %v626_v19 = vrot.slane %v474_v10, 2  ;;  %v5113_v20 = vsel %vm435_vm0, 0, %v5047_v23  ;;  %v4555_v8 = vld [vmem:[%s7169_s3 + $0x20] sm:$0xff]  }
  0x2e   : > { %v471_v29 = vsel %vm461_vm4, %v467_v14, %v470_v5  ;;  %v630_v30 = vrot.slane %v628_v16, 1  ;;  %v631_v31 = vrot.slane %v478_v15, 2  ;;  %v5123_v32 = vsel %vm435_vm0, %v5047_v23, 0  ;;  %v4556_v14 = vld [vmem:[%s7168_s2 + $0x48] sm:$0xff]  }
  0x2f   : > { %v627_v33 = vor.u32 %v626_v19, %v625_v18  ;;  %v879_v36 = vshrl.u32 %v5113_v20, 16  ;;  %v881_v37 = vshll.u32 %v5113_v20, 16  ;;  %v885_v38 = vshll.u32 %v5123_v32, 16  ;;  %1341 = vmatpush1.bf16.msra.mxu0 %v4550_v26  ;;  %v5191_v26 = vld [vmem:[%s5020_s26 + $0x30] sm:$0xff] }
  0x30   : > { %1093 = vrot.lane.b32.xlu0 %v1029_v17, %s7205_s30  ;;  %v632_v41 = vor.u32 %v631_v31, %v630_v30  ;;  %v476_v23 = vrot.slane %v474_v10, 1  ;;  %v480_v42 = vrot.slane %v478_v15, 1  ;;  %v823_v43 = vpack.c.bf16 %v384_v25, %v383_v22  ;;  %1342 = vmatprep.subr.bf16.mxu0 %v7177_v0 }
  0x31   : > { %542 = vrot.lane.b32.xlu1 %v471_v29, %s7191_s27  ;;  %v883_v46 = vrot.slane %v881_v37, 1  ;;  %v887_v47 = vrot.slane %v885_v38, 1  ;;  %v708_v48 = vrot.slane %v5064_v34, 2  ;;  %v709_v49 = vrot.slane %v5067_v35, 2  ;;  %v4553_v35 = vld [vmem:[%s7169_s3 + $0x18] sm:$0xff]  }
  0x32   : > { %v633_v50 = vsel %vm615_vm3, %v627_v33, %v632_v41  ;;  %v477_v51 = vor.u32 %v476_v23, %v472_v9  ;;  %v984_v52 = vrot.slane %v5113_v20, 1  ;;  %v1030_v53 = vrot.slane %v879_v36, 1  ;;  %1536 = vmatpush1.bf16.msra.mxu1 %v4553_v35  ;;  %v5194_v29 = vld [vmem:[%s5020_s26 + $0x38] sm:$0xff] }
  0x33   : > { %v884_v54 = vor.u32 %v883_v46, %v879_v36  ;;  %v985_v55 = vrot.slane %v5123_v32, 1  ;;  %v1031_v56 = vrot.slane %v881_v37, 2  ;;  %v1033_v57 = vshrl.u32 %v5123_v32, 16  ;;  %1343 = vmatpush1.bf16.msra.mxu0 %v4552_v45  ;;  %1537 = vmatprep.subr.bf16.mxu1 %v7177_v0  ;;  %v4557_v37 = vld [vmem:[%s7169_s3 + $0x28] sm:$0xff]   ;;  %v4558_v45 = vld [vmem:[%s7168_s2 + $0x50] sm:$0xff]   ;;  %v4560_v35 = vld [vmem:[%s7168_s2 + $0x58] sm:$0xff]  }
  0x34   : > { %690 = vrot.lane.b32.xlu0 %v633_v50, %s7193_s20  ;;  %v1036_v58 = vrot.slane %v885_v38, 2  ;;  %v429_v59 = vrot.slane %v5049_v24, 7  ;;  %v5152_v60 = vpack.c.bf16 %v402_v44, %v401_v39  ;;  %v481_v62 = vsel %vm461_vm4, %v477_v51, %v480_v42  ;;  %1344 = vmatprep.subr.bf16.mxu0 %v7177_v0 }
  0x35   : > { %v888_v61 = vsel %vm461_vm4, %v884_v54, %v887_v47  ;;  %v1035_v63 = vrot.slane %v1033_v57, 1  ;;  %v839_v1 = vrot.slane %v823_v43, 7  ;;  %v710_v3 = vsel %vm704_vm2, %v708_v48, %v709_v49 }
  0x36   : > { %7214 = vst [vmem:[#allocation6_spill] sm:$0xff] %v5152_v60  ;;  %951 = vrot.lane.b32.xlu1 %v888_v61, %s7207_s21  ;;  %v1032_v4 = vor.u32 %v1031_v56, %v1030_v53  ;;  %v5163_v5 = vsel %vm435_vm0, 0, %v429_v59  ;;  %v5166_v6 = vsel %vm435_vm0, %v429_v59, 0  ;;  %v986_v19 = vsel %vm574_vm1, %v984_v52, %v985_v55  ;;  %1538 = vmatpush1.bf16.msra.mxu1 %v4555_v8  ;;  %v4559_v53 = vld [vmem:[%s7169_s3 + $0x30] sm:$0xff]  }
  0x37   : > { %v1037_v9 = vor.u32 %v1036_v58, %v1035_v63  ;;  %v581_v10 = vrot.slane %v5163_v5, 1  ;;  %v582_v11 = vrot.slane %v5166_v6, 1  ;;  %v482_v13 = vshrl.u32 %v5163_v5, 16  ;;  %1345 = vmatpush1.bf16.msra.mxu0 %v4554_v2  ;;  %1539 = vmatprep.subr.bf16.mxu1 %v7177_v0 }
  0x38   : > { %544 = vrot.lane.b32.xlu0 %v481_v62, %s7191_s27  ;;  %v484_v15 = vshll.u32 %v5163_v5, 16  ;;  %v488_v16 = vshll.u32 %v5166_v6, 16  ;;  %v637_v17 = vshrl.u32 %v5166_v6, 16  ;;  %v5183_v18 = vsel %vm435_vm0, 0, %v839_v1  ;;  %1346 = vmatprep.subr.bf16.mxu0 %v7177_v0 }
  0x39   : > { %v634_v22 = vrot.slane %v482_v13, 1  ;;  %v5188_v25 = vsel %vm435_vm0, %v839_v1, 0  ;;  %v1038_v30 = vsel %vm615_vm3, %v1032_v4, %v1037_v9  ;;  %v889_v38 = vshrl.u32 %v5183_v18, 16 }
  0x3a   : > { %731 = vrot.lane.b32.xlu1 %v710_v3, %s7209_s11  ;;  %v635_v31 = vrot.slane %v484_v15, 2  ;;  %v639_v33 = vrot.slane %v637_v17, 1  ;;  %v640_v36 = vrot.slane %v488_v16, 2  ;;  %v891_v39 = vshll.u32 %v5183_v18, 16  ;;  %1540 = vmatpush1.bf16.msra.mxu1 %v4557_v37 }
  0x3b   : > { %v895_v40 = vshll.u32 %v5188_v25, 16  ;;  %v486_v41 = vrot.slane %v484_v15, 1  ;;  %v583_v23 = vsel %vm574_vm1, %v581_v10, %v582_v11  ;;  %v430_v44 = vrot.slane %v5152_v60, 7  ;;  %1347 = vmatpush1.bf16.msra.mxu0 %v4556_v14  ;;  %1541 = vmatprep.subr.bf16.mxu1 %v7177_v0  ;;  %v4561_v14 = vld [vmem:[%s7169_s3 + $0x38] sm:$0xff]  }
  0x3c   : > { %1007 = vrot.lane.b32.xlu0 %v986_v19, %s7209_s11  ;;  %v636_v42 = vor.u32 %v635_v31, %v634_v22  ;;  %v641_v43 = vor.u32 %v640_v36, %v639_v33  ;;  %v893_v46 = vrot.slane %v891_v39, 1  ;;  %v490_v48 = vrot.slane %v488_v16, 1  ;;  %1348 = vmatprep.subr.bf16.mxu0 %v7177_v0  ;;  %v4562_v22 = vld [vmem:[%s7168_s2 + $0x60] sm:$0xff]  }
  0x3d   : > { %v897_v47 = vrot.slane %v895_v40, 1  ;;  %v711_v49 = vrot.slane %v5163_v5, 2  ;;  %v487_v50 = vor.u32 %v486_v41, %v482_v13  ;;  %v712_v51 = vrot.slane %v5166_v6, 2  ;;  %v403_v41 = vld [vmem:[%s5015_s18 + $0x40] sm:$0xff] }
  0x3e   : > { %1095 = vrot.lane.b32.xlu1 %v1038_v30, %s7205_s30  ;;  %v824_v52 = vpack.c.bf16 %v5194_v29, %v5191_v26  ;;  %v642_v54 = vsel %vm615_vm3, %v636_v42, %v641_v43  ;;  %v894_v55 = vor.u32 %v893_v46, %v889_v38  ;;  %v1039_v56 = vrot.slane %v889_v38, 1  ;;  %1542 = vmatpush1.bf16.msra.mxu1 %v4559_v53  ;;  %v5267_v42 = vld [vmem:[%s5020_s26 + $0x40] sm:$0xff] }
  0x3f   : > { %v1042_v57 = vshrl.u32 %v5188_v25, 16  ;;  %v1040_v58 = vrot.slane %v891_v39, 2  ;;  %v1045_v59 = vrot.slane %v895_v40, 2  ;;  %v5228_v61 = vsel %vm435_vm0, 0, %v430_v44  ;;  %1349 = vmatpush1.bf16.msra.mxu0 %v4558_v45  ;;  %1543 = vmatprep.subr.bf16.mxu1 %v7177_v0  ;;  %v5273_v45 = vld [vmem:[%s5020_s26 + $0x48] sm:$0xff]  ;;  %v4563_v46 = vld [vmem:[%s7169_s3 + $0x40] sm:$0xff]  }
  0x40   : > { %603 = vrot.lane.b32.xlu0 %v583_v23, %s7205_s30  ;;  %v5231_v62 = vsel %vm435_vm0, %v430_v44, 0  ;;  %v898_v63 = vsel %vm461_vm4, %v894_v55, %v897_v47  ;;  %v987_v1 = vrot.slane %v5183_v18, 1  ;;  %v713_v3 = vsel %vm704_vm2, %v711_v49, %v712_v51  ;;  %1350 = vmatprep.subr.bf16.mxu0 %v7177_v0  ;;  %v404_v23 = vld [vmem:[%s5015_s18 + $0x48] sm:$0xff] }
  0x41   : > { %v1044_v2 = vrot.slane %v1042_v57, 1  ;;  %v492_v4 = vshrl.u32 %v5228_v61, 16  ;;  %v494_v6 = vshll.u32 %v5228_v61, 16  ;;  %v498_v8 = vshll.u32 %v5231_v62, 16  ;;  %v4564_v51 = vld [vmem:[%s7168_s2 + $0x68] sm:$0xff]  }
  0x42   : > { %692 = vrot.lane.b32.xlu1 %v642_v54, %s7193_s20  ;;  %v491_v9 = vsel %vm461_vm4, %v487_v50, %v490_v48  ;;  %v988_v10 = vrot.slane %v5188_v25, 1  ;;  %v646_v11 = vshrl.u32 %v5231_v62, 16  ;;  %v840_v13 = vrot.slane %v824_v52, 7  ;;  %1544 = vmatpush1.bf16.msra.mxu1 %v4561_v14 }
  0x43   : > { %v1041_v15 = vor.u32 %v1040_v58, %v1039_v56  ;;  %v1046_v16 = vor.u32 %v1045_v59, %v1044_v2  ;;  %v643_v17 = vrot.slane %v492_v4, 1  ;;  %v644_v19 = vrot.slane %v494_v6, 2  ;;  %1351 = vmatpush1.bf16.msra.mxu0 %v4560_v35  ;;  %1545 = vmatprep.subr.bf16.mxu1 %v7177_v0  ;;  %v4565_v56 = vld [vmem:[%s7169_s3 + $0x48] sm:$0xff]   ;;  %v4566_v2 = vld [vmem:[%s7168_s2 + $0x70] sm:$0xff]  }
  0x44   : > { %953 = vrot.lane.b32.xlu0 %v898_v63, %s7207_s21  ;;  %v648_v30 = vrot.slane %v646_v11, 1  ;;  %v649_v31 = vrot.slane %v498_v8, 2  ;;  %v5254_v33 = vsel %vm435_vm0, 0, %v840_v13  ;;  %v5257_v36 = vsel %vm435_vm0, %v840_v13, 0  ;;  %1352 = vmatprep.subr.bf16.mxu0 %v7177_v0  ;;  %v405_v13 = vld [vmem:[%s5015_s18 + $0x50] sm:$0xff] }
  0x45   : > { %v584_v37 = vrot.slane %v5228_v61, 1  ;;  %v585_v38 = vrot.slane %v5231_v62, 1  ;;  %v901_v39 = vshll.u32 %v5254_v33, 16  ;;  %v905_v40 = vshll.u32 %v5257_v36, 16 }
  0x46   : > { %546 = vrot.lane.b32.xlu1 %v491_v9, %s7191_s27  ;;  %v989_v43 = vsel %vm574_vm1, %v987_v1, %v988_v10  ;;  %v899_v44 = vshrl.u32 %v5254_v33, 16  ;;  %v1047_v47 = vsel %vm615_vm3, %v1041_v15, %v1046_v16  ;;  %v496_v49 = vrot.slane %v494_v6, 1  ;;  %1546 = vmatpush1.bf16.msra.mxu1 %v4563_v46 }
  0x47   : > { %v903_v48 = vrot.slane %v901_v39, 1  ;;  %v714_v50 = vrot.slane %v5228_v61, 2  ;;  %v645_v52 = vor.u32 %v644_v19, %v643_v17  ;;  %v650_v53 = vor.u32 %v649_v31, %v648_v30  ;;  %1353 = vmatpush1.bf16.msra.mxu0 %v4562_v22  ;;  %1547 = vmatprep.subr.bf16.mxu1 %v7177_v0  ;;  %v406_v22 = vld [vmem:[%s5015_s18 + $0x58] sm:$0xff] }
  0x48   : > { %733 = vrot.lane.b32.xlu0 %v713_v3, %s7209_s11  ;;  %v500_v54 = vrot.slane %v498_v8, 1  ;;  %v715_v55 = vrot.slane %v5231_v62, 2  ;;  %v586_v57 = vsel %vm574_vm1, %v584_v37, %v585_v38  ;;  %v907_v35 = vrot.slane %v905_v40, 1  ;;  %1354 = vmatprep.subr.bf16.mxu0 %v7177_v0 }
  0x49   : > { %v1051_v58 = vshrl.u32 %v5257_v36, 16  ;;  %v904_v59 = vor.u32 %v903_v48, %v899_v44  ;;  %v990_v63 = vrot.slane %v5254_v33, 1  ;;  %v5294_v1 = vpack.c.bf16 %v404_v23, %v403_v41  ;;  %v5336_v48 = vld [vmem:[%s5020_s26 + $0x50] sm:$0xff] }
  0x4a   : > { %1009 = vrot.lane.b32.xlu1 %v989_v43, %s7209_s11  ;;  %v825_v62 = vpack.c.bf16 %v5273_v45, %v5267_v42  ;;  %v497_v3 = vor.u32 %v496_v49, %v492_v4  ;;  %v1048_v6 = vrot.slane %v899_v44, 1  ;;  %v1049_v8 = vrot.slane %v901_v39, 2  ;;  %1548 = vmatpush1.bf16.msra.mxu1 %v4565_v56  ;;  %v5339_v49 = vld [vmem:[%s5020_s26 + $0x58] sm:$0xff] }
  0x4b   : > { %7215 = vst [vmem:[#allocation7_spill] sm:$0xff] %v5294_v1  ;;  %v651_v9 = vsel %vm615_vm3, %v645_v52, %v650_v53  ;;  %v431_v10 = vrot.slane %v5294_v1, 7  ;;  %1355 = vmatpush1.bf16.msra.mxu0 %v4564_v51  ;;  %v1053_v14 = vrot.slane %v1051_v58, 1  ;;  %v1054_v15 = vrot.slane %v905_v40, 2  ;;  %2360 = vmatprep.subr.bf16.mxu1 %v7177_v0 }
  0x4c   : > { %1097 = vrot.lane.b32.xlu0 %v1047_v47, %s7205_s30  ;;  %v841_v11 = vrot.slane %v825_v62, 7  ;;  %1356 = vmatprep.subr.bf16.mxu0 %v7177_v0  ;;  %v908_v4 = vsel %vm461_vm4, %v904_v59, %v907_v35  ;;  %v501_v30 = vsel %vm461_vm4, %v497_v3, %v500_v54  ;;  %v716_v31 = vsel %vm704_vm2, %v714_v50, %v715_v55 }
  0x4d   : > { %v5310_v16 = vsel %vm435_vm0, 0, %v431_v10  ;;  %v5313_v17 = vsel %vm435_vm0, %v431_v10, 0  ;;  %v991_v37 = vrot.slane %v5257_v36, 1  ;;  %v1050_v43 = vor.u32 %v1049_v8, %v1048_v6 }
  0x4e   : > { %605 = vrot.lane.b32.xlu1 %v586_v57, %s7205_s30  ;;  %v5316_v19 = vsel %vm435_vm0, 0, %v841_v11  ;;  %v502_v38 = vshrl.u32 %v5310_v16, 16  ;;  %v504_v39 = vshll.u32 %v5310_v16, 16  ;;  %v508_v40 = vshll.u32 %v5313_v17, 16 }
  0x4f   : > { %v655_v41 = vshrl.u32 %v5313_v17, 16  ;;  %v5329_v23 = vsel %vm435_vm0, %v841_v11, 0  ;;  %1357 = vmatpush1.bf16.msra.mxu0 %v4566_v2  ;;  %v1055_v44 = vor.u32 %v1054_v15, %v1053_v14  ;;  %v911_v46 = vshll.u32 %v5316_v19, 16 }
  0x50   : > { %694 = vrot.lane.b32.xlu0 %v651_v9, %s7193_s20  ;;  %v5333_v47 = vpack.c.bf16 %v406_v22, %v405_v13  ;;  %2959 = vmatprep.subr.bf16.mxu0 %v7177_v0  ;;  %v652_v50 = vrot.slane %v502_v38, 1  ;;  %v653_v51 = vrot.slane %v504_v39, 2  ;;  %v658_v53 = vrot.slane %v508_v40, 2 }
  0x51   : > { %v657_v52 = vrot.slane %v655_v41, 1  ;;  %v909_v54 = vshrl.u32 %v5316_v19, 16  ;;  %v913_v55 = vrot.slane %v911_v46, 1  ;;  %v915_v56 = vshll.u32 %v5329_v23, 16 }
  0x52   : > { %955 = vrot.lane.b32.xlu1 %v908_v4, %s7207_s21  ;;  %7216 = vst [vmem:[#allocation8_spill] sm:$0xff] %v5333_v47  ;;  %v992_v57 = vsel %vm574_vm1, %v990_v63, %v991_v37  ;;  %v587_v35 = vrot.slane %v5310_v16, 1  ;;  %v588_v58 = vrot.slane %v5313_v17, 1  ;;  %v826_v59 = vpack.c.bf16 %v5339_v49, %v5336_v48  ;;  %v407_v37 = vld [vmem:[%s5015_s18 + $0x60] sm:$0xff] }
  0x53   : > { %v506_v62 = vrot.slane %v504_v39, 1  ;;  %v432_v2 = vrot.slane %v5333_v47, 7  ;;  %v1056_v3 = vsel %vm615_vm3, %v1050_v43, %v1055_v44  ;;  %v654_v6 = vor.u32 %v653_v51, %v652_v50  ;;  %v408_v44 = vld [vmem:[%s5015_s18 + $0x68] sm:$0xff] }
  0x54   : > { %548 = vrot.lane.b32.xlu0 %v501_v30, %s7191_s27  ;;  %v659_v8 = vor.u32 %v658_v53, %v657_v52  ;;  %v914_v63 = vor.u32 %v913_v55, %v909_v54  ;;  %v917_v9 = vrot.slane %v915_v56, 1  ;;  %v1060_v10 = vshrl.u32 %v5329_v23, 16 }
  0x55   : > { %v589_v11 = vsel %vm574_vm1, %v587_v35, %v588_v58  ;;  %v510_v13 = vrot.slane %v508_v40, 1  ;;  %v717_v14 = vrot.slane %v5310_v16, 2  ;;  %v842_v15 = vrot.slane %v826_v59, 7  ;;  %v5388_v59 = vld [vmem:[%s5020_s26 + $0x68] sm:$0xff] }
  0x56   : > { %735 = vrot.lane.b32.xlu1 %v716_v31, %s7209_s11  ;;  %v507_v4 = vor.u32 %v506_v62, %v502_v38  ;;  %v718_v22 = vrot.slane %v5313_v17, 2  ;;  %v5360_v30 = vsel %vm435_vm0, 0, %v432_v2  ;;  %v5363_v31 = vsel %vm435_vm0, %v432_v2, 0 }
  0x57   : > { %v660_v39 = vsel %vm615_vm3, %v654_v6, %v659_v8  ;;  %v1057_v41 = vrot.slane %v909_v54, 1  ;;  %v1058_v40 = vrot.slane %v911_v46, 2  ;;  %v1063_v43 = vrot.slane %v915_v56, 2  ;;  %v5381_v56 = vld [vmem:[%s5020_s26 + $0x60] sm:$0xff] }
  0x58   : > { %1011 = vrot.lane.b32.xlu0 %v992_v57, %s7209_s11  ;;  %v918_v38 = vsel %vm461_vm4, %v914_v63, %v917_v9  ;;  %v1062_v17 = vrot.slane %v1060_v10, 1  ;;  %v5371_v50 = vsel %vm435_vm0, 0, %v842_v15  ;;  %v512_v51 = vshrl.u32 %v5360_v30, 16 }
  0x59   : > { %v514_v52 = vshll.u32 %v5360_v30, 16  ;;  %v518_v53 = vshll.u32 %v5363_v31, 16  ;;  %v664_v54 = vshrl.u32 %v5363_v31, 16  ;;  %v993_v46 = vrot.slane %v5316_v19, 1 }
  0x5a   : > { %1099 = vrot.lane.b32.xlu1 %v1056_v3, %s7205_s30  ;;  %v994_v55 = vrot.slane %v5329_v23, 1  ;;  %v511_v57 = vsel %vm461_vm4, %v507_v4, %v510_v13  ;;  %v921_v35 = vshll.u32 %v5371_v50, 16  ;;  %v5385_v58 = vpack.c.bf16 %v408_v44, %v407_v37 }
  0x5b   : > { %v719_v62 = vsel %vm704_vm2, %v717_v14, %v718_v22  ;;  %v1059_v2 = vor.u32 %v1058_v40, %v1057_v41  ;;  %v1064_v3 = vor.u32 %v1063_v43, %v1062_v17  ;;  %v5393_v6 = vsel %vm435_vm0, %v842_v15, 0  ;;  %v409_v17 = vld [vmem:[%s5015_s18 + $0x70] sm:$0xff] }
  0x5c   : > { %607 = vrot.lane.b32.xlu0 %v589_v11, %s7205_s30  ;;  %7217 = vst [vmem:[#allocation9_spill] sm:$0xff] %v5385_v58  ;;  %v661_v8 = vrot.slane %v512_v51, 1  ;;  %v662_v63 = vrot.slane %v514_v52, 2  ;;  %v666_v9 = vrot.slane %v664_v54, 1  ;;  %v667_v10 = vrot.slane %v518_v53, 2  ;;  %v410_v54 = vld [vmem:[%s5015_s18 + $0x78] sm:$0xff] }
  0x5d   : > { %v995_v11 = vsel %vm574_vm1, %v993_v46, %v994_v55  ;;  %v590_v13 = vrot.slane %v5360_v30, 1  ;;  %v591_v4 = vrot.slane %v5363_v31, 1  ;;  %v827_v14 = vpack.c.bf16 %v5388_v59, %v5381_v56  ;;  %s7233_s18 = smov 64  }
  0x5e   : > { %696 = vrot.lane.b32.xlu1 %v660_v39, %s7193_s20  ;;  %v919_v15 = vshrl.u32 %v5371_v50, 16  ;;  %v923_v22 = vrot.slane %v921_v35, 1  ;;  %v925_v37 = vshll.u32 %v5393_v6, 16  ;;  %v433_v39 = vrot.slane %v5385_v58, 7 }
  0x5f   : > { %v1065_v41 = vsel %vm615_vm3, %v1059_v2, %v1064_v3  ;;  %v663_v40 = vor.u32 %v662_v63, %v661_v8  ;;  %v668_v43 = vor.u32 %v667_v10, %v666_v9  ;;  %v516_v44 = vrot.slane %v514_v52, 1 }
  0x60   : > { %957 = vrot.lane.b32.xlu0 %v918_v38, %s7207_s21  ;;  %v5407_v38 = vsel %vm435_vm0, 0, %v433_v39  ;;  %v592_v46 = vsel %vm574_vm1, %v590_v13, %v591_v4  ;;  %v843_v55 = vrot.slane %v827_v14, 7  ;;  %v927_v0 = vrot.slane %v925_v37, 1 }
  0x61   : > { %v1069_v58 = vshrl.u32 %v5393_v6, 16  ;;  %v520_v52 = vrot.slane %v518_v53, 1  ;;  %v522_v2 = vshrl.u32 %v5407_v38, 16  ;;  %v524_v3 = vshll.u32 %v5407_v38, 16 }
  0x62   : > { %550 = vrot.lane.b32.xlu1 %v511_v57, %s7191_s27  ;;  %v924_v57 = vor.u32 %v923_v22, %v919_v15  ;;  %v5420_v8 = vpack.c.bf16 %v410_v54, %v409_v17  ;;  %v669_v63 = vsel %vm615_vm3, %v663_v40, %v668_v43  ;;  %v517_v9 = vor.u32 %v516_v44, %v512_v51  ;;  %v5433_v51 = vld [vmem:[%s5020_s26 + $0x70] sm:$0xff]  ;;  %v5436_v43 = vld [vmem:[%s5020_s26 + $0x78] sm:$0xff] }
  0x63   : > { %v720_v10 = vrot.slane %v5360_v30, 2  ;;  %v1066_v13 = vrot.slane %v919_v15, 1  ;;  %v5429_v14 = vsel %vm435_vm0, 0, %v843_v55  ;;  %v1072_v40 = vrot.slane %v925_v37, 2 }
  0x64   : > { %737 = vrot.lane.b32.xlu0 %v719_v62, %s7209_s11  ;;  %v5415_v62 = vsel %vm435_vm0, %v433_v39, 0  ;;  %7218 = vst [vmem:[#allocation10_spill] sm:$0xff] %v5420_v8  ;;  %v928_v22 = vsel %vm461_vm4, %v924_v57, %v927_v0  ;;  %v1067_v39 = vrot.slane %v921_v35, 2  ;;  %v997_v15 = vrot.slane %v5393_v6, 1 }
  0x65   : > { %v528_v53 = vshll.u32 %v5415_v62, 16  ;;  %v673_v4 = vshrl.u32 %v5415_v62, 16  ;;  %v670_v44 = vrot.slane %v522_v2, 1  ;;  %v671_v17 = vrot.slane %v524_v3, 2 }
  0x66   : > { %1013 = vrot.lane.b32.xlu1 %v995_v11, %s7209_s11  ;;  %v721_v11 = vrot.slane %v5363_v31, 2  ;;  %v996_v31 = vrot.slane %v5371_v50, 1  ;;  %v521_v54 = vsel %vm461_vm4, %v517_v9, %v520_v52  ;;  %v931_v0 = vshll.u32 %v5429_v14, 16 }
  0x67   : > { %v675_v35 = vrot.slane %v673_v4, 1  ;;  %v1068_v57 = vor.u32 %v1067_v39, %v1066_v13  ;;  %v434_v47 = vrot.slane %v5420_v8, 7  ;;  %v593_v1 = vrot.slane %v5407_v38, 1 }
  0x68   : > { %1101 = vrot.lane.b32.xlu0 %v1065_v41, %s7205_s30  ;;  %v1071_v41 = vrot.slane %v1069_v58, 1  ;;  %v676_v58 = vrot.slane %v528_v53, 2  ;;  %v722_v37 = vsel %vm704_vm2, %v720_v10, %v721_v11  ;;  %v594_v52 = vrot.slane %v5415_v62, 1 }
  0x69   : > { %v998_v9 = vsel %vm574_vm1, %v996_v31, %v997_v15  ;;  %v929_v4 = vshrl.u32 %v5429_v14, 16  ;;  %v672_v11 = vor.u32 %v671_v17, %v670_v44  ;;  %v526_v39 = vrot.slane %v524_v3, 1 }
  0x6a   : > { %609 = vrot.lane.b32.xlu1 %v592_v46, %s7205_s30  ;;  %v5443_v46 = vsel %vm435_vm0, %v843_v55, 0  ;;  %v828_v55 = vpack.c.bf16 %v5436_v43, %v5433_v51  ;;  %v677_v13 = vor.u32 %v676_v58, %v675_v35  ;;  %v530_v8 = vrot.slane %v528_v53, 1 }
  0x6b   : > { %v935_v10 = vshll.u32 %v5443_v46, 16  ;;  %v5463_v31 = vsel %vm435_vm0, 0, %v434_v47  ;;  %v724_v44 = vrot.slane %v5415_v62, 2  ;;  %v527_v17 = vor.u32 %v526_v39, %v522_v2 }
  0x6c   : > { %698 = vrot.lane.b32.xlu0 %v669_v63, %s7193_s20  ;;  %v1073_v63 = vor.u32 %v1072_v40, %v1071_v41  ;;  %v1078_v40 = vshrl.u32 %v5443_v46, 16  ;;  %v844_v15 = vrot.slane %v828_v55, 7  ;;  %v678_v3 = vsel %vm615_vm3, %v672_v11, %v677_v13 }
  0x6d   : > { %v937_v24 = vrot.slane %v935_v10, 1  ;;  %v1075_v35 = vrot.slane %v929_v4, 1  ;;  %v5470_v58 = vsel %vm435_vm0, %v434_v47, 0  ;;  %v596_v11 = vrot.slane %v5463_v31, 1 }
  0x6e   : > { %959 = vrot.lane.b32.xlu1 %v928_v22, %s7207_s21  ;;  %v933_v22 = vrot.slane %v931_v0, 1  ;;  %v1074_v41 = vsel %vm615_vm3, %v1068_v57, %v1073_v63  ;;  %v1080_v53 = vrot.slane %v1078_v40, 1  ;;  %v1081_v57 = vrot.slane %v935_v10, 2 }
  0x6f   : > { %v532_v63 = vshrl.u32 %v5463_v31, 16  ;;  %v5476_v62 = vsel %vm435_vm0, 0, %v844_v15  ;;  %v538_v2 = vshll.u32 %v5470_v58, 16  ;;  %v1109_v39 = vrot.slane %v5053_v27, 2 }
  0x70   : > { %552 = vrot.lane.b32.xlu0 %v521_v54, %s7191_s27  ;;  %v595_v54 = vsel %vm574_vm1, %v593_v1, %v594_v52  ;;  %v934_v60 = vor.u32 %v933_v22, %v929_v4  ;;  %v1076_v1 = vrot.slane %v931_v0, 2  ;;  %v534_v52 = vshll.u32 %v5463_v31, 16 }
  0x71   : > { %v999_v0 = vrot.slane %v5429_v14, 1  ;;  %v1000_v4 = vrot.slane %v5443_v46, 1  ;;  %v531_v22 = vsel %vm461_vm4, %v527_v17, %v530_v8  ;;  %v941_v13 = vshll.u32 %v5476_v62, 16 }
  0x72   : > { %739 = vrot.lane.b32.xlu1 %v722_v37, %s7209_s11  ;;  %v723_v37 = vrot.slane %v5407_v38, 2  ;;  %v938_v55 = vsel %vm461_vm4, %v934_v60, %v937_v24  ;;  %v1077_v10 = vor.u32 %v1076_v1, %v1075_v35  ;;  %v1082_v24 = vor.u32 %v1081_v57, %v1080_v53 }
  0x73   : > { %v5490_v60 = vsel %vm435_vm0, %v844_v15, 0  ;;  %v679_v40 = vrot.slane %v532_v63, 1  ;;  %v597_v8 = vrot.slane %v5470_v58, 1  ;;  %v1001_v15 = vsel %vm574_vm1, %v999_v0, %v1000_v4 }
  0x74   : > { %1015 = vrot.lane.b32.xlu0 %v998_v9, %s7209_s11  ;;  %v682_v9 = vshrl.u32 %v5470_v58, 16  ;;  %v725_v47 = vsel %vm704_vm2, %v723_v37, %v724_v44  ;;  %v685_v44 = vrot.slane %v538_v2, 2  ;;  %v943_v35 = vrot.slane %v941_v13, 1 }
  0x75   : > { %v945_v1 = vshll.u32 %v5490_v60, 16  ;;  %v1087_v0 = vshrl.u32 %v5490_v60, 16 }
  0x76   : > { %1103 = vrot.lane.b32.xlu1 %v1074_v41, %s7205_s30  ;;  %v1110_v41 = vrot.slane %v5056_v28, 2  ;;  %v684_v37 = vrot.slane %v682_v9, 1  ;;  %v1083_v28 = vsel %vm615_vm3, %v1077_v10, %v1082_v24  ;;  %v540_v9 = vrot.slane %v538_v2, 1 }
  0x77   : > { %v1085_v24 = vrot.slane %v941_v13, 2 }
  0x78   : > { %611 = vrot.lane.b32.xlu0 %v595_v54, %s7205_s30  ;;  %v680_v54 = vrot.slane %v534_v52, 2  ;;  %v1111_v17 = vsel %vm704_vm2, %v1109_v39, %v1110_v41  ;;  %v686_v57 = vor.u32 %v685_v44, %v684_v37  ;;  %v947_v41 = vrot.slane %v945_v1, 1 }
  0x79   : > { %4384 = vmatprep.mubr.msk.bf16.mxu1 %vm1133_vm5, %v1111_v17  ;;  %v1003_v37 = vrot.slane %v5490_v60, 1 }
  0x7a   : > { %700 = vrot.lane.b32.xlu1 %v678_v3, %s7193_s20  ;;  %v939_v3 = vshrl.u32 %v5476_v62, 16  ;;  %v681_v53 = vor.u32 %v680_v54, %v679_v40  ;;  %v1090_v40 = vrot.slane %v945_v1, 2  ;;  %v4805_v1 = vld [vmem:[%s5020_s26 + $0x8] sm:$0xff] }
  0x7c   : > { %961 = vrot.lane.b32.xlu0 %v938_v55, %s7207_s21  ;;  %v536_v55 = vrot.slane %v534_v52, 1  ;;  %v944_v39 = vor.u32 %v943_v35, %v939_v3  ;;  %v687_v4 = vsel %vm615_vm3, %v681_v53, %v686_v57  ;;  %v727_v52 = vrot.slane %v5470_v58, 2  ;;  %v4806_v53 = vld [vmem:[%s5020_s26 + $0x10] sm:$0xff] }
  0x7d   : > { %v1084_v2 = vrot.slane %v939_v3, 1 }
  0x7e   : > { %554 = vrot.lane.b32.xlu1 %v531_v22, %s7191_s27  ;;  %v598_v22 = vsel %vm574_vm1, %v596_v11, %v597_v8  ;;  %v537_v17 = vor.u32 %v536_v55, %v532_v63  ;;  %v948_v10 = vsel %vm461_vm4, %v944_v39, %v947_v41  ;;  %v1089_v11 = vrot.slane %v1087_v0, 1  ;;  %v4807_v55 = vld [vmem:[%s5020_s26 + $0x18] sm:$0xff] }
  0x7f   : > { %v1002_v63 = vrot.slane %v5476_v62, 1  ;;  %v1086_v44 = vor.u32 %v1085_v24, %v1084_v2  ;;  %v1112_v41 = vrot.slane %v5113_v20, 2  ;;  %v1113_v0 = vrot.slane %v5123_v32, 2 }
  0x80   : > { %741 = vrot.lane.b32.xlu0 %v725_v47, %s7209_s11  ;;  %v726_v47 = vrot.slane %v5463_v31, 2  ;;  %v541_v54 = vsel %vm461_vm4, %v537_v17, %v540_v9  ;;  %v1091_v8 = vor.u32 %v1090_v40, %v1089_v11 }
  0x81   : > { %v1004_v13 = vsel %vm574_vm1, %v1002_v63, %v1003_v37  ;;  %v1114_v24 = vsel %vm704_vm2, %v1112_v41, %v1113_v0 }
  0x82   : > { %1017 = vrot.lane.b32.xlu1 %v1001_v15, %s7209_s11  ;;  %v728_v58 = vsel %vm704_vm2, %v726_v47, %v727_v52  ;;  %v1092_v3 = vsel %vm615_vm3, %v1086_v44, %v1091_v8  ;;  %v4804_v15 = vld [vmem:[%s5020_s26] sm:$0xff]  ;;  %v1115_v44 = vrot.slane %v5183_v18, 2 }
  0x84   : > { %1105 = vrot.lane.b32.xlu0 %v1083_v28, %s7205_s30 }
  0x86   : > { %613 = vrot.lane.b32.xlu1 %v598_v22, %s7205_s30  ;;  %v4808_v22 = vld [vmem:[%s5020_s26 + $0x20] sm:$0xff] }
  0x88   : > { %702 = vrot.lane.b32.xlu0 %v687_v4, %s7193_s20  ;;  %v4809_v4 = vld [vmem:[%s5020_s26 + $0x28] sm:$0xff]  ;;  %s7225_s20 = smov 16  }
  0x8a   : > { %963 = vrot.lane.b32.xlu1 %v948_v10, %s7207_s21 }
  0x8c   : > { %556 = vrot.lane.b32.xlu0 %v541_v54, %s7191_s27  ;;  %s4830_s27 = sshll.u32 %s4898_s12, 4  ;;  %s4831_s27 = int_to_ptr.vmem [resolvable:$false] %s4830_s27 }
  0x8e   : > { %743 = vrot.lane.b32.xlu1 %v728_v58, %s7209_s11 }
  0x90   : > { %1019 = vrot.lane.b32.xlu0 %v1004_v13, %s7209_s11 }
  0x92   : > { %1107 = vrot.lane.b32.xlu1 %v1092_v3, %s7205_s30 }
  0x94   : > { %1744 = vrot.lane.b32.xlu0 %v4804_v15, %s7207_s21 }
  0x96   : > { %v600_v35 = vpop.permute.xlu0 %599  ;;  %1746 = vrot.lane.b32.xlu1 %v4805_v1, %s7207_s21 }
  0x97   : > { %v1006_v28 = vpop.permute.xlu1 %1005 }
  0x98   : > { %1748 = vrot.lane.b32.xlu0 %v4806_v53, %s7207_s21  ;;  %v1119_v53 = vrot.slane %v5257_v36, 2 }
  0x9a   : > { %v730_v57 = vpop.permute.xlu0 %729  ;;  %1750 = vrot.lane.b32.xlu1 %v4807_v55, %s7207_s21 }
  0x9b   : > { %v602_v9 = vpop.permute.xlu1 %601 }
  0x9c   : > { %1752 = vrot.lane.b32.xlu0 %v4808_v22, %s7207_s21 }
  0x9e   : > { %v689_v39 = vpop.permute.xlu0 %688  ;;  %1754 = vrot.lane.b32.xlu1 %v4809_v4, %s7207_s21 }
  0x9f   : > { %v789_v17 = vsel %vm787_vm6, %v600_v35, %v689_v39  ;;  %v950_v47 = vpop.permute.xlu1 %949 }
  0xa0   : > { %v1135_v52 = vsel %vm1133_vm5, %v5053_v27, %v950_v47  ;;  %v806_v2 = vsel %vm804_vm7, %v789_v17, %v730_v57  ;;  %1756 = vrot.lane.b32.xlu0 %v5191_v26, %s7207_s21 }
  0xa1   : > { %4366 = vmatprep.mubr.msk.bf16.mxu0 %vm1311_vm8, %v806_v2  ;;  %v1151_v32 = vsel %vm804_vm7, %v1135_v52, %v1006_v28 }
  0xa2   : > { %v1094_v10 = vpop.permute.xlu0 %1093  ;;  %1758 = vrot.lane.b32.xlu1 %v5194_v29, %s7207_s21 }
  0xa3   : > { %v543_v11 = vpop.permute.xlu1 %542  ;;  %v1167_v27 = vsel %vm762_vm9, %v1151_v32, %v1094_v10  ;;  %v1121_v10 = vrot.slane %v5316_v19, 2  ;;  %v1122_v32 = vrot.slane %v5329_v23, 2 }
  0xa4   : > { %v747_v40 = vsel %vm745_vm10, %v5044_v21, %v543_v11  ;;  %1562 = vmatmul.mubr.bf16.vlgmr.msra.gmra.mrb[0].mxu1 %v1167_v27  ;;  %1760 = vrot.lane.b32.xlu0 %v5267_v42, %s7207_s21 }
  0xa5   : > { %v764_v26 = vsel %vm762_vm9, %v747_v40, %v600_v35  ;;  %4385 = vmatprep.mubr.msk.bf16.mxu1 %vm1133_vm5, %v1114_v24 }
  0xa6   : > { %1361 = vmatmul.mubr.bf16.vlgmr.msra.gmra.mrb[0].mxu0 %v764_v26  ;;  %v691_v54 = vpop.permute.xlu0 %690  ;;  %1762 = vrot.lane.b32.xlu1 %v5273_v45, %s7207_s21  ;;  %v1116_v45 = vrot.slane %v5188_v25, 2  ;;  %v1123_v26 = vsel %vm704_vm2, %v1121_v10, %v1122_v32 }
  0xa7   : > { %v791_v42 = vsel %vm787_vm6, %v602_v9, %v691_v54 }
  0xa8   : > { %v952_v29 = vpop.permute.xlu1 %951  ;;  %1764 = vrot.lane.b32.xlu0 %v5336_v48, %s7207_s21  ;;  %v1117_v25 = vsel %vm704_vm2, %v1115_v44, %v1116_v45  ;;  %v1125_v44 = vrot.slane %v5393_v6, 2 }
  0xaa   : > { %v545_v63 = vpop.permute.xlu0 %544  ;;  %1766 = vrot.lane.b32.xlu1 %v5339_v49, %s7207_s21  ;;  %v1137_v49 = vsel %vm1133_vm5, %v5113_v20, %v952_v29 }
  0xab   : > { %v749_v21 = vsel %vm745_vm10, %v5064_v34, %v545_v63 }
  0xac   : > { %v732_v37 = vpop.permute.xlu1 %731  ;;  %v767_v58 = vsel %vm762_vm9, %v749_v21, %v602_v9  ;;  %1768 = vrot.lane.b32.xlu0 %v5381_v56, %s7207_s21 }
  0xad   : > { %v808_v48 = vsel %vm804_vm7, %v791_v42, %v732_v37 }
  0xae   : > { %4367 = vmatprep.mubr.msk.bf16.mxu0 %vm1311_vm8, %v808_v48  ;;  %v1008_v34 = vpop.permute.xlu0 %1007  ;;  %1770 = vrot.lane.b32.xlu1 %v5388_v59, %s7207_s21 }
  0xaf   : > { %1369 = vmatmul.mubr.bf16.gmra.mrb[4].mxu0 %v767_v58  ;;  %v1153_v8 = vsel %vm804_vm7, %v1137_v49, %v1008_v34  ;;  %v1124_v58 = vrot.slane %v5371_v50, 2 }
  0xb0   : > { %v1096_v13 = vpop.permute.xlu1 %1095  ;;  %1772 = vrot.lane.b32.xlu0 %v5433_v51, %s7207_s21  ;;  %v1118_v51 = vrot.slane %v5254_v33, 2 }
  0xb1   : > { %v1170_v56 = vsel %vm762_vm9, %v1153_v8, %v1096_v13  ;;  %v1126_v13 = vsel %vm704_vm2, %v1124_v58, %v1125_v44 }
  0xb2   : > { %1570 = vmatmul.mubr.bf16.gmra.mrb[4].mxu1 %v1170_v56  ;;  %v604_v3 = vpop.permute.xlu0 %603  ;;  %1774 = vrot.lane.b32.xlu1 %v5436_v43, %s7207_s21  ;;  %v1120_v39 = vsel %vm704_vm2, %v1118_v51, %v1119_v53 }
  0xb3   : > { %4386 = vmatprep.mubr.msk.bf16.mxu1 %vm1133_vm5, %v1117_v25 }
  0xb4   : > { %v693_v20 = vpop.permute.xlu1 %692 }
  0xb5   : > { %v793_v1 = vsel %vm787_vm6, %v604_v3, %v693_v20 }
  0xb6   : > { %v954_v59 = vpop.permute.xlu0 %953 }
  0xb7   : > { %v1139_v9 = vsel %vm1133_vm5, %v5183_v18, %v954_v59 }
  0xb8   : > { %v547_v15 = vpop.permute.xlu1 %546 }
  0xb9   : > { %v751_v35 = vsel %vm745_vm10, %v5163_v5, %v547_v15 }
  0xba   : > { %v734_v28 = vpop.permute.xlu0 %733  ;;  %v770_v43 = vsel %vm762_vm9, %v751_v35, %v604_v3 }
  0xbb   : > { %v810_v57 = vsel %vm804_vm7, %v793_v1, %v734_v28  ;;  %v1127_v1 = vrot.slane %v5429_v14, 2  ;;  %v1128_v28 = vrot.slane %v5443_v46, 2 }
  0xbc   : > { %v1010_v55 = vpop.permute.xlu1 %1009  ;;  %4368 = vmatprep.mubr.msk.bf16.mxu0 %vm1311_vm8, %v810_v57 }
  0xbd   : > { %1377 = vmatmul.mubr.bf16.gmra.mrb[8].mxu0 %v770_v43  ;;  %v1155_v5 = vsel %vm804_vm7, %v1139_v9, %v1010_v55  ;;  %v1129_v43 = vsel %vm704_vm2, %v1127_v1, %v1128_v28 }
  0xbe   : > { %v1098_v22 = vpop.permute.xlu0 %1097 }
  0xbf   : > { %v1173_v41 = vsel %vm762_vm9, %v1155_v5, %v1098_v22 }
  0xc0   : > { %v606_v0 = vpop.permute.xlu1 %605  ;;  %1578 = vmatmul.mubr.bf16.gmra.mrb[8].mxu1 %v1173_v41 }
  0xc1   : > { %4387 = vmatprep.mubr.msk.bf16.mxu1 %vm1133_vm5, %v1120_v39 }
  0xc2   : > { %v695_v36 = vpop.permute.xlu0 %694 }
  0xc3   : > { %v795_v18 = vsel %vm787_vm6, %v606_v0, %v695_v36  ;;  %v1130_v36 = vrot.slane %v5476_v62, 2 }
  0xc4   : > { %v956_v4 = vpop.permute.xlu1 %955 }
  0xc5   : > { %v1141_v11 = vsel %vm1133_vm5, %v5254_v33, %v956_v4  ;;  %v1131_v4 = vrot.slane %v5490_v60, 2 }
  0xc6   : > { %v549_v17 = vpop.permute.xlu0 %548 }
  0xc7   : > { %v753_v47 = vsel %vm745_vm10, %v5228_v61, %v549_v17  ;;  %v1132_v10 = vsel %vm704_vm2, %v1130_v36, %v1131_v4 }
  0xc8   : > { %v736_v52 = vpop.permute.xlu1 %735  ;;  %v773_v2 = vsel %vm762_vm9, %v753_v47, %v606_v0 }
  0xc9   : > { %v812_v24 = vsel %vm804_vm7, %v795_v18, %v736_v52 }
  0xca   : > { %4369 = vmatprep.mubr.msk.bf16.mxu0 %vm1311_vm8, %v812_v24  ;;  %v1012_v27 = vpop.permute.xlu0 %1011 }
  0xcb   : > { %1385 = vmatmul.mubr.bf16.gmra.mrb[12].mxu0 %v773_v2  ;;  %v1157_v61 = vsel %vm804_vm7, %v1141_v11, %v1012_v27 }
  0xcc   : > { %v1100_v40 = vpop.permute.xlu1 %1099 }
  0xcd   : > { %v1176_v54 = vsel %vm762_vm9, %v1157_v61, %v1100_v40 }
  0xce   : > { %1586 = vmatmul.mubr.bf16.gmra.mrb[12].mxu1 %v1176_v54  ;;  %v608_v29 = vpop.permute.xlu0 %607 }
  0xcf   : > { %4388 = vmatprep.mubr.msk.bf16.mxu1 %vm1133_vm5, %v1123_v26 }
  0xd0   : > { %v697_v23 = vpop.permute.xlu1 %696 }
  0xd1   : > { %v797_v42 = vsel %vm787_vm6, %v608_v29, %v697_v23 }
  0xd2   : > { %v958_v63 = vpop.permute.xlu0 %957 }
  0xd3   : > { %v1143_v34 = vsel %vm1133_vm5, %v5316_v19, %v958_v63 }
  0xd4   : > { %v551_v21 = vpop.permute.xlu1 %550 }
  0xd5   : > { %v755_v33 = vsel %vm745_vm10, %v5310_v16, %v551_v21 }
  0xd6   : > { %v738_v37 = vpop.permute.xlu0 %737  ;;  %v776_v49 = vsel %vm762_vm9, %v755_v33, %v608_v29 }
  0xd7   : > { %v814_v45 = vsel %vm804_vm7, %v797_v42, %v738_v37  ;;  %v5667_v37 = vld [vmem:[%s7171_s5] ss:$0 sm:$0xff] }
  0xd8   : > { %v1014_v48 = vpop.permute.xlu1 %1013  ;;  %4370 = vmatprep.mubr.msk.bf16.mxu0 %vm1311_vm8, %v814_v45 }
  0xd9   : > { %1393 = vmatmul.mubr.bf16.gmra.mrb[16].mxu0 %v776_v49  ;;  %v1159_v16 = vsel %vm804_vm7, %v1143_v34, %v1014_v48 }
  0xda   : > { %v1102_v8 = vpop.permute.xlu0 %1101 }
  0xdb   : > { %v1179_v25 = vsel %vm762_vm9, %v1159_v16, %v1102_v8 }
  0xdc   : > { %v610_v56 = vpop.permute.xlu1 %609  ;;  %1594 = vmatmul.mubr.bf16.gmra.mrb[16].mxu1 %v1179_v25 }
  0xdd   : > { %4389 = vmatprep.mubr.msk.bf16.mxu1 %vm1133_vm5, %v1126_v13 }
  0xde   : > { %v699_v6 = vpop.permute.xlu0 %698 }
  0xdf   : > { %v799_v19 = vsel %vm787_vm6, %v610_v56, %v699_v6 }
  0xe0   : > { %v960_v3 = vpop.permute.xlu1 %959 }
  0xe1   : > { %v1145_v53 = vsel %vm1133_vm5, %v5371_v50, %v960_v3 }
  0xe2   : > { %v553_v20 = vpop.permute.xlu0 %552 }
  0xe3   : > { %v757_v59 = vsel %vm745_vm10, %v5360_v30, %v553_v20 }
  0xe4   : > { %v740_v15 = vpop.permute.xlu1 %739  ;;  %v779_v35 = vsel %vm762_vm9, %v757_v59, %v610_v56 }
  0xe5   : > { %v816_v51 = vsel %vm804_vm7, %v799_v19, %v740_v15 }
  0xe6   : > { %4371 = vmatprep.mubr.msk.bf16.mxu0 %vm1311_vm8, %v816_v51  ;;  %v1016_v57 = vpop.permute.xlu0 %1015 }
  0xe7   : > { %1401 = vmatmul.mubr.bf16.gmra.mrb[20].mxu0 %v779_v35  ;;  %v1161_v30 = vsel %vm804_vm7, %v1145_v53, %v1016_v57 }
  0xe8   : > { %v1104_v55 = vpop.permute.xlu1 %1103 }
  0xe9   : > { %v1182_v9 = vsel %vm762_vm9, %v1161_v30, %v1104_v55 }
  0xea   : > { %1602 = vmatmul.mubr.bf16.gmra.mrb[20].mxu1 %v1182_v9  ;;  %v612_v5 = vpop.permute.xlu0 %611 }
  0xeb   : > { %4390 = vmatprep.mubr.msk.bf16.mxu1 %vm1133_vm5, %v1129_v43 }
  0xec   : > { %v701_v46 = vpop.permute.xlu1 %700 }
  0xed   : > { %v801_v41 = vsel %vm787_vm6, %v612_v5, %v701_v46 }
  0xee   : > { %v962_v22 = vpop.permute.xlu0 %961 }
  0xef   : > { %v1147_v52 = vsel %vm1133_vm5, %v5429_v14, %v962_v22 }
  0xf0   : > { %v555_v39 = vpop.permute.xlu1 %554 }
  0xf1   : > { %v759_v50 = vsel %vm745_vm10, %v5407_v38, %v555_v39 }
  0xf2   : > { %v742_v0 = vpop.permute.xlu0 %741  ;;  %v782_v18 = vsel %vm762_vm9, %v759_v50, %v612_v5 }
  0xf3   : > { %v818_v17 = vsel %vm804_vm7, %v801_v41, %v742_v0 }
  0xf4   : > { %v1018_v47 = vpop.permute.xlu1 %1017  ;;  %4372 = vmatprep.mubr.msk.bf16.mxu0 %vm1311_vm8, %v818_v17 }
  0xf5   : > { %1409 = vmatmul.mubr.bf16.gmra.mrb[24].mxu0 %v782_v18  ;;  %v1163_v38 = vsel %vm804_vm7, %v1147_v52, %v1018_v47 }
  0xf6   : > { %v1106_v2 = vpop.permute.xlu0 %1105 }
  0xf7   : > { %v1185_v32 = vsel %vm762_vm9, %v1163_v38, %v1106_v2 }
  0xf8   : > { %v614_v24 = vpop.permute.xlu1 %613  ;;  %1610 = vmatmul.mubr.bf16.gmra.mrb[24].mxu1 %v1185_v32 }
  0xf9   : > { %4391 = vmatprep.mubr.msk.bf16.mxu1 %vm1133_vm5, %v1132_v10 }
  0xfa   : > { %v703_v60 = vpop.permute.xlu0 %702 }
  0xfb   : > { %v803_v14 = vsel %vm787_vm6, %v614_v24, %v703_v60 }
  0xfc   : > { %v964_v11 = vpop.permute.xlu1 %963 }
  0xfd   : > { %v1149_v29 = vsel %vm1133_vm5, %v5476_v62, %v964_v11 }
  0xfe   : > { %v557_v27 = vpop.permute.xlu0 %556 }
  0xff   : > { %v761_v61 = vsel %vm745_vm10, %v5463_v31, %v557_v27 }
 0x100   : > { %v744_v40 = vpop.permute.xlu1 %743  ;;  %v785_v26 = vsel %vm762_vm9, %v761_v61, %v614_v24 }
 0x101   : > { %v820_v54 = vsel %vm804_vm7, %v803_v14, %v744_v40 }
 0x102   : > { %4373 = vmatprep.mubr.msk.bf16.mxu0 %vm1311_vm8, %v820_v54  ;;  %v1020_v23 = vpop.permute.xlu0 %1019 }
 0x103   : > { %1417 = vmatmul.mubr.bf16.gmra.mrb[28].mxu0 %v785_v26  ;;  %v1165_v63 = vsel %vm804_vm7, %v1149_v29, %v1020_v23 }
 0x104   : > { %v1108_v21 = vpop.permute.xlu1 %1107 }
 0x105   : > { %v1188_v33 = vsel %vm762_vm9, %v1165_v63, %v1108_v21 }
 0x106   : > { %1618 = vmatmul.mubr.bf16.gmra.mrb[28].mxu1 %v1188_v33  ;;  %v1745_v14 = vpop.permute.xlu0 %1744 }
 0x108   : > { %v1747_v40 = vpop.permute.xlu1 %1746 }
 0x177   : > { %v1563_v31 = vpop.f32.mrb[0].mxu1 }
 0x178   : > { %v1565_v42 = vpop.f32.mrb[1].mxu1 }
 0x179   : > { %v5669_v58 = vpop.f32.mrb[0].mxu0  ;;  %v1566_v62 = vpop.f32.mrb[2].mxu1 }
 0x17a   : > { %v1564_v44 = vadd.f32 %v1563_v31, %v5669_v58  ;;  %v1364_v45 = vpop.f32.mrb[1].mxu0  ;;  %v1568_v48 = vpop.f32.mrb[3].mxu1 }
 0x17b   : > { %v5672_v49 = vpop.f32.mrb[2].mxu0 }
 0x17c   : > { %v1632_v34 = vadd.f32 %v5667_v37, %v1564_v44  ;;  %v1567_v16 = vadd.f32 %v1566_v62, %v5672_v49  ;;  %v1367_v8 = vpop.f32.mrb[3].mxu0 }
 0x17e   : > { %v1648_v13 = vsub.f32 0.0, %v1632_v34  ;;  %v1633_v25 = vadd.f32 %v5667_v37, %v1567_v16 }
 0x180   : > { %v1664_v56 = vmul.f32 1.442695, %v1648_v13  ;;  %v1649_v6 = vsub.f32 0.0, %v1633_v25 }
 0x182   : > { %4612 = vpow2.f32 %v1664_v56  ;;  %v1666_v3 = vmul.f32 1.442695, %v1649_v6  ;;  %v5677_v20 = vpop.f32.mrb[4].mxu0 }
 0x183   : > { %v1372_v59 = vpop.f32.mrb[5].mxu0 }
 0x184   : > { %4614 = vpow2.f32 %v1666_v3  ;;  %v5679_v19 = vpop.f32.mrb[6].mxu0 }
 0x185   : > { %v1375_v15 = vpop.f32.mrb[7].mxu0  ;;  %v1571_v35 = vpop.f32.mrb[4].mxu1 }
 0x186   : > { %v1572_v1 = vadd.f32 %v1571_v35, %v5677_v20  ;;  %v1573_v28 = vpop.f32.mrb[5].mxu1  ;;  %v1749_v15 = vpop.permute.xlu0 %1748 }
 0x187   : > { %v1574_v51 = vpop.f32.mrb[6].mxu1  ;;  %v1751_v35 = vpop.permute.xlu1 %1750 }
 0x188   : > { %v1634_v53 = vadd.f32 %v5667_v37, %v1572_v1  ;;  %v1575_v57 = vadd.f32 %v1574_v51, %v5679_v19  ;;  %v1576_v30 = vpop.f32.mrb[7].mxu1 }
 0x18a   : > { %v1650_v55 = vsub.f32 0.0, %v1634_v53  ;;  %v1635_v43 = vadd.f32 %v5667_v37, %v1575_v57 }
 0x18c   : > { %v4613_v9 = vpop.eup %4612  ;;  %v1668_v5 = vmul.f32 1.442695, %v1650_v55  ;;  %v1651_v46 = vsub.f32 0.0, %v1635_v43 }
 0x18d   : > { %v1696_v22 = vadd.f32 1.0, %v4613_v9 }
 0x18e   : > { %v4615_v39 = vpop.eup %4614  ;;  %4616 = vpow2.f32 %v1668_v5  ;;  %v1670_v50 = vmul.f32 1.442695, %v1651_v46 }
 0x18f   : > { %4618 = vrcp.f32 %v1696_v22  ;;  %v1697_v41 = vadd.f32 1.0, %v4615_v39 }
 0x190   : > { %4620 = vpow2.f32 %v1670_v50  ;;  %v5685_v0 = vpop.f32.mrb[8].mxu0 }
 0x191   : > { %4622 = vrcp.f32 %v1697_v41  ;;  %v1380_v36 = vpop.f32.mrb[9].mxu0 }
 0x192   : > { %v5687_v4 = vpop.f32.mrb[10].mxu0 }
 0x193   : > { %v1383_v17 = vpop.f32.mrb[11].mxu0  ;;  %v1579_v47 = vpop.f32.mrb[8].mxu1 }
 0x194   : > { %v1580_v18 = vadd.f32 %v1579_v47, %v5685_v0  ;;  %v1581_v52 = vpop.f32.mrb[9].mxu1 }
 0x195   : > { %v1582_v38 = vpop.f32.mrb[10].mxu1 }
 0x196   : > { %v1636_v2 = vadd.f32 %v5667_v37, %v1580_v18  ;;  %v1583_v10 = vadd.f32 %v1582_v38, %v5687_v4  ;;  %v1584_v32 = vpop.f32.mrb[11].mxu1 }
 0x198   : > { %v4617_v24 = vpop.eup %4616  ;;  %v1652_v60 = vsub.f32 0.0, %v1636_v2  ;;  %v1637_v11 = vadd.f32 %v5667_v37, %v1583_v10 }
 0x199   : > { %v5693_v27 = vpop.eup %4618  ;;  %v1698_v61 = vadd.f32 1.0, %v4617_v24 }
 0x19a   : > { %v4621_v26 = vpop.eup %4620  ;;  %v1672_v54 = vmul.f32 1.442695, %v1652_v60  ;;  %v1653_v29 = vsub.f32 0.0, %v1637_v11  ;;  %v1792_v33 = vmul.f32 %v5693_v27, %v1745_v14  ;;  %v1753_v11 = vpop.permute.xlu0 %1752 }
 0x19b   : > { %v5695_v23 = vpop.eup %4622  ;;  %4624 = vrcp.f32 %v1698_v61  ;;  %v1699_v63 = vadd.f32 1.0, %v4621_v26  ;;  %v1755_v61 = vpop.permute.xlu1 %1754 }
 0x19c   : > { %4626 = vpow2.f32 %v1672_v54  ;;  %v1674_v21 = vmul.f32 1.442695, %v1653_v29  ;;  %v1793_v31 = vmul.f32 %v5695_v23, %v1747_v40 }
 0x19d   : > { %4628 = vrcp.f32 %v1699_v63 }
 0x19e   : > { %4630 = vpow2.f32 %v1674_v21  ;;  %v1808_v42 = vpack.c.bf16 %v1793_v31, %v1792_v33  ;;  %v5699_v62 = vpop.f32.mrb[12].mxu0 }
 0x19f   : > { %v1388_v44 = vpop.f32.mrb[13].mxu0 }
 0x1a0   : > { %v5701_v45 = vpop.f32.mrb[14].mxu0  ;;  %v1824_v48 = vrot.slane %v1808_v42, 7 }
 0x1a1   : > { %v1391_v34 = vpop.f32.mrb[15].mxu0  ;;  %v1587_v16 = vpop.f32.mrb[12].mxu1 }
 0x1a2   : > { %v1588_v8 = vadd.f32 %v1587_v16, %v5699_v62  ;;  %v1589_v13 = vpop.f32.mrb[13].mxu1  ;;  %1832 = vrot.lane.b32.xlu0 %v1824_v48, %s7205_s30 }
 0x1a3   : > { %v1590_v25 = vpop.f32.mrb[14].mxu1 }
 0x1a4   : > { %v1638_v56 = vadd.f32 %v5667_v37, %v1588_v8  ;;  %v1591_v6 = vadd.f32 %v1590_v25, %v5701_v45  ;;  %v1592_v3 = vpop.f32.mrb[15].mxu1 }
 0x1a5   : > { %v5707_v59 = vpop.eup %4624 }
 0x1a6   : > { %v4627_v1 = vpop.eup %4626  ;;  %v1654_v28 = vsub.f32 0.0, %v1638_v56  ;;  %v1639_v51 = vadd.f32 %v5667_v37, %v1591_v6  ;;  %v1794_v9 = vmul.f32 %v5707_v59, %v1749_v15 }
 0x1a7   : > { %v5710_v53 = vpop.eup %4628  ;;  %v1700_v57 = vadd.f32 1.0, %v4627_v1 }
 0x1a8   : > { %v4631_v30 = vpop.eup %4630  ;;  %v1676_v55 = vmul.f32 1.442695, %v1654_v28  ;;  %v1655_v43 = vsub.f32 0.0, %v1639_v51  ;;  %v1795_v5 = vmul.f32 %v5710_v53, %v1751_v35 }
 0x1a9   : > { %4632 = vrcp.f32 %v1700_v57  ;;  %v1701_v46 = vadd.f32 1.0, %v4631_v30  ;;  %v1757_v30 = vpop.permute.xlu0 %1756 }
 0x1aa   : > { %4634 = vpow2.f32 %v1676_v55  ;;  %v1678_v22 = vmul.f32 1.442695, %v1655_v43  ;;  %v1809_v39 = vpack.c.bf16 %v1795_v5, %v1794_v9  ;;  %v1759_v55 = vpop.permute.xlu1 %1758 }
 0x1ab   : > { %4636 = vrcp.f32 %v1701_v46 }
 0x1ac   : > { %4638 = vpow2.f32 %v1678_v22  ;;  %v5714_v50 = vpop.f32.mrb[16].mxu0  ;;  %v1825_v41 = vrot.slane %v1809_v39, 7 }
 0x1ad   : > { %v1396_v36 = vpop.f32.mrb[17].mxu0 }
 0x1ae   : > { %1834 = vrot.lane.b32.xlu1 %v1825_v41, %s7205_s30  ;;  %v5717_v17 = vpop.f32.mrb[18].mxu0 }
 0x1af   : > { %v1399_v47 = vpop.f32.mrb[19].mxu0  ;;  %v1595_v18 = vpop.f32.mrb[16].mxu1 }
 0x1b0   : > { %v1596_v52 = vadd.f32 %v1595_v18, %v5714_v50  ;;  %v1597_v38 = vpop.f32.mrb[17].mxu1 }
 0x1b1   : > { %v1598_v2 = vpop.f32.mrb[18].mxu1 }
 0x1b2   : > { %v1640_v10 = vadd.f32 %v5667_v37, %v1596_v52  ;;  %v1599_v32 = vadd.f32 %v1598_v2, %v5717_v17  ;;  %v1600_v24 = vpop.f32.mrb[19].mxu1 }
 0x1b3   : > { %v5722_v60 = vpop.eup %4632 }
 0x1b4   : > { %v4635_v14 = vpop.eup %4634  ;;  %v1656_v40 = vsub.f32 0.0, %v1640_v10  ;;  %v1641_v26 = vadd.f32 %v5667_v37, %v1599_v32  ;;  %v1796_v31 = vmul.f32 %v5722_v60, %v1753_v11 }
 0x1b5   : > { %v5725_v54 = vpop.eup %4636  ;;  %v1702_v29 = vadd.f32 1.0, %v4635_v14 }
 0x1b6   : > { %v4639_v63 = vpop.eup %4638  ;;  %v1680_v21 = vmul.f32 1.442695, %v1656_v40  ;;  %v1657_v33 = vsub.f32 0.0, %v1641_v26  ;;  %v1797_v42 = vmul.f32 %v5725_v54, %v1755_v61 }
 0x1b7   : > { %4640 = vrcp.f32 %v1702_v29  ;;  %v1703_v44 = vadd.f32 1.0, %v4639_v63 }
 0x1b8   : > { %4642 = vpow2.f32 %v1680_v21  ;;  %v1682_v48 = vmul.f32 1.442695, %v1657_v33  ;;  %v1810_v34 = vpack.c.bf16 %v1797_v42, %v1796_v31  ;;  %v1761_v42 = vpop.permute.xlu0 %1760 }
 0x1b9   : > { %4644 = vrcp.f32 %v1703_v44  ;;  %v1763_v44 = vpop.permute.xlu1 %1762 }
 0x1ba   : > { %4646 = vpow2.f32 %v1682_v48  ;;  %v5729_v16 = vpop.f32.mrb[20].mxu0  ;;  %v1826_v8 = vrot.slane %v1810_v34, 7 }
 0x1bb   : > { %v1404_v13 = vpop.f32.mrb[21].mxu0 }
 0x1bc   : > { %v5731_v25 = vpop.f32.mrb[22].mxu0  ;;  %1836 = vrot.lane.b32.xlu0 %v1826_v8, %s7205_s30 }
 0x1bd   : > { %v1407_v56 = vpop.f32.mrb[23].mxu0  ;;  %v1603_v6 = vpop.f32.mrb[20].mxu1 }
 0x1be   : > { %v1604_v3 = vadd.f32 %v1603_v6, %v5729_v16  ;;  %v1605_v15 = vpop.f32.mrb[21].mxu1 }
 0x1bf   : > { %v1606_v35 = vpop.f32.mrb[22].mxu1 }
 0x1c0   : > { %v1642_v1 = vadd.f32 %v5667_v37, %v1604_v3  ;;  %v1607_v28 = vadd.f32 %v1606_v35, %v5731_v25  ;;  %v1608_v51 = vpop.f32.mrb[23].mxu1 }
 0x1c1   : > { %v5737_v57 = vpop.eup %4640 }
 0x1c2   : > { %v4643_v43 = vpop.eup %4642  ;;  %v1658_v9 = vsub.f32 0.0, %v1642_v1  ;;  %v1643_v5 = vadd.f32 %v5667_v37, %v1607_v28  ;;  %v1798_v47 = vmul.f32 %v5737_v57, %v1757_v30 }
 0x1c3   : > { %v5740_v46 = vpop.eup %4644  ;;  %v1704_v22 = vadd.f32 1.0, %v4643_v43 }
 0x1c4   : > { %v4647_v39 = vpop.eup %4646  ;;  %v1684_v41 = vmul.f32 1.442695, %v1658_v9  ;;  %v1659_v36 = vsub.f32 0.0, %v1643_v5  ;;  %v1799_v18 = vmul.f32 %v5740_v46, %v1759_v55 }
 0x1c5   : > { %4648 = vrcp.f32 %v1704_v22  ;;  %v1705_v52 = vadd.f32 1.0, %v4647_v39 }
 0x1c6   : > { %4650 = vpow2.f32 %v1684_v41  ;;  %v1686_v38 = vmul.f32 1.442695, %v1659_v36  ;;  %v1811_v2 = vpack.c.bf16 %v1799_v18, %v1798_v47 }
 0x1c7   : > { %4652 = vrcp.f32 %v1705_v52 }
 0x1c8   : > { %4654 = vpow2.f32 %v1686_v38  ;;  %v5744_v10 = vpop.f32.mrb[24].mxu0  ;;  %v1827_v32 = vrot.slane %v1811_v2, 7 }
 0x1c9   : > { %v1412_v24 = vpop.f32.mrb[25].mxu0 }
 0x1ca   : > { %1838 = vrot.lane.b32.xlu1 %v1827_v32, %s7205_s30  ;;  %v5747_v11 = vpop.f32.mrb[26].mxu0  ;;  %v1765_v32 = vpop.permute.xlu0 %1764 }
 0x1cb   : > { %v1415_v61 = vpop.f32.mrb[27].mxu0  ;;  %v1611_v14 = vpop.f32.mrb[24].mxu1 }
 0x1cc   : > { %v1612_v40 = vadd.f32 %v1611_v14, %v5744_v10  ;;  %v1613_v26 = vpop.f32.mrb[25].mxu1  ;;  %v1767_v24 = vpop.permute.xlu1 %1766 }
 0x1cd   : > { %v1614_v29 = vpop.f32.mrb[26].mxu1 }
 0x1ce   : > { %v1644_v63 = vadd.f32 %v5667_v37, %v1612_v40  ;;  %v1615_v21 = vadd.f32 %v1614_v29, %v5747_v11  ;;  %v1616_v33 = vpop.f32.mrb[27].mxu1 }
 0x1cf   : > { %v5752_v31 = vpop.eup %4648 }
 0x1d0   : > { %v4651_v48 = vpop.eup %4650  ;;  %v1660_v34 = vsub.f32 0.0, %v1644_v63  ;;  %v1645_v8 = vadd.f32 %v5667_v37, %v1615_v21  ;;  %v1800_v35 = vmul.f32 %v5752_v31, %v1761_v42 }
 0x1d1   : > { %v5755_v13 = vpop.eup %4652  ;;  %v1706_v56 = vadd.f32 1.0, %v4651_v48 }
 0x1d2   : > { %v4655_v6 = vpop.eup %4654  ;;  %v1688_v3 = vmul.f32 1.442695, %v1660_v34  ;;  %v1661_v15 = vsub.f32 0.0, %v1645_v8  ;;  %v1801_v1 = vmul.f32 %v5755_v13, %v1763_v44 }
 0x1d3   : > { %4656 = vrcp.f32 %v1706_v56  ;;  %v1707_v28 = vadd.f32 1.0, %v4655_v6 }
 0x1d4   : > { %4658 = vpow2.f32 %v1688_v3  ;;  %v1690_v51 = vmul.f32 1.442695, %v1661_v15  ;;  %v1812_v30 = vpack.c.bf16 %v1801_v1, %v1800_v35  ;;  %v1769_v3 = vpop.permute.xlu0 %1768  ;;  %v1771_v15 = vpop.permute.xlu1 %1770  ;;  %v4567_v1 = vld [vmem:[%s7170_s4] sm:$0xff]  }
 0x1d5   : > { %4660 = vrcp.f32 %v1707_v28  ;;  %2361 = vmatpush1.bf16.msra.mxu1 %v4567_v1 }
 0x1d6   : > { %4662 = vpow2.f32 %v1690_v51  ;;  %v5759_v55 = vpop.f32.mrb[28].mxu0  ;;  %v1828_v43 = vrot.slane %v1812_v30, 7 }
 0x1d7   : > { %v1420_v9 = vpop.f32.mrb[29].mxu0 }
 0x1d8   : > { %v5761_v5 = vpop.f32.mrb[30].mxu0  ;;  %1840 = vrot.lane.b32.xlu0 %v1828_v43, %s7205_s30 }
 0x1d9   : > { %v1423_v22 = vpop.f32.mrb[31].mxu0  ;;  %v1619_v39 = vpop.f32.mrb[28].mxu1 }
 0x1da   : > { %v1620_v41 = vadd.f32 %v1619_v39, %v5759_v55  ;;  %v1621_v36 = vpop.f32.mrb[29].mxu1  ;;  %v7222_v39 = vmov 0  }
 0x1db   : > { %v1622_v47 = vpop.f32.mrb[30].mxu1  ;;  %2362 = vmatprep.subr.bf16.mxu1 %v7222_v39 }
 0x1dc   : > { %v1646_v18 = vadd.f32 %v5667_v37, %v1620_v41  ;;  %v1623_v52 = vadd.f32 %v1622_v47, %v5761_v5  ;;  %v1624_v38 = vpop.f32.mrb[31].mxu1  ;;  %v4568_v41 = vld [vmem:[%s7170_s4 + $0x8] sm:$0xff]  }
 0x1dd   : > { %v5767_v2 = vpop.eup %4656  ;;  %2363 = vmatpush1.bf16.msra.mxu1 %v4568_v41  ;;  %v1773_v38 = vpop.permute.xlu0 %1772 }
 0x1de   : > { %v4659_v61 = vpop.eup %4658  ;;  %v1662_v14 = vsub.f32 0.0, %v1646_v18  ;;  %v1647_v40 = vadd.f32 %v5667_v37, %v1623_v52  ;;  %v1802_v42 = vmul.f32 %v5767_v2, %v1765_v32  ;;  %2364 = vmatprep.subr.bf16.mxu1 %v7222_v39  ;;  %v4569_v18 = vld [vmem:[%s7170_s4 + $0x10] sm:$0xff]   ;;  %v1775_v32 = vpop.permute.xlu1 %1774 }
 0x1df   : > { %v5770_v26 = vpop.eup %4660  ;;  %v1708_v29 = vadd.f32 1.0, %v4659_v61 }
 0x1e0   : > { %7219 = vst [vmem:[#allocation11_spill] sm:$0xff] %v5770_v26  ;;  %v4663_v63 = vpop.eup %4662  ;;  %v1692_v21 = vmul.f32 1.442695, %v1662_v14  ;;  %v1663_v33 = vsub.f32 0.0, %v1647_v40  ;;  %v1803_v44 = vmul.f32 %v5770_v26, %v1767_v24  ;;  %v4570_v24 = vld [vmem:[%s7170_s4 + $0x18] sm:$0xff]  }
 0x1e1   : > { %4664 = vrcp.f32 %v1708_v29  ;;  %v1709_v48 = vadd.f32 1.0, %v4663_v63  ;;  %2365 = vmatpush1.bf16.msra.mxu1 %v4569_v18  ;;  %v4571_v29 = vld [vmem:[%s7170_s4 + $0x20] sm:$0xff]  }
 0x1e2   : > { %4666 = vpow2.f32 %v1692_v21  ;;  %v1694_v34 = vmul.f32 1.442695, %v1663_v33  ;;  %v1813_v8 = vpack.c.bf16 %v1803_v44, %v1802_v42  ;;  %2366 = vmatprep.subr.bf16.mxu1 %v7222_v39  ;;  %v4572_v33 = vld [vmem:[%s7170_s4 + $0x28] sm:$0xff]   ;;  %v4573_v42 = vld [vmem:[%s7170_s4 + $0x30] sm:$0xff]   ;;  %v4574_v44 = vld [vmem:[%s7170_s4 + $0x38] sm:$0xff]  }
 0x1e3   : > { %4668 = vrcp.f32 %v1709_v48  ;;  %v4575_v48 = vld [vmem:[%s7170_s4 + $0x40] sm:$0xff]  }
 0x1e4   : > { %4670 = vpow2.f32 %v1694_v34  ;;  %v1829_v56 = vrot.slane %v1813_v8, 7  ;;  %v4576_v34 = vld [vmem:[%s7170_s4 + $0x48] sm:$0xff]  }
 0x1e5   : > { %2367 = vmatpush1.bf16.msra.mxu1 %v4570_v24 }
 0x1e6   : > { %1842 = vrot.lane.b32.xlu1 %v1829_v56, %s7205_s30  ;;  %2368 = vmatprep.subr.bf16.mxu1 %v7222_v39 }
 0x1e9   : > { %2369 = vmatpush1.bf16.msra.mxu1 %v4571_v29 }
 0x1ea   : > { %2370 = vmatprep.subr.bf16.mxu1 %v7222_v39 }
 0x1eb   : > { %v5775_v6 = vpop.eup %4664 }
 0x1ec   : > { %7220 = vst [vmem:[#allocation12_spill] sm:$0xff] %v5775_v6  ;;  %v4667_v35 = vpop.eup %4666  ;;  %v1804_v43 = vmul.f32 %v5775_v6, %v1769_v3 }
 0x1ed   : > { %v5780_v28 = vpop.eup %4668  ;;  %v1710_v51 = vadd.f32 1.0, %v4667_v35  ;;  %2371 = vmatpush1.bf16.msra.mxu1 %v4572_v33 }
 0x1ee   : > { %7221 = vst [vmem:[#allocation13_spill] sm:$0xff] %v5780_v28  ;;  %v4671_v30 = vpop.eup %4670  ;;  %v1805_v9 = vmul.f32 %v5780_v28, %v1771_v15  ;;  %2372 = vmatprep.subr.bf16.mxu1 %v7222_v39 }
 0x1ef   : > { %4672 = vrcp.f32 %v1710_v51  ;;  %v1711_v22 = vadd.f32 1.0, %v4671_v30 }
 0x1f0   : > { %v1814_v36 = vpack.c.bf16 %v1805_v9, %v1804_v43 }
 0x1f1   : > { %4674 = vrcp.f32 %v1711_v22  ;;  %2373 = vmatpush1.bf16.msra.mxu1 %v4573_v42 }
 0x1f2   : > { %v1830_v47 = vrot.slane %v1814_v36, 7  ;;  %2374 = vmatprep.subr.bf16.mxu1 %v7222_v39 }
 0x1f4   : > { %1844 = vrot.lane.b32.xlu0 %v1830_v47, %s7205_s30 }
 0x1f5   : > { %2375 = vmatpush1.bf16.msra.mxu1 %v4574_v44 }
 0x1f6   : > { %2376 = vmatprep.subr.bf16.mxu1 %v7222_v39 }
 0x1f9   : > { %v5794_v52 = vpop.eup %4672  ;;  %2377 = vmatpush1.bf16.msra.mxu1 %v4575_v48 }
 0x1fa   : > { %7223 = vst [vmem:[#allocation14_spill] sm:$0xff] %v5794_v52  ;;  %v1806_v14 = vmul.f32 %v5794_v52, %v1773_v38  ;;  %2378 = vmatprep.subr.bf16.mxu1 %v7222_v39 }
 0x1fb   : > { %v5799_v61 = vpop.eup %4674 }
 0x1fc   : > { %7224 = vst [vmem:[#allocation15_spill] sm:$0xff] %v5799_v61  ;;  %v1807_v40 = vmul.f32 %v5799_v61, %v1775_v32 }
 0x1fd   : > { %2379 = vmatpush1.bf16.msra.mxu1 %v4576_v34 }
 0x1fe   : > { %v1815_v63 = vpack.c.bf16 %v1807_v40, %v1806_v14  ;;  %3152 = vmatprep.subr.bf16.mxu1 %v7222_v39 }
 0x200   : > { %v1831_v21 = vrot.slane %v1815_v63, 7 }
 0x202   : > { %1846 = vrot.lane.b32.xlu1 %v1831_v21, %s7205_s30 }
 0x214   : > { %v1833_v8 = vpop.permute.xlu0 %1832 }
 0x215   : > { %v5830_v56 = vsel %vm435_vm0, 0, %v1833_v8  ;;  %v1864_v3 = vsel %vm435_vm0, %v1833_v8, 0 }
 0x216   : > { %v1874_v15 = vshll.u32 %v5830_v56, 16  ;;  %v1878_v35 = vshll.u32 %v1864_v3, 16  ;;  %v2027_v1 = vshrl.u32 %v1864_v3, 16  ;;  %v2113_v51 = vrot.slane %v1864_v3, 2 }
 0x217   : > { %v2112_v30 = vrot.slane %v5830_v56, 2  ;;  %v1984_v43 = vrot.slane %v5830_v56, 1  ;;  %v1985_v9 = vrot.slane %v1864_v3, 1  ;;  %v1872_v22 = vshrl.u32 %v5830_v56, 16 }
 0x218   : > { %v2029_v41 = vrot.slane %v2027_v1, 1  ;;  %v1876_v36 = vrot.slane %v1874_v15, 1  ;;  %v2025_v47 = vrot.slane %v1874_v15, 2  ;;  %v2030_v24 = vrot.slane %v1878_v35, 2 }
 0x219   : > { %v2114_v18 = vsel %vm704_vm2, %v2112_v30, %v2113_v51  ;;  %v1986_v38 = vsel %vm574_vm1, %v1984_v43, %v1985_v9  ;;  %v2024_v32 = vrot.slane %v1872_v22, 1  ;;  %v1880_v40 = vrot.slane %v1878_v35, 1 }
 0x21a   : > { %4403 = vmatprep.mubr.msk.bf16.mxu1 %vm1133_vm5, %v2114_v18  ;;  %2008 = vrot.lane.b32.xlu1 %v1986_v38, %s7209_s11  ;;  %v1877_v14 = vor.u32 %v1876_v36, %v1872_v22  ;;  %v2031_v21 = vor.u32 %v2030_v24, %v2029_v41 }
 0x21b   : > { %v2026_v63 = vor.u32 %v2025_v47, %v2024_v32 }
 0x21c   : > { %v1881_v29 = vsel %vm461_vm4, %v1877_v14, %v1880_v40 }
 0x21d   : > { %1952 = vrot.lane.b32.xlu0 %v1881_v29, %s7207_s21  ;;  %v2032_v42 = vsel %vm615_vm3, %v2026_v63, %v2031_v21 }
 0x220   : > { %v1835_v33 = vpop.permute.xlu1 %1834 }
 0x221   : > { %v5845_v44 = vsel %vm435_vm0, 0, %v1835_v33  ;;  %v5848_v48 = vsel %vm435_vm0, %v1835_v33, 0  ;;  %2096 = vrot.lane.b32.xlu0 %v2032_v42, %s7205_s30 }
 0x222   : > { %v1884_v34 = vshll.u32 %v5845_v44, 16  ;;  %v1888_v8 = vshll.u32 %v5848_v48, 16  ;;  %v2036_v3 = vshrl.u32 %v5848_v48, 16  ;;  %v1987_v15 = vrot.slane %v5845_v44, 1 }
 0x223   : > { %v1988_v35 = vrot.slane %v5848_v48, 1  ;;  %v1882_v1 = vshrl.u32 %v5845_v44, 16 }
 0x224   : > { %v2038_v51 = vrot.slane %v2036_v3, 1  ;;  %v1886_v30 = vrot.slane %v1884_v34, 1  ;;  %v2034_v43 = vrot.slane %v1884_v34, 2  ;;  %v2039_v41 = vrot.slane %v1888_v8, 2 }
 0x225   : > { %v1989_v9 = vsel %vm574_vm1, %v1987_v15, %v1988_v35  ;;  %v2033_v22 = vrot.slane %v1882_v1, 1  ;;  %v1890_v47 = vrot.slane %v1888_v8, 1 }
 0x226   : > { %2010 = vrot.lane.b32.xlu0 %v1989_v9, %s7209_s11  ;;  %v1887_v36 = vor.u32 %v1886_v30, %v1882_v1  ;;  %v2040_v32 = vor.u32 %v2039_v41, %v2038_v51 }
 0x227   : > { %v2035_v38 = vor.u32 %v2034_v43, %v2033_v22 }
 0x228   : > { %v1891_v18 = vsel %vm461_vm4, %v1887_v36, %v1890_v47 }
 0x229   : > { %1954 = vrot.lane.b32.xlu1 %v1891_v18, %s7207_s21  ;;  %v2041_v24 = vsel %vm615_vm3, %v2035_v38, %v2040_v32 }
 0x22d   : > { %2098 = vrot.lane.b32.xlu1 %v2041_v24, %s7205_s30 }
 0x22e   : > { %v1837_v14 = vpop.permute.xlu0 %1836 }
 0x22f   : > { %v5864_v40 = vsel %vm435_vm0, 0, %v1837_v14  ;;  %v5867_v29 = vsel %vm435_vm0, %v1837_v14, 0 }
 0x230   : > { %v1894_v63 = vshll.u32 %v5864_v40, 16  ;;  %v1898_v21 = vshll.u32 %v5867_v29, 16  ;;  %v2045_v33 = vshrl.u32 %v5867_v29, 16  ;;  %v1990_v42 = vrot.slane %v5864_v40, 1 }
 0x231   : > { %v1991_v34 = vrot.slane %v5867_v29, 1  ;;  %v1892_v8 = vshrl.u32 %v5864_v40, 16 }
 0x232   : > { %v2047_v3 = vrot.slane %v2045_v33, 1  ;;  %v1896_v15 = vrot.slane %v1894_v63, 1  ;;  %v2043_v35 = vrot.slane %v1894_v63, 2  ;;  %v2048_v30 = vrot.slane %v1898_v21, 2 }
 0x233   : > { %v1992_v1 = vsel %vm574_vm1, %v1990_v42, %v1991_v34  ;;  %v2042_v51 = vrot.slane %v1892_v8, 1  ;;  %v1900_v9 = vrot.slane %v1898_v21, 1 }
 0x234   : > { %2012 = vrot.lane.b32.xlu1 %v1992_v1, %s7209_s11  ;;  %v1897_v43 = vor.u32 %v1896_v15, %v1892_v8  ;;  %v2049_v36 = vor.u32 %v2048_v30, %v2047_v3 }
 0x235   : > { %v2044_v41 = vor.u32 %v2043_v35, %v2042_v51 }
 0x236   : > { %v1901_v22 = vsel %vm461_vm4, %v1897_v43, %v1900_v9 }
 0x237   : > { %1956 = vrot.lane.b32.xlu0 %v1901_v22, %s7207_s21  ;;  %v2050_v47 = vsel %vm615_vm3, %v2044_v41, %v2049_v36 }
 0x23b   : > { %2100 = vrot.lane.b32.xlu0 %v2050_v47, %s7205_s30 }
 0x23c   : > { %v1839_v18 = vpop.permute.xlu1 %1838 }
 0x23d   : > { %v5882_v38 = vsel %vm435_vm0, 0, %v1839_v18  ;;  %v5885_v32 = vsel %vm435_vm0, %v1839_v18, 0 }
 0x23e   : > { %v1904_v24 = vshll.u32 %v5882_v38, 16  ;;  %v1908_v14 = vshll.u32 %v5885_v32, 16  ;;  %v2054_v63 = vshrl.u32 %v5885_v32, 16  ;;  %v1993_v21 = vrot.slane %v5882_v38, 1 }
 0x23f   : > { %v1994_v33 = vrot.slane %v5885_v32, 1  ;;  %v1902_v42 = vshrl.u32 %v5882_v38, 16 }
 0x240   : > { %v2056_v34 = vrot.slane %v2054_v63, 1  ;;  %v1906_v8 = vrot.slane %v1904_v24, 1  ;;  %v2052_v3 = vrot.slane %v1904_v24, 2  ;;  %v2057_v1 = vrot.slane %v1908_v14, 2 }
 0x241   : > { %v1995_v15 = vsel %vm574_vm1, %v1993_v21, %v1994_v33  ;;  %v2051_v35 = vrot.slane %v1902_v42, 1  ;;  %v1910_v30 = vrot.slane %v1908_v14, 1 }
 0x242   : > { %2014 = vrot.lane.b32.xlu0 %v1995_v15, %s7209_s11  ;;  %v1907_v51 = vor.u32 %v1906_v8, %v1902_v42  ;;  %v2058_v22 = vor.u32 %v2057_v1, %v2056_v34 }
 0x243   : > { %v2053_v9 = vor.u32 %v2052_v3, %v2051_v35 }
 0x244   : > { %v1911_v43 = vsel %vm461_vm4, %v1907_v51, %v1910_v30 }
 0x245   : > { %1958 = vrot.lane.b32.xlu1 %v1911_v43, %s7207_s21  ;;  %v2059_v41 = vsel %vm615_vm3, %v2053_v9, %v2058_v22 }
 0x249   : > { %2102 = vrot.lane.b32.xlu1 %v2059_v41, %s7205_s30 }
 0x24a   : > { %v1841_v36 = vpop.permute.xlu0 %1840 }
 0x24b   : > { %v5900_v47 = vsel %vm435_vm0, 0, %v1841_v36  ;;  %v5903_v18 = vsel %vm435_vm0, %v1841_v36, 0 }
 0x24c   : > { %v1914_v24 = vshll.u32 %v5900_v47, 16  ;;  %v1918_v14 = vshll.u32 %v5903_v18, 16  ;;  %v2063_v63 = vshrl.u32 %v5903_v18, 16  ;;  %v1996_v21 = vrot.slane %v5900_v47, 1 }
 0x24d   : > { %v1997_v33 = vrot.slane %v5903_v18, 1  ;;  %v1912_v42 = vshrl.u32 %v5900_v47, 16 }
 0x24e   : > { %v2065_v34 = vrot.slane %v2063_v63, 1  ;;  %v1916_v8 = vrot.slane %v1914_v24, 1  ;;  %v2061_v3 = vrot.slane %v1914_v24, 2  ;;  %v2066_v1 = vrot.slane %v1918_v14, 2 }
 0x24f   : > { %v1998_v15 = vsel %vm574_vm1, %v1996_v21, %v1997_v33  ;;  %v2060_v35 = vrot.slane %v1912_v42, 1  ;;  %v1920_v30 = vrot.slane %v1918_v14, 1 }
 0x250   : > { %2016 = vrot.lane.b32.xlu1 %v1998_v15, %s7209_s11  ;;  %v1917_v51 = vor.u32 %v1916_v8, %v1912_v42  ;;  %v2067_v22 = vor.u32 %v2066_v1, %v2065_v34 }
 0x251   : > { %v2062_v9 = vor.u32 %v2061_v3, %v2060_v35 }
 0x252   : > { %v1921_v43 = vsel %vm461_vm4, %v1917_v51, %v1920_v30 }
 0x253   : > { %1960 = vrot.lane.b32.xlu0 %v1921_v43, %s7207_s21  ;;  %v2068_v41 = vsel %vm615_vm3, %v2062_v9, %v2067_v22 }
 0x257   : > { %2104 = vrot.lane.b32.xlu0 %v2068_v41, %s7205_s30 }
 0x258   : > { %v1843_v36 = vpop.permute.xlu1 %1842 }
 0x259   : > { %v5918_v24 = vsel %vm435_vm0, 0, %v1843_v36  ;;  %v5921_v63 = vsel %vm435_vm0, %v1843_v36, 0 }
 0x25a   : > { %v1924_v21 = vshll.u32 %v5918_v24, 16  ;;  %v1928_v14 = vshll.u32 %v5921_v63, 16  ;;  %v2072_v33 = vshrl.u32 %v5921_v63, 16  ;;  %v1999_v42 = vrot.slane %v5918_v24, 1 }
 0x25b   : > { %v2000_v34 = vrot.slane %v5921_v63, 1  ;;  %v1922_v8 = vshrl.u32 %v5918_v24, 16 }
 0x25c   : > { %v2074_v3 = vrot.slane %v2072_v33, 1  ;;  %v1926_v15 = vrot.slane %v1924_v21, 1  ;;  %v2070_v35 = vrot.slane %v1924_v21, 2  ;;  %v2075_v30 = vrot.slane %v1928_v14, 2 }
 0x25d   : > { %v2001_v1 = vsel %vm574_vm1, %v1999_v42, %v2000_v34  ;;  %v2069_v51 = vrot.slane %v1922_v8, 1  ;;  %v1930_v9 = vrot.slane %v1928_v14, 1 }
 0x25e   : > { %2018 = vrot.lane.b32.xlu0 %v2001_v1, %s7209_s11  ;;  %v1927_v43 = vor.u32 %v1926_v15, %v1922_v8  ;;  %v2076_v36 = vor.u32 %v2075_v30, %v2074_v3 }
 0x25f   : > { %v2071_v41 = vor.u32 %v2070_v35, %v2069_v51 }
 0x260   : > { %v1931_v22 = vsel %vm461_vm4, %v1927_v43, %v1930_v9 }
 0x261   : > { %1962 = vrot.lane.b32.xlu1 %v1931_v22, %s7207_s21  ;;  %v2077_v61 = vsel %vm615_vm3, %v2071_v41, %v2076_v36 }
 0x265   : > { %2106 = vrot.lane.b32.xlu1 %v2077_v61, %s7205_s30 }
 0x266   : > { %v1845_v33 = vpop.permute.xlu0 %1844 }
 0x267   : > { %v5936_v21 = vsel %vm435_vm0, 0, %v1845_v33  ;;  %v5939_v42 = vsel %vm435_vm0, %v1845_v33, 0 }
 0x268   : > { %v1932_v34 = vshrl.u32 %v5936_v21, 16  ;;  %v1934_v14 = vshll.u32 %v5936_v21, 16  ;;  %v1938_v8 = vshll.u32 %v5939_v42, 16  ;;  %v2003_v3 = vrot.slane %v5939_v42, 1 }
 0x269   : > { %v2081_v15 = vshrl.u32 %v5939_v42, 16  ;;  %v2002_v35 = vrot.slane %v5936_v21, 1 }
 0x26a   : > { %v2084_v61 = vrot.slane %v1938_v8, 2  ;;  %v1936_v1 = vrot.slane %v1934_v14, 1  ;;  %v2078_v51 = vrot.slane %v1932_v34, 1  ;;  %v2079_v9 = vrot.slane %v1934_v14, 2 }
 0x26b   : > { %v2083_v30 = vrot.slane %v2081_v15, 1  ;;  %v2004_v43 = vsel %vm574_vm1, %v2002_v35, %v2003_v3  ;;  %v1940_v41 = vrot.slane %v1938_v8, 1 }
 0x26c   : > { %2020 = vrot.lane.b32.xlu1 %v2004_v43, %s7209_s11  ;;  %v1937_v22 = vor.u32 %v1936_v1, %v1932_v34  ;;  %v2080_v33 = vor.u32 %v2079_v9, %v2078_v51 }
 0x26d   : > { %v2085_v52 = vor.u32 %v2084_v61, %v2083_v30 }
 0x26e   : > { %v1941_v36 = vsel %vm461_vm4, %v1937_v22, %v1940_v41 }
 0x26f   : > { %1964 = vrot.lane.b32.xlu0 %v1941_v36, %s7207_s21  ;;  %v2086_v28 = vsel %vm615_vm3, %v2080_v33, %v2085_v52 }
 0x273   : > { %2108 = vrot.lane.b32.xlu0 %v2086_v28, %s7205_s30 }
 0x274   : > { %v1847_v6 = vpop.permute.xlu1 %1846 }
 0x275   : > { %v5954_v15 = vsel %vm435_vm0, 0, %v1847_v6  ;;  %v5957_v14 = vsel %vm435_vm0, %v1847_v6, 0 }
 0x276   : > { %v1942_v34 = vshrl.u32 %v5954_v15, 16  ;;  %v1944_v8 = vshll.u32 %v5954_v15, 16  ;;  %v1948_v3 = vshll.u32 %v5957_v14, 16  ;;  %v2006_v35 = vrot.slane %v5957_v14, 1 }
 0x277   : > { %v2090_v61 = vshrl.u32 %v5957_v14, 16  ;;  %v2005_v52 = vrot.slane %v5954_v15, 1 }
 0x278   : > { %v2093_v28 = vrot.slane %v1948_v3, 2  ;;  %v1946_v1 = vrot.slane %v1944_v8, 1  ;;  %v2087_v51 = vrot.slane %v1942_v34, 1  ;;  %v2088_v6 = vrot.slane %v1944_v8, 2 }
 0x279   : > { %v2092_v30 = vrot.slane %v2090_v61, 1  ;;  %v2007_v43 = vsel %vm574_vm1, %v2005_v52, %v2006_v35  ;;  %v1950_v22 = vrot.slane %v1948_v3, 1  ;;  %v7227_v35 = vld [vmem:[#allocation5_spill] sm:$0xff]  ;;  %v7228_v52 = vld [vmem:[#allocation6_spill] sm:$0xff] }
 0x27a   : > { %2022 = vrot.lane.b32.xlu0 %v2007_v43, %s7209_s11  ;;  %v1947_v9 = vor.u32 %v1946_v1, %v1942_v34  ;;  %v2089_v36 = vor.u32 %v2088_v6, %v2087_v51  ;;  %v2125_v1 = vrot.slane %v5903_v18, 2  ;;  %v2124_v51 = vrot.slane %v5900_v47, 2  ;;  %v7230_v18 = vld [vmem:[#allocation8_spill] sm:$0xff] }
 0x27b   : > { %v2094_v33 = vor.u32 %v2093_v28, %v2092_v30 }
 0x27c   : > { %v1951_v41 = vsel %vm461_vm4, %v1947_v9, %v1950_v22  ;;  %v2126_v22 = vsel %vm704_vm2, %v2124_v51, %v2125_v1 }
 0x27d   : > { %1966 = vrot.lane.b32.xlu1 %v1951_v41, %s7207_s21  ;;  %v2095_v26 = vsel %vm615_vm3, %v2089_v36, %v2094_v33  ;;  %v2128_v33 = vrot.slane %v5921_v63, 2  ;;  %v7231_v63 = vld [vmem:[#allocation9_spill] sm:$0xff] }
 0x27e   : > { %2288 = vrot.lane.b32.xlu0 %v5669_v58, %s7209_s11 }
 0x281   : > { %2110 = vrot.lane.b32.xlu1 %v2095_v26, %s7205_s30 }
 0x282   : > { %2292 = vrot.lane.b32.xlu0 %v5677_v20, %s7209_s11 }
 0x285   : > { %2290 = vrot.lane.b32.xlu1 %v5672_v49, %s7209_s11  ;;  %v2116_v49 = vrot.slane %v5848_v48, 2 }
 0x286   : > { %2457 = vrot.lane.b32.xlu0 %v5667_v37, %s7209_s11  ;;  %v2115_v37 = vrot.slane %v5845_v44, 2 }
 0x288   : > { %v2117_v26 = vsel %vm704_vm2, %v2115_v37, %v2116_v49 }
 0x289   : > { %2294 = vrot.lane.b32.xlu1 %v5679_v19, %s7209_s11 }
 0x28a   : > { %2298 = vrot.lane.b32.xlu0 %v5687_v4, %s7209_s11 }
 0x28c   : > { %v2009_v19 = vpop.permute.xlu1 %2008 }
 0x28d   : > { %2296 = vrot.lane.b32.xlu1 %v5685_v0, %s7209_s11 }
 0x28e   : > { %2302 = vrot.lane.b32.xlu0 %v5701_v45, %s7209_s11 }
 0x28f   : > { %v1953_v58 = vpop.permute.xlu0 %1952 }
 0x290   : > { %v2137_v20 = vsel %vm1133_vm5, %v5830_v56, %v1953_v58  ;;  %v2118_v56 = vrot.slane %v5864_v40, 2  ;;  %v2127_v58 = vrot.slane %v5918_v24, 2 }
 0x291   : > { %2300 = vrot.lane.b32.xlu1 %v5699_v62, %s7209_s11  ;;  %v2153_v0 = vsel %vm804_vm7, %v2137_v20, %v2009_v19 }
 0x292   : > { %2306 = vrot.lane.b32.xlu0 %v5717_v17, %s7209_s11 }
 0x293   : > { %v2097_v4 = vpop.permute.xlu0 %2096 }
 0x294   : > { %v2169_v45 = vsel %vm762_vm9, %v2153_v0, %v2097_v4  ;;  %v7232_v4 = vld [vmem:[#allocation10_spill] sm:$0xff] }
 0x295   : > { %2304 = vrot.lane.b32.xlu1 %v5714_v50, %s7209_s11  ;;  %2393 = vmatmul.mubr.bf16.vlgmr.msra.gmra.mrb[32].mxu1 %v2169_v45  ;;  %v2119_v50 = vrot.slane %v5867_v29, 2  ;;  %v2121_v29 = vrot.slane %v5882_v38, 2 }
 0x296   : > { %2310 = vrot.lane.b32.xlu0 %v5731_v25, %s7209_s11  ;;  %4404 = vmatprep.mubr.msk.bf16.mxu1 %vm1133_vm5, %v2117_v26  ;;  %v2131_v26 = vrot.slane %v5939_v42, 2  ;;  %v2134_v42 = vrot.slane %v5957_v14, 2 }
 0x298   : > { %v2011_v25 = vpop.permute.xlu0 %2010 }
 0x299   : > { %2308 = vrot.lane.b32.xlu1 %v5729_v16, %s7209_s11 }
 0x29a   : > { %2314 = vrot.lane.b32.xlu0 %v5747_v11, %s7209_s11 }
 0x29b   : > { %v1955_v62 = vpop.permute.xlu1 %1954 }
 0x29c   : > { %v2139_v17 = vsel %vm1133_vm5, %v5845_v44, %v1955_v62  ;;  %v2120_v44 = vsel %vm704_vm2, %v2118_v56, %v2119_v50  ;;  %v2130_v62 = vrot.slane %v5936_v21, 2 }
 0x29d   : > { %2312 = vrot.lane.b32.xlu1 %v5744_v10, %s7209_s11  ;;  %v2155_v16 = vsel %vm804_vm7, %v2139_v17, %v2011_v25 }
 0x29e   : > { %2318 = vrot.lane.b32.xlu0 %v5761_v5, %s7209_s11  ;;  %v2122_v5 = vrot.slane %v5885_v32, 2 }
 0x29f   : > { %v2099_v48 = vpop.permute.xlu1 %2098 }
 0x2a0   : > { %v2172_v11 = vsel %vm762_vm9, %v2155_v16, %v2099_v48  ;;  %v2132_v48 = vsel %vm704_vm2, %v2130_v62, %v2131_v26  ;;  %v4583_v26 = vld [vmem:[%s7172_s6 + $0x30] sm:$0xff]  }
 0x2a1   : > { %2316 = vrot.lane.b32.xlu1 %v5759_v55, %s7209_s11  ;;  %2401 = vmatmul.mubr.bf16.gmra.mrb[36].mxu1 %v2172_v11  ;;  %v2133_v11 = vrot.slane %v5954_v15, 2 }
 0x2a2   : > { %4405 = vmatprep.mubr.msk.bf16.mxu1 %vm1133_vm5, %v2120_v44  ;;  %2589 = vrot.lane.b32.xlu0 %v5034_v12, %s7225_s20 }
 0x2a5   : > { %2573 = vrot.lane.b32.xlu1 %v5029_v7, %s7205_s30 }
 0x2a6   : > { %2557 = vrot.lane.b32.xlu0 %v7222_v39, %s7226_s25  ;;  %v2013_v34 = vpop.permute.xlu1 %2012 }
 0x2a9   : > { %v1957_v10 = vpop.permute.xlu0 %1956  ;;  %2711 = vrot.lane.b32.xlu1 %v7222_v39, %s7207_s21 }
 0x2aa   : > { %v2141_v55 = vsel %vm1133_vm5, %v5864_v40, %v1957_v10  ;;  %2575 = vrot.lane.b32.xlu0 %v5034_v12, %s7205_s30  ;;  %v2123_v40 = vsel %vm704_vm2, %v2121_v29, %v2122_v5  ;;  %v2135_v29 = vsel %vm704_vm2, %v2133_v11, %v2134_v42  ;;  %v4586_v42 = vld [vmem:[%s7172_s6 + $0x48] sm:$0xff]  }
 0x2ab   : > { %v2157_v3 = vsel %vm804_vm7, %v2141_v55, %v2013_v34 }
 0x2ad   : > { %v2101_v8 = vpop.permute.xlu0 %2100  ;;  %2605 = vrot.lane.b32.xlu1 %v7227_v35, %s7209_s11 }
 0x2ae   : > { %v2175_v61 = vsel %vm762_vm9, %v2157_v3, %v2101_v8  ;;  %2607 = vrot.lane.b32.xlu0 %v7228_v52, %s7209_s11 }
 0x2af   : > { %2409 = vmatmul.mubr.bf16.gmra.mrb[40].mxu1 %v2175_v61 }
 0x2b0   : > { %4406 = vmatprep.mubr.msk.bf16.mxu1 %vm1133_vm5, %v2123_v40 }
 0x2b1   : > { %2591 = vrot.lane.b32.xlu1 %v7227_v35, %s7225_s20 }
 0x2b2   : > { %2593 = vrot.lane.b32.xlu0 %v7228_v52, %s7225_s20 }
 0x2b4   : > { %v2015_v30 = vpop.permute.xlu0 %2014 }
 0x2b5   : > { %2559 = vrot.lane.b32.xlu1 %v5029_v7, %s7226_s25 }
 0x2b6   : > { %2561 = vrot.lane.b32.xlu0 %v5034_v12, %s7226_s25 }
 0x2b7   : > { %v1959_v32 = vpop.permute.xlu1 %1958 }
 0x2b8   : > { %v2143_v28 = vsel %vm1133_vm5, %v5882_v38, %v1959_v32  ;;  %v7229_v38 = vld [vmem:[#allocation7_spill] sm:$0xff] }
 0x2b9   : > { %2577 = vrot.lane.b32.xlu1 %v7227_v35, %s7205_s30  ;;  %v2159_v6 = vsel %vm804_vm7, %v2143_v28, %v2015_v30 }
 0x2ba   : > { %2579 = vrot.lane.b32.xlu0 %v7228_v52, %s7205_s30 }
 0x2bb   : > { %v2103_v43 = vpop.permute.xlu1 %2102 }
 0x2bc   : > { %v2178_v9 = vsel %vm762_vm9, %v2159_v6, %v2103_v43  ;;  %v4577_v6 = vld [vmem:[%s7172_s6] sm:$0xff]  }
 0x2bd   : > { %2417 = vmatmul.mubr.bf16.gmra.mrb[44].mxu1 %v2178_v9  ;;  %2609 = vrot.lane.b32.xlu1 %v7229_v38, %s7209_s11 }
 0x2be   : > { %4407 = vmatprep.mubr.msk.bf16.mxu1 %vm1133_vm5, %v2126_v22  ;;  %2611 = vrot.lane.b32.xlu0 %v7230_v18, %s7209_s11 }
 0x2bf   : > { %2960 = vmatpush1.bf16.msra.mxu0 %v4577_v6  ;;  %v4593_v6 = vld [vmem:[%s7173_s7 + $0x18] sm:$0xff]  }
 0x2c0   : > { %2961 = vmatprep.subr.bf16.mxu0 %v7222_v39 }
 0x2c1   : > { %2595 = vrot.lane.b32.xlu1 %v7229_v38, %s7225_s20 }
 0x2c2   : > { %2597 = vrot.lane.b32.xlu0 %v7230_v18, %s7225_s20  ;;  %v2017_v20 = vpop.permute.xlu1 %2016 }
 0x2c5   : > { %v1961_v41 = vpop.permute.xlu0 %1960  ;;  %2563 = vrot.lane.b32.xlu1 %v7227_v35, %s7226_s25 }
 0x2c6   : > { %v2145_v36 = vsel %vm1133_vm5, %v5900_v47, %v1961_v41  ;;  %2565 = vrot.lane.b32.xlu0 %v7228_v52, %s7226_s25  ;;  %v2129_v47 = vsel %vm704_vm2, %v2127_v58, %v2128_v33  ;;  %v4578_v41 = vld [vmem:[%s7172_s6 + $0x8] sm:$0xff]  }
 0x2c7   : > { %v2161_v37 = vsel %vm804_vm7, %v2145_v36, %v2017_v20  ;;  %2962 = vmatpush1.bf16.msra.mxu0 %v4578_v41  ;;  %v4579_v36 = vld [vmem:[%s7172_s6 + $0x10] sm:$0xff]   ;;  %v4580_v20 = vld [vmem:[%s7172_s6 + $0x18] sm:$0xff]   ;;  %v4594_v41 = vld [vmem:[%s7172_s6 + $0x68] sm:$0xff]  }
 0x2c8   : > { %2963 = vmatprep.subr.bf16.mxu0 %v7222_v39 }
 0x2c9   : > { %v2105_v49 = vpop.permute.xlu0 %2104  ;;  %2581 = vrot.lane.b32.xlu1 %v7229_v38, %s7205_s30 }
 0x2ca   : > { %v2181_v19 = vsel %vm762_vm9, %v2161_v37, %v2105_v49  ;;  %2583 = vrot.lane.b32.xlu0 %v7230_v18, %s7205_s30  ;;  %s7235_s30 = smov 96  }
 0x2cb   : > { %2425 = vmatmul.mubr.bf16.gmra.mrb[48].mxu1 %v2181_v19  ;;  %2964 = vmatpush1.bf16.msra.mxu0 %v4579_v36  ;;  %v4581_v19 = vld [vmem:[%s7172_s6 + $0x20] sm:$0xff]  }
 0x2cc   : > { %4408 = vmatprep.mubr.msk.bf16.mxu1 %vm1133_vm5, %v2129_v47  ;;  %2965 = vmatprep.subr.bf16.mxu0 %v7222_v39  ;;  %v4582_v47 = vld [vmem:[%s7172_s6 + $0x28] sm:$0xff]  }
 0x2cd   : > { %2613 = vrot.lane.b32.xlu1 %v7231_v63, %s7209_s11 }
 0x2ce   : > { %2615 = vrot.lane.b32.xlu0 %v7232_v4, %s7209_s11  ;;  %s365_s11 = sand.u32 1, %s4880_s14  }
 0x2cf   : > { %2966 = vmatpush1.bf16.msra.mxu0 %v4580_v20  ;;  %s4346_s21 = sshll.u32 %s365_s11, 5 }
 0x2d0   : > { %v2019_v17 = vpop.permute.xlu0 %2018  ;;  %2967 = vmatprep.subr.bf16.mxu0 %v7222_v39 }
 0x2d1   : > { %2599 = vrot.lane.b32.xlu1 %v7231_v63, %s7225_s20 }
 0x2d3   : > { %v1963_v0 = vpop.permute.xlu1 %1962  ;;  %2968 = vmatpush1.bf16.msra.mxu0 %v4581_v19 }
 0x2d4   : > { %v2147_v45 = vsel %vm1133_vm5, %v5918_v24, %v1963_v0  ;;  %2969 = vmatprep.subr.bf16.mxu0 %v7222_v39 }
 0x2d5   : > { %2567 = vrot.lane.b32.xlu1 %v7229_v38, %s7226_s25  ;;  %v2163_v56 = vsel %vm804_vm7, %v2147_v45, %v2019_v17 }
 0x2d7   : > { %v2107_v50 = vpop.permute.xlu1 %2106  ;;  %2970 = vmatpush1.bf16.msra.mxu0 %v4582_v47  ;;  %v4595_v47 = vld [vmem:[%s7173_s7 + $0x20] sm:$0xff]  }
 0x2d8   : > { %v2184_v25 = vsel %vm762_vm9, %v2163_v56, %v2107_v50  ;;  %2971 = vmatprep.subr.bf16.mxu0 %v7222_v39  ;;  %v4584_v50 = vld [vmem:[%s7172_s6 + $0x38] sm:$0xff]  }
 0x2d9   : > { %2433 = vmatmul.mubr.bf16.gmra.mrb[52].mxu1 %v2184_v25  ;;  %v4585_v25 = vld [vmem:[%s7172_s6 + $0x40] sm:$0xff]  }
 0x2da   : > { %4409 = vmatprep.mubr.msk.bf16.mxu1 %vm1133_vm5, %v2132_v48 }
 0x2db   : > { %2972 = vmatpush1.bf16.msra.mxu0 %v4583_v26  ;;  %v4596_v26 = vld [vmem:[%s7172_s6 + $0x70] sm:$0xff]  }
 0x2dc   : > { %2973 = vmatprep.subr.bf16.mxu0 %v7222_v39 }
 0x2de   : > { %v2021_v44 = vpop.permute.xlu1 %2020 }
 0x2df   : > { %2974 = vmatpush1.bf16.msra.mxu0 %v4584_v50 }
 0x2e0   : > { %2975 = vmatprep.subr.bf16.mxu0 %v7222_v39 }
 0x2e1   : > { %v1965_v16 = vpop.permute.xlu0 %1964 }
 0x2e2   : > { %v2149_v24 = vsel %vm1133_vm5, %v5936_v21, %v1965_v16 }
 0x2e3   : > { %v2165_v55 = vsel %vm804_vm7, %v2149_v24, %v2021_v44  ;;  %2976 = vmatpush1.bf16.msra.mxu0 %v4585_v25  ;;  %v4587_v44 = vld [vmem:[%s7173_s7] sm:$0xff]  }
 0x2e4   : > { %2977 = vmatprep.subr.bf16.mxu0 %v7222_v39  ;;  %3153 = vmatpush1.bf16.msra.mxu1 %v4587_v44 }
 0x2e5   : > { %v2109_v10 = vpop.permute.xlu0 %2108  ;;  %3154 = vmatprep.subr.bf16.mxu1 %v7222_v39 }
 0x2e6   : > { %v2187_v5 = vsel %vm762_vm9, %v2165_v55, %v2109_v10  ;;  %v4588_v10 = vld [vmem:[%s7172_s6 + $0x50] sm:$0xff]  }
 0x2e7   : > { %2441 = vmatmul.mubr.bf16.gmra.mrb[56].mxu1 %v2187_v5  ;;  %2978 = vmatpush1.bf16.msra.mxu0 %v4586_v42  ;;  %v4589_v5 = vld [vmem:[%s7173_s7 + $0x8] sm:$0xff]  }
 0x2e8   : > { %4410 = vmatprep.mubr.msk.bf16.mxu1 %vm1133_vm5, %v2135_v29  ;;  %2979 = vmatprep.subr.bf16.mxu0 %v7222_v39  ;;  %v4590_v29 = vld [vmem:[%s7172_s6 + $0x58] sm:$0xff]  }
 0x2e9   : > { %3155 = vmatpush1.bf16.msra.mxu1 %v4589_v5 }
 0x2ea   : > { %3156 = vmatprep.subr.bf16.mxu1 %v7222_v39 }
 0x2eb   : > { %2980 = vmatpush1.bf16.msra.mxu0 %v4588_v10  ;;  %v4597_v10 = vld [vmem:[%s7173_s7 + $0x28] sm:$0xff]  }
 0x2ec   : > { %v2023_v21 = vpop.permute.xlu0 %2022  ;;  %2981 = vmatprep.subr.bf16.mxu0 %v7222_v39 }
 0x2ef   : > { %v1967_v34 = vpop.permute.xlu1 %1966  ;;  %2982 = vmatpush1.bf16.msra.mxu0 %v4590_v29 }
 0x2f0   : > { %v2151_v8 = vsel %vm1133_vm5, %v5954_v15, %v1967_v34  ;;  %v6115_v40 = vpop.permute.xlu0 %2288  ;;  %2983 = vmatprep.subr.bf16.mxu0 %v7222_v39 }
 0x2f1   : > { %v2167_v14 = vsel %vm804_vm7, %v2151_v8, %v2023_v21  ;;  %v4591_v21 = vld [vmem:[%s7173_s7 + $0x10] sm:$0xff]  }
 0x2f2   : > { %3157 = vmatpush1.bf16.msra.mxu1 %v4591_v21 }
 0x2f3   : > { %v2111_v3 = vpop.permute.xlu1 %2110  ;;  %3158 = vmatprep.subr.bf16.mxu1 %v7222_v39 }
 0x2f4   : > { %v2190_v61 = vsel %vm762_vm9, %v2167_v14, %v2111_v3  ;;  %v6119_v28 = vpop.permute.xlu0 %2292  ;;  %v4592_v3 = vld [vmem:[%s7172_s6 + $0x60] sm:$0xff]  }
 0x2f5   : > { %2449 = vmatmul.mubr.bf16.gmra.mrb[60].mxu1 %v2190_v61  ;;  %2984 = vmatpush1.bf16.msra.mxu0 %v4592_v3 }
 0x2f6   : > { %2985 = vmatprep.subr.bf16.mxu0 %v7222_v39  ;;  %3159 = vmatpush1.bf16.msra.mxu1 %v4593_v6  ;;  %v4599_v6 = vld [vmem:[%s7173_s7 + $0x38] sm:$0xff]  }
 0x2f7   : > { %v6117_v32 = vpop.permute.xlu1 %2290  ;;  %3160 = vmatprep.subr.bf16.mxu1 %v7222_v39 }
 0x2f8   : > { %v6123_v51 = vpop.permute.xlu0 %2457 }
 0x2f9   : > { %2986 = vmatpush1.bf16.msra.mxu0 %v4594_v41 }
 0x2fa   : > { %2987 = vmatprep.subr.bf16.mxu0 %v7222_v39  ;;  %3161 = vmatpush1.bf16.msra.mxu1 %v4595_v47 }
 0x2fb   : > { %v6121_v1 = vpop.permute.xlu1 %2294  ;;  %3162 = vmatprep.subr.bf16.mxu1 %v7222_v39 }
 0x2fc   : > { %v6127_v15 = vpop.permute.xlu0 %2298 }
 0x2fd   : > { %2988 = vmatpush1.bf16.msra.mxu0 %v4596_v26  ;;  %v2492_v26 = vsub.f32 1.0, %v5693_v27 }
 0x2fe   : > { %3724 = vmatprep.subr.bf16.mxu0 %v7222_v39  ;;  %3163 = vmatpush1.bf16.msra.mxu1 %v4597_v10 }
 0x2ff   : > { %v6125_v30 = vpop.permute.xlu1 %2296  ;;  %3164 = vmatprep.subr.bf16.mxu1 %v7222_v39 }
 0x300   : > { %v6134_v9 = vpop.permute.xlu0 %2302 }
 0x303   : > { %v6129_v43 = vpop.permute.xlu1 %2300 }
 0x304   : > { %v6146_v33 = vpop.permute.xlu0 %2306 }
 0x307   : > { %v6137_v22 = vpop.permute.xlu1 %2304 }
 0x308   : > { %v6154_v49 = vpop.permute.xlu0 %2310 }
 0x30b   : > { %v6148_v58 = vpop.permute.xlu1 %2308 }
 0x30c   : > { %v6166_v0 = vpop.permute.xlu0 %2314 }
 0x30f   : > { %v6157_v37 = vpop.permute.xlu1 %2312 }
 0x310   : > { %v6174_v17 = vpop.permute.xlu0 %2318 }
 0x313   : > { %v6168_v45 = vpop.permute.xlu1 %2316 }
 0x314   : > { %v2590_v48 = vpop.permute.xlu0 %2589 }
 0x317   : > { %v2574_v62 = vpop.permute.xlu1 %2573 }
 0x318   : > { %v2666_v16 = vsel %vm787_vm6, %v2574_v62, %v2590_v48  ;;  %v2558_v55 = vpop.permute.xlu0 %2557 }
 0x319   : > { %v2620_v20 = vsel %vm745_vm10, 0, %v2558_v55 }
 0x31a   : > { %v2642_v44 = vsel %vm762_vm9, %v2620_v20, %v2574_v62  ;;  %v4598_v62 = vld [vmem:[%s7173_s7 + $0x30] sm:$0xff]  }
 0x31b   : > { %v6180_v56 = vpop.permute.xlu1 %2711  ;;  %3165 = vmatpush1.bf16.msra.mxu1 %v4598_v62 }
 0x31c   : > { %v6209_v8 = vpop.permute.xlu0 %2575  ;;  %3166 = vmatprep.subr.bf16.mxu1 %v7222_v39 }
 0x31f   : > { %v2606_v24 = vpop.permute.xlu1 %2605  ;;  %3167 = vmatpush1.bf16.msra.mxu1 %v4599_v6  ;;  %v4601_v6 = vld [vmem:[%s7173_s7 + $0x48] sm:$0xff]  }
 0x320   : > { %v2682_v11 = vsel %vm804_vm7, %v2666_v16, %v2606_v24  ;;  %v2608_v61 = vpop.permute.xlu0 %2607  ;;  %3168 = vmatprep.subr.bf16.mxu1 %v7222_v39 }
 0x321   : > { %4426 = vmatprep.mubr.msk.bf16.mxu0 %vm1311_vm8, %v2682_v11 }
 0x322   : > { %2992 = vmatmul.mubr.bf16.vlgmr.msra.gmra.mrb[32].mxu0 %v2642_v44  ;;  %v4600_v44 = vld [vmem:[%s7173_s7 + $0x40] sm:$0xff]  }
 0x323   : > { %v2592_v34 = vpop.permute.xlu1 %2591  ;;  %3169 = vmatpush1.bf16.msra.mxu1 %v4600_v44 }
 0x324   : > { %v2594_v16 = vpop.permute.xlu0 %2593  ;;  %v2668_v29 = vsel %vm787_vm6, %v6209_v8, %v2592_v34  ;;  %3170 = vmatprep.subr.bf16.mxu1 %v7222_v39 }
 0x327   : > { %v2560_v14 = vpop.permute.xlu1 %2559  ;;  %3171 = vmatpush1.bf16.msra.mxu1 %v4601_v6 }
 0x328   : > { %v2622_v20 = vsel %vm745_vm10, 0, %v2560_v14  ;;  %v2684_v14 = vsel %vm804_vm7, %v2668_v29, %v2608_v61  ;;  %4475 = vmatprep.subr.bf16.mxu1 %v7222_v39 }
 0x329   : > { %4427 = vmatprep.mubr.msk.bf16.mxu0 %vm1311_vm8, %v2684_v14 }
 0x32b   : > { %v6228_v19 = vpop.permute.xlu1 %2577 }
 0x32c   : > { %v2670_v21 = vsel %vm787_vm6, %v6228_v19, %v2594_v16 }
 0x32f   : > { %v2610_v55 = vpop.permute.xlu1 %2609 }
 0x333   : > { %v2596_v3 = vpop.permute.xlu1 %2595 }
 0x368   : > { %v2394_v36 = vpop.f32.mrb[32].mxu1 }
 0x369   : > { %v2395_v50 = vadd.f32 %v2394_v36, %v6115_v40  ;;  %v2396_v25 = vpop.f32.mrb[33].mxu1 }
 0x36a   : > { %v2397_v48 = vpop.f32.mrb[34].mxu1 }
 0x36b   : > { %v2460_v24 = vadd.f32 %v6123_v51, %v2395_v50  ;;  %v2398_v42 = vadd.f32 %v2397_v48, %v6117_v32  ;;  %v2399_v11 = vpop.f32.mrb[35].mxu1  ;;  %v2562_v32 = vpop.permute.xlu0 %2561  ;;  %v2493_v50 = vsub.f32 1.0, %v5695_v23 }
 0x36c   : > { %v2645_v11 = vsel %vm762_vm9, %v2622_v20, %v6209_v8 }
 0x36d   : > { %4676 = vtanh.f32 %v2460_v24  ;;  %v2461_v40 = vadd.f32 %v6123_v51, %v2398_v42  ;;  %3000 = vmatmul.mubr.bf16.gmra.mrb[36].mxu0 %v2645_v11 }
 0x36f   : > { %4678 = vtanh.f32 %v2461_v40  ;;  %v6263_v25 = vpop.permute.xlu0 %2579  ;;  %v4810_v40 = vld [vmem:[%s5020_s26] sm:$0xff] }
 0x370   : > { %v2508_v61 = vmul.f32 %v4810_v40, %v2492_v26  ;;  %v2494_v26 = vsub.f32 1.0, %v5707_v59 }
 0x374   : > { %v2402_v5 = vpop.f32.mrb[36].mxu1 }
 0x375   : > { %v2403_v41 = vadd.f32 %v2402_v5, %v6119_v28  ;;  %v2404_v36 = vpop.f32.mrb[37].mxu1  ;;  %v2686_v28 = vsel %vm804_vm7, %v2670_v21, %v2610_v55  ;;  %v4811_v55 = vld [vmem:[%s5020_s26 + $0x8] sm:$0xff]  ;;  %v2564_v5 = vpop.permute.xlu1 %2563 }
 0x376   : > { %v2405_v47 = vpop.f32.mrb[38].mxu1  ;;  %v2509_v62 = vmul.f32 %v4811_v55, %v2493_v50  ;;  %4428 = vmatprep.mubr.msk.bf16.mxu0 %vm1311_vm8, %v2686_v28  ;;  %v2612_v21 = vpop.permute.xlu0 %2611 }
 0x377   : > { %v4677_v34 = vpop.eup %4676  ;;  %v2462_v48 = vadd.f32 %v6123_v51, %v2403_v41  ;;  %v2406_v16 = vadd.f32 %v2405_v47, %v6121_v1  ;;  %v2407_v24 = vpop.f32.mrb[39].mxu1  ;;  %v2625_v41 = vsel %vm745_vm10, %v5029_v7, %v2562_v32  ;;  %v2495_v7 = vsub.f32 1.0, %v5710_v53 }
 0x378   : > { %v2524_v42 = vmul.f32 %v4677_v34, %v5693_v27  ;;  %v2648_v20 = vsel %vm762_vm9, %v2625_v41, %v6228_v19 }
 0x379   : > { %v4679_v10 = vpop.eup %4678  ;;  %4680 = vtanh.f32 %v2462_v48  ;;  %v2463_v1 = vadd.f32 %v6123_v51, %v2406_v16  ;;  %v2582_v36 = vpop.permute.xlu1 %2581  ;;  %3008 = vmatmul.mubr.bf16.gmra.mrb[40].mxu0 %v2648_v20  ;;  %v2672_v16 = vsel %vm787_vm6, %v6263_v25, %v2596_v3  ;;  %v4813_v3 = vld [vmem:[%s5020_s26 + $0x18] sm:$0xff] }
 0x37a   : > { %v2525_v27 = vmul.f32 %v4679_v10, %v5695_v23  ;;  %v6283_v8 = vadd.f32 %v2524_v42, %v2508_v61  ;;  %v2598_v32 = vpop.permute.xlu0 %2597  ;;  %v4812_v10 = vld [vmem:[%s5020_s26 + $0x10] sm:$0xff]  ;;  %v2511_v40 = vmul.f32 %v4813_v3, %v2495_v7 }
 0x37b   : > { %4682 = vtanh.f32 %v2463_v1  ;;  %v2674_v28 = vsel %vm787_vm6, %v2582_v36, %v2598_v32  ;;  %v2510_v1 = vmul.f32 %v4812_v10, %v2494_v26  ;;  %v2497_v26 = vsub.f32 1.0, %v5725_v54 }
 0x37c   : > { %v6285_v29 = vadd.f32 %v2525_v27, %v2509_v62 }
 0x37d   : > { %v2614_v55 = vpop.permute.xlu1 %2613 }
 0x37e   : > { %v6294_v23 = vpack.c.bf16 %v6285_v29, %v6283_v8  ;;  %v2690_v27 = vsel %vm804_vm7, %v2674_v28, %v2614_v55  ;;  %v2499_v55 = vsub.f32 1.0, %v5740_v46 }
 0x380   : > { %2728 = vrot.lane.b32.xlu0 %v6294_v23, %s7233_s18 }
 0x381   : > { %v2600_v41 = vpop.permute.xlu1 %2599 }
 0x382   : > { %v2410_v47 = vpop.f32.mrb[40].mxu1 }
 0x383   : > { %v4681_v50 = vpop.eup %4680  ;;  %v2411_v34 = vadd.f32 %v2410_v47, %v6125_v30  ;;  %v2412_v48 = vpop.f32.mrb[41].mxu1  ;;  %v2628_v30 = vsel %vm745_vm10, %v5034_v12, %v2564_v5 }
 0x384   : > { %2713 = vrot.lane.b32.xlu0 %v6294_v23, %s7234_s28  ;;  %v2413_v19 = vpop.f32.mrb[42].mxu1  ;;  %v2526_v24 = vmul.f32 %v4681_v50, %v5707_v59  ;;  %v2688_v59 = vsel %vm804_vm7, %v2672_v16, %v2612_v21  ;;  %v2566_v12 = vpop.permute.xlu0 %2565  ;;  %v2651_v5 = vsel %vm762_vm9, %v2628_v30, %v6263_v25  ;;  %v2496_v25 = vsub.f32 1.0, %v5722_v60 }
 0x385   : > { %v4683_v14 = vpop.eup %4682  ;;  %v2464_v42 = vadd.f32 %v6123_v51, %v2411_v34  ;;  %v2414_v11 = vadd.f32 %v2413_v19, %v6127_v15  ;;  %v2415_v44 = vpop.f32.mrb[43].mxu1  ;;  %4429 = vmatprep.mubr.msk.bf16.mxu0 %vm1311_vm8, %v2688_v59  ;;  %v2631_v21 = vsel %vm745_vm10, %v7227_v35, %v2566_v12 }
 0x386   : > { %v2527_v61 = vmul.f32 %v4683_v14, %v5710_v53  ;;  %v6321_v15 = vadd.f32 %v2526_v24, %v2510_v1  ;;  %3016 = vmatmul.mubr.bf16.gmra.mrb[44].mxu0 %v2651_v5  ;;  %v2654_v47 = vsel %vm762_vm9, %v2631_v21, %v2582_v36  ;;  %v2568_v16 = vpop.permute.xlu1 %2567 }
 0x387   : > { %4684 = vtanh.f32 %v2464_v42  ;;  %v2465_v62 = vadd.f32 %v6123_v51, %v2414_v11  ;;  %4430 = vmatprep.mubr.msk.bf16.mxu0 %vm1311_vm8, %v2690_v27  ;;  %v2634_v42 = vsel %vm745_vm10, %v7228_v52, %v2568_v16  ;;  %v4814_v11 = vld [vmem:[%s5020_s26 + $0x20] sm:$0xff] }
 0x388   : > { %v6323_v6 = vadd.f32 %v2527_v61, %v2511_v40  ;;  %v2584_v20 = vpop.permute.xlu0 %2583  ;;  %v2512_v44 = vmul.f32 %v4814_v11, %v2496_v25  ;;  %v2498_v61 = vsub.f32 1.0, %v5737_v57 }
 0x389   : > { %4686 = vtanh.f32 %v2465_v62  ;;  %v2676_v36 = vsel %vm787_vm6, %v2584_v20, %v2600_v41  ;;  %v2657_v52 = vsel %vm762_vm9, %v2634_v42, %v2584_v20 }
 0x38a   : > { %v6329_v53 = vpack.c.bf16 %v6323_v6, %v6321_v15 }
 0x38c   : > { %2744 = vrot.lane.b32.xlu1 %v6329_v53, %s7235_s30 }
 0x38e   : > { %3024 = vmatmul.mubr.bf16.gmra.mrb[48].mxu0 %v2654_v47 }
 0x390   : > { %v2418_v7 = vpop.f32.mrb[44].mxu1  ;;  %2730 = vrot.lane.b32.xlu1 %v6329_v53, %s7233_s18 }
 0x391   : > { %v4685_v32 = vpop.eup %4684  ;;  %v2419_v35 = vadd.f32 %v2418_v7, %v6129_v43  ;;  %v2420_v50 = vpop.f32.mrb[45].mxu1  ;;  %v4815_v43 = vld [vmem:[%s5020_s26 + $0x28] sm:$0xff] }
 0x392   : > { %v2528_v34 = vmul.f32 %v4685_v32, %v5722_v60  ;;  %v2421_v48 = vpop.f32.mrb[46].mxu1  ;;  %v2513_v30 = vmul.f32 %v4815_v43, %v2497_v26  ;;  %v2616_v60 = vpop.permute.xlu0 %2615  ;;  %v4816_v26 = vld [vmem:[%s5020_s26 + $0x30] sm:$0xff]  ;;  %v4817_v32 = vld [vmem:[%s5020_s26 + $0x38] sm:$0xff] }
 0x393   : > { %v4687_v19 = vpop.eup %4686  ;;  %v2466_v24 = vadd.f32 %v6123_v51, %v2419_v35  ;;  %v2422_v28 = vadd.f32 %v2421_v48, %v6134_v9  ;;  %v2423_v14 = vpop.f32.mrb[47].mxu1  ;;  %v2692_v3 = vsel %vm804_vm7, %v2676_v36, %v2616_v60  ;;  %v2514_v7 = vmul.f32 %v4816_v26, %v2498_v61  ;;  %v4819_v60 = vld [vmem:[%s5020_s26 + $0x48] sm:$0xff]  ;;  %v7236_v61 = vld [vmem:[#allocation11_spill] sm:$0xff] }
 0x394   : > { %v2529_v10 = vmul.f32 %v4687_v19, %v5725_v54  ;;  %2585 = vrot.lane.b32.xlu1 %v7231_v63, %s7235_s30  ;;  %v6355_v9 = vadd.f32 %v2528_v34, %v2512_v44  ;;  %4431 = vmatprep.mubr.msk.bf16.mxu0 %vm1311_vm8, %v2692_v3  ;;  %v2515_v35 = vmul.f32 %v4817_v32, %v2499_v55  ;;  %v2501_v48 = vsub.f32 1.0, %v5755_v13  ;;  %v4820_v26 = vld [vmem:[%s5020_s26 + $0x50] sm:$0xff]  ;;  %v4821_v32 = vld [vmem:[%s5020_s26 + $0x58] sm:$0xff] }
 0x395   : > { %4688 = vtanh.f32 %v2466_v24  ;;  %v2467_v1 = vadd.f32 %v6123_v51, %v2422_v28  ;;  %v2503_v55 = vsub.f32 1.0, %v7236_v61 }
 0x396   : > { %v6357_v40 = vadd.f32 %v2529_v10, %v2513_v30  ;;  %3032 = vmatmul.mubr.bf16.gmra.mrb[52].mxu0 %v2657_v52  ;;  %v4818_v30 = vld [vmem:[%s5020_s26 + $0x40] sm:$0xff] }
 0x397   : > { %4690 = vtanh.f32 %v2467_v1  ;;  %v2517_v1 = vmul.f32 %v4819_v60, %v2501_v48  ;;  %v7237_v48 = vld [vmem:[#allocation12_spill] sm:$0xff]  ;;  %v4822_v60 = vld [vmem:[%s5020_s26 + $0x60] sm:$0xff] }
 0x398   : > { %2715 = vrot.lane.b32.xlu1 %v6329_v53, %s7234_s28  ;;  %v6365_v54 = vpack.c.bf16 %v6357_v40, %v6355_v9 }
 0x39a   : > { %2746 = vrot.lane.b32.xlu0 %v6365_v54, %s7235_s30  ;;  %4444 = vmatprep.mubr.msk.bf16.mxu1 %vm1133_vm5, %v6365_v54 }
 0x39e   : > { %v2426_v59 = vpop.f32.mrb[48].mxu1  ;;  %2601 = vrot.lane.b32.xlu0 %v7232_v4, %s7225_s20 }
 0x39f   : > { %v4689_v62 = vpop.eup %4688  ;;  %v2427_v27 = vadd.f32 %v2426_v59, %v6137_v22  ;;  %v2428_v12 = vpop.f32.mrb[49].mxu1 }
 0x3a0   : > { %v2530_v5 = vmul.f32 %v4689_v62, %v5737_v57  ;;  %v2429_v21 = vpop.f32.mrb[50].mxu1 }
 0x3a1   : > { %v4691_v41 = vpop.eup %4690  ;;  %v2468_v20 = vadd.f32 %v6123_v51, %v2427_v27  ;;  %v2430_v47 = vadd.f32 %v2429_v21, %v6146_v33  ;;  %v2431_v25 = vpop.f32.mrb[51].mxu1 }
 0x3a2   : > { %v2531_v50 = vmul.f32 %v4691_v41, %v5740_v46  ;;  %2732 = vrot.lane.b32.xlu0 %v6365_v54, %s7233_s18  ;;  %v6385_v57 = vadd.f32 %v2530_v5, %v2514_v7  ;;  %v2500_v46 = vsub.f32 1.0, %v5752_v31 }
 0x3a3   : > { %4692 = vtanh.f32 %v2468_v20  ;;  %v2469_v22 = vadd.f32 %v6123_v51, %v2430_v47 }
 0x3a4   : > { %v6387_v34 = vadd.f32 %v2531_v50, %v2515_v35  ;;  %v2516_v10 = vmul.f32 %v4818_v30, %v2500_v46  ;;  %v2519_v35 = vmul.f32 %v4821_v32, %v2503_v55 }
 0x3a5   : > { %4694 = vtanh.f32 %v2469_v22 }
 0x3a6   : > { %2717 = vrot.lane.b32.xlu0 %v6365_v54, %s7234_s28  ;;  %v6393_v33 = vpack.c.bf16 %v6387_v34, %v6385_v57 }
 0x3a8   : > { %2748 = vrot.lane.b32.xlu1 %v6393_v33, %s7235_s30 }
 0x3ac   : > { %v2434_v36 = vpop.f32.mrb[52].mxu1  ;;  %2734 = vrot.lane.b32.xlu1 %v6393_v33, %s7233_s18 }
 0x3ad   : > { %v4693_v16 = vpop.eup %4692  ;;  %v2435_v19 = vadd.f32 %v2434_v36, %v6148_v58  ;;  %v2436_v24 = vpop.f32.mrb[53].mxu1  ;;  %v2504_v36 = vsub.f32 1.0, %v7237_v48 }
 0x3ae   : > { %v2532_v28 = vmul.f32 %v4693_v16, %v5752_v31  ;;  %v2437_v14 = vpop.f32.mrb[54].mxu1  ;;  %v7238_v16 = vld [vmem:[#allocation13_spill] sm:$0xff] }
 0x3af   : > { %v4695_v42 = vpop.eup %4694  ;;  %v2470_v11 = vadd.f32 %v6123_v51, %v2435_v19  ;;  %v2438_v44 = vadd.f32 %v2437_v14, %v6154_v49  ;;  %v2439_v43 = vpop.f32.mrb[55].mxu1  ;;  %v2505_v19 = vsub.f32 1.0, %v7238_v16 }
 0x3b0   : > { %v2533_v3 = vmul.f32 %v4695_v42, %v5755_v13  ;;  %2719 = vrot.lane.b32.xlu1 %v6393_v33, %s7234_s28  ;;  %v6411_v31 = vadd.f32 %v2532_v28, %v2516_v10  ;;  %v2502_v13 = vsub.f32 1.0, %v5767_v2 }
 0x3b1   : > { %4696 = vtanh.f32 %v2470_v11  ;;  %v2471_v58 = vadd.f32 %v6123_v51, %v2438_v44 }
 0x3b2   : > { %v6413_v52 = vadd.f32 %v2533_v3, %v2517_v1  ;;  %v2518_v7 = vmul.f32 %v4820_v26, %v2502_v13  ;;  %v2520_v1 = vmul.f32 %v4822_v60, %v2504_v36  ;;  %v4823_v3 = vld [vmem:[%s5020_s26 + $0x68] sm:$0xff] }
 0x3b3   : > { %4698 = vtanh.f32 %v2471_v58  ;;  %v2521_v58 = vmul.f32 %v4823_v3, %v2505_v19 }
 0x3b4   : > { %v6417_v49 = vpack.c.bf16 %v6413_v52, %v6411_v31  ;;  %2617 = vrot.lane.b32.xlu1 %v7222_v39, %s7233_s18 }
 0x3b6   : > { %2750 = vrot.lane.b32.xlu0 %v6417_v49, %s7235_s30 }
 0x3ba   : > { %v2442_v59 = vpop.f32.mrb[56].mxu1  ;;  %2569 = vrot.lane.b32.xlu0 %v7230_v18, %s7226_s25 }
 0x3bb   : > { %v4697_v62 = vpop.eup %4696  ;;  %v2443_v27 = vadd.f32 %v2442_v59, %v6157_v37  ;;  %v2444_v12 = vpop.f32.mrb[57].mxu1 }
 0x3bc   : > { %v2534_v5 = vmul.f32 %v4697_v62, %v5767_v2  ;;  %v2445_v21 = vpop.f32.mrb[58].mxu1  ;;  %v7240_v62 = vld [vmem:[#allocation15_spill] sm:$0xff] }
 0x3bd   : > { %v4699_v41 = vpop.eup %4698  ;;  %v2472_v20 = vadd.f32 %v6123_v51, %v2443_v27  ;;  %v2446_v47 = vadd.f32 %v2445_v21, %v6166_v0  ;;  %v2447_v25 = vpop.f32.mrb[59].mxu1  ;;  %v2507_v27 = vsub.f32 1.0, %v7240_v62 }
 0x3be   : > { %v2535_v50 = vmul.f32 %v4699_v41, %v7236_v61  ;;  %2736 = vrot.lane.b32.xlu0 %v6417_v49, %s7233_s18  ;;  %v6437_v2 = vadd.f32 %v2534_v5, %v2518_v7  ;;  %v4824_v41 = vld [vmem:[%s5020_s26 + $0x70] sm:$0xff] }
 0x3bf   : > { %4700 = vtanh.f32 %v2472_v20  ;;  %v2473_v37 = vadd.f32 %v6123_v51, %v2446_v47  ;;  %v4825_v47 = vld [vmem:[%s5020_s26 + $0x78] sm:$0xff] }
 0x3c0   : > { %v6439_v22 = vadd.f32 %v2535_v50, %v2519_v35  ;;  %v2523_v25 = vmul.f32 %v4825_v47, %v2507_v27 }
 0x3c1   : > { %4702 = vtanh.f32 %v2473_v37 }
 0x3c2   : > { %2721 = vrot.lane.b32.xlu0 %v6417_v49, %s7234_s28  ;;  %v6445_v0 = vpack.c.bf16 %v6439_v22, %v6437_v2 }
 0x3c4   : > { %2752 = vrot.lane.b32.xlu1 %v6445_v0, %s7235_s30 }
 0x3c8   : > { %v2450_v46 = vpop.f32.mrb[60].mxu1  ;;  %2738 = vrot.lane.b32.xlu1 %v6445_v0, %s7233_s18 }
 0x3c9   : > { %v4701_v24 = vpop.eup %4700  ;;  %v2451_v28 = vadd.f32 %v2450_v46, %v6168_v45  ;;  %v2452_v14 = vpop.f32.mrb[61].mxu1 }
 0x3ca   : > { %v2453_v42 = vpop.f32.mrb[62].mxu1  ;;  %v2536_v11 = vmul.f32 %v4701_v24, %v7237_v48 }
 0x3cb   : > { %v4703_v44 = vpop.eup %4702  ;;  %v2474_v43 = vadd.f32 %v6123_v51, %v2451_v28  ;;  %v2454_v30 = vadd.f32 %v2453_v42, %v6174_v17  ;;  %v2455_v10 = vpop.f32.mrb[63].mxu1 }
 0x3cc   : > { %2723 = vrot.lane.b32.xlu1 %v6445_v0, %s7234_s28  ;;  %v2537_v13 = vmul.f32 %v4703_v44, %v7238_v16  ;;  %v6463_v61 = vadd.f32 %v2536_v11, %v2520_v1 }
 0x3cd   : > { %4704 = vtanh.f32 %v2474_v43  ;;  %v2475_v45 = vadd.f32 %v6123_v51, %v2454_v30  ;;  %v7239_v51 = vld [vmem:[#allocation14_spill] sm:$0xff] }
 0x3ce   : > { %v6465_v55 = vadd.f32 %v2537_v13, %v2521_v58  ;;  %v2506_v59 = vsub.f32 1.0, %v7239_v51 }
 0x3cf   : > { %4706 = vtanh.f32 %v2475_v45 }
 0x3d0   : > { %v6469_v17 = vpack.c.bf16 %v6465_v55, %v6463_v61  ;;  %2603 = vrot.lane.b32.xlu1 %v7222_v39, %s7225_s20  ;;  %v2522_v20 = vmul.f32 %v4824_v41, %v2506_v59 }
 0x3d2   : > { %2754 = vrot.lane.b32.xlu0 %v6469_v17, %s7235_s30 }
 0x3d6   : > { %2587 = vrot.lane.b32.xlu0 %v7232_v4, %s7235_s30 }
 0x3d7   : > { %v4705_v12 = vpop.eup %4704 }
 0x3d8   : > { %v2538_v5 = vmul.f32 %v4705_v12, %v7239_v51 }
 0x3d9   : > { %v4707_v21 = vpop.eup %4706 }
 0x3da   : > { %2740 = vrot.lane.b32.xlu0 %v6469_v17, %s7233_s18  ;;  %v2539_v26 = vmul.f32 %v4707_v21, %v7240_v62  ;;  %v6485_v7 = vadd.f32 %v2538_v5, %v2522_v20 }
 0x3dc   : > { %v6487_v4 = vadd.f32 %v2539_v26, %v2523_v25 }
 0x3de   : > { %2725 = vrot.lane.b32.xlu0 %v6469_v17, %s7234_s28  ;;  %v6493_v32 = vpack.c.bf16 %v6487_v4, %v6485_v7 }
 0x3e0   : > { %2756 = vrot.lane.b32.xlu1 %v6493_v32, %s7235_s30 }
 0x3e2   : > { %2742 = vrot.lane.b32.xlu0 %v6493_v32, %s7233_s18 }
 0x3e4   : > { %2571 = vrot.lane.b32.xlu1 %v7231_v63, %s7226_s25  ;;  %v6525_v63 = vsel %vm1133_vm5, 0, %v6180_v56 }
 0x3e6   : > { %3367 = vrot.lane.b32.xlu0 %v6283_v8, %s7234_s28 }
 0x3e8   : > { %2758 = vrot.lane.b32.xlu1 %v7222_v39, %s7235_s30 }
 0x3ea   : > { %3371 = vrot.lane.b32.xlu0 %v6321_v15, %s7234_s28 }
 0x3ec   : > { %3369 = vrot.lane.b32.xlu1 %v6285_v29, %s7234_s28 }
 0x3ee   : > { %3375 = vrot.lane.b32.xlu0 %v6355_v9, %s7234_s28 }
 0x3f0   : > { %3373 = vrot.lane.b32.xlu1 %v6323_v6, %s7234_s28 }
 0x3f2   : > { %3379 = vrot.lane.b32.xlu0 %v6385_v57, %s7234_s28  ;;  %v2729_v35 = vpop.permute.xlu0 %2728 }
 0x3f3   : > { %v2783_v50 = vsel %vm804_vm7, %v6525_v63, %v2729_v35 }
 0x3f4   : > { %3377 = vrot.lane.b32.xlu1 %v6357_v40, %s7234_s28 }
 0x3f5   : > { %v6573_v26 = vpop.f32.mrb[32].mxu0 }
 0x3f6   : > { %3383 = vrot.lane.b32.xlu0 %v6411_v31, %s7234_s28  ;;  %v2714_v56 = vpop.permute.xlu0 %2713  ;;  %v2995_v35 = vpop.f32.mrb[33].mxu0 }
 0x3f7   : > { %v2763_v36 = vsel %vm1133_vm5, 0, %v2714_v56  ;;  %v6624_v35 = vld [vmem:[%s7175_s9] ss:$0 sm:$0xff] }
 0x3f8   : > { %3381 = vrot.lane.b32.xlu1 %v6387_v34, %s7234_s28 }
 0x3fa   : > { %3387 = vrot.lane.b32.xlu0 %v6437_v2, %s7234_s28 }
 0x3fc   : > { %3385 = vrot.lane.b32.xlu1 %v6413_v52, %s7234_s28 }
 0x3fe   : > { %v2745_v37 = vpop.permute.xlu1 %2744  ;;  %3391 = vrot.lane.b32.xlu0 %v6463_v61, %s7234_s28 }
 0x3ff   : > { %v2799_v46 = vsel %vm762_vm9, %v2783_v50, %v2745_v37  ;;  %v6577_v37 = vpop.f32.mrb[34].mxu0 }
 0x400   : > { %3389 = vrot.lane.b32.xlu1 %v6439_v22, %s7234_s28  ;;  %3185 = vmatmul.mubr.bf16.vlgmr.msra.gmra.mrb[64].mxu1 %v2799_v46  ;;  %v2998_v56 = vpop.f32.mrb[35].mxu0 }
 0x401   : > { %4445 = vmatprep.mubr.msk.bf16.mxu1 %vm1133_vm5, %v6393_v33 }
 0x402   : > { %3395 = vrot.lane.b32.xlu0 %v6485_v7, %s7234_s28  ;;  %v2731_v48 = vpop.permute.xlu1 %2730 }
 0x403   : > { %v2785_v16 = vsel %vm804_vm7, %v2763_v36, %v2731_v48 }
 0x404   : > { %3393 = vrot.lane.b32.xlu1 %v6465_v55, %s7234_s28 }
 0x406   : > { %v2586_v28 = vpop.permute.xlu1 %2585 }
 0x408   : > { %3397 = vrot.lane.b32.xlu1 %v6487_v4, %s7234_s28 }
 0x40a   : > { %v2716_v42 = vpop.permute.xlu1 %2715 }
 0x40b   : > { %v2766_v44 = vsel %vm1133_vm5, %v6294_v23, %v2716_v42 }
 0x40c   : > { %v2747_v19 = vpop.permute.xlu0 %2746 }
 0x40d   : > { %v2802_v24 = vsel %vm762_vm9, %v2785_v16, %v2747_v19 }
 0x40e   : > { %3193 = vmatmul.mubr.bf16.gmra.mrb[68].mxu1 %v2802_v24 }
 0x40f   : > { %4446 = vmatprep.mubr.msk.bf16.mxu1 %vm1133_vm5, %v6417_v49 }
 0x410   : > { %v2602_v14 = vpop.permute.xlu0 %2601 }
 0x411   : > { %v2678_v3 = vsel %vm787_vm6, %v2586_v28, %v2602_v14 }
 0x414   : > { %v2733_v11 = vpop.permute.xlu0 %2732 }
 0x415   : > { %v2787_v43 = vsel %vm804_vm7, %v2766_v44, %v2733_v11 }
 0x418   : > { %v2718_v58 = vpop.permute.xlu0 %2717 }
 0x419   : > { %v2769_v45 = vsel %vm1133_vm5, %v6329_v53, %v2718_v58 }
 0x41a   : > { %v2749_v30 = vpop.permute.xlu1 %2748 }
 0x41b   : > { %v2805_v10 = vsel %vm762_vm9, %v2787_v43, %v2749_v30 }
 0x41c   : > { %3201 = vmatmul.mubr.bf16.gmra.mrb[72].mxu1 %v2805_v10 }
 0x41d   : > { %4447 = vmatprep.mubr.msk.bf16.mxu1 %vm1133_vm5, %v6445_v0 }
 0x41e   : > { %v2735_v60 = vpop.permute.xlu1 %2734 }
 0x41f   : > { %v2789_v51 = vsel %vm804_vm7, %v2769_v45, %v2735_v60 }
 0x422   : > { %v2720_v1 = vpop.permute.xlu1 %2719 }
 0x423   : > { %v2772_v21 = vsel %vm1133_vm5, %v6365_v54, %v2720_v1 }
 0x426   : > { %v2618_v13 = vpop.permute.xlu1 %2617 }
 0x427   : > { %v2694_v23 = vsel %vm804_vm7, %v2678_v3, %v2618_v13 }
 0x428   : > { %v2751_v59 = vpop.permute.xlu0 %2750  ;;  %4432 = vmatprep.mubr.msk.bf16.mxu0 %vm1311_vm8, %v2694_v23 }
 0x429   : > { %v2808_v62 = vsel %vm762_vm9, %v2789_v51, %v2751_v59 }
 0x42a   : > { %3209 = vmatmul.mubr.bf16.gmra.mrb[76].mxu1 %v2808_v62 }
 0x42b   : > { %4448 = vmatprep.mubr.msk.bf16.mxu1 %vm1133_vm5, %v6469_v17 }
 0x42c   : > { %v2570_v27 = vpop.permute.xlu0 %2569 }
 0x42d   : > { %v2637_v12 = vsel %vm745_vm10, %v7229_v38, %v2570_v27 }
 0x42e   : > { %v2660_v5 = vsel %vm762_vm9, %v2637_v12, %v2586_v28 }
 0x42f   : > { %3040 = vmatmul.mubr.bf16.gmra.mrb[56].mxu0 %v2660_v5 }
 0x430   : > { %v2737_v53 = vpop.permute.xlu0 %2736 }
 0x431   : > { %v2791_v41 = vsel %vm804_vm7, %v2772_v21, %v2737_v53 }
 0x434   : > { %v2722_v25 = vpop.permute.xlu0 %2721 }
 0x435   : > { %v2775_v50 = vsel %vm1133_vm5, %v6393_v33, %v2722_v25 }
 0x436   : > { %v2753_v20 = vpop.permute.xlu1 %2752 }
 0x437   : > { %v2811_v47 = vsel %vm762_vm9, %v2791_v41, %v2753_v20 }
 0x438   : > { %3217 = vmatmul.mubr.bf16.gmra.mrb[80].mxu1 %v2811_v47 }
 0x439   : > { %4449 = vmatprep.mubr.msk.bf16.mxu1 %vm1133_vm5, %v6493_v32 }
 0x43a   : > { %v2739_v17 = vpop.permute.xlu1 %2738 }
 0x43b   : > { %v2793_v54 = vsel %vm804_vm7, %v2775_v50, %v2739_v17 }
 0x43e   : > { %v2724_v38 = vpop.permute.xlu1 %2723 }
 0x43f   : > { %v2778_v11 = vsel %vm1133_vm5, %v6417_v49, %v2724_v38 }
 0x440   : > { %v6585_v24 = vpop.f32.mrb[36].mxu0 }
 0x441   : > { %v3003_v28 = vpop.f32.mrb[37].mxu0 }
 0x442   : > { %v2604_v36 = vpop.permute.xlu1 %2603  ;;  %v6587_v14 = vpop.f32.mrb[38].mxu0 }
 0x443   : > { %v3006_v42 = vpop.f32.mrb[39].mxu0 }
 0x444   : > { %v2755_v46 = vpop.permute.xlu0 %2754 }
 0x445   : > { %v2814_v48 = vsel %vm762_vm9, %v2793_v54, %v2755_v46 }
 0x446   : > { %3225 = vmatmul.mubr.bf16.gmra.mrb[84].mxu1 %v2814_v48 }
 0x447   : > { %3232 = vmatprep.mubr.bf16.mxu1 %v7222_v39 }
 0x448   : > { %v2588_v32 = vpop.permute.xlu0 %2587 }
 0x449   : > { %v2680_v16 = vsel %vm787_vm6, %v2588_v32, %v2604_v36 }
 0x44a   : > { %v2695_v19 = vsel %vm804_vm7, %v2680_v16, %v2618_v13 }
 0x44b   : > { %4433 = vmatprep.mubr.msk.bf16.mxu0 %vm1311_vm8, %v2695_v19 }
 0x44c   : > { %v2741_v33 = vpop.permute.xlu0 %2740  ;;  %v6594_v60 = vpop.f32.mrb[40].mxu0 }
 0x44d   : > { %v2795_v43 = vsel %vm804_vm7, %v2778_v11, %v2741_v33  ;;  %v3011_v3 = vpop.f32.mrb[41].mxu0 }
 0x44e   : > { %v6598_v45 = vpop.f32.mrb[42].mxu0 }
 0x44f   : > { %v3014_v23 = vpop.f32.mrb[43].mxu0 }
 0x450   : > { %v2726_v44 = vpop.permute.xlu0 %2725 }
 0x451   : > { %v2781_v51 = vsel %vm1133_vm5, %v6445_v0, %v2726_v44 }
 0x452   : > { %v2757_v30 = vpop.permute.xlu1 %2756 }
 0x453   : > { %v2817_v10 = vsel %vm762_vm9, %v2795_v43, %v2757_v30 }
 0x454   : > { %3233 = vmatmul.mubr.bf16.gmra.mrb[88].mxu1 %v2817_v10  ;;  %v2743_v58 = vpop.permute.xlu0 %2742 }
 0x455   : > { %3240 = vmatprep.mubr.bf16.mxu1 %v7222_v39  ;;  %v2797_v59 = vsel %vm804_vm7, %v2781_v51, %v2743_v58 }
 0x456   : > { %v2572_v1 = vpop.permute.xlu1 %2571 }
 0x457   : > { %v2640_v13 = vsel %vm745_vm10, %v7230_v18, %v2572_v1 }
 0x458   : > { %v2663_v49 = vsel %vm762_vm9, %v2640_v13, %v2588_v32 }
 0x459   : > { %3048 = vmatmul.mubr.bf16.gmra.mrb[60].mxu0 %v2663_v49  ;;  %v6608_v12 = vpop.f32.mrb[44].mxu0 }
 0x45a   : > { %v6604_v62 = vpop.permute.xlu1 %2758  ;;  %v3019_v18 = vpop.f32.mrb[45].mxu0 }
 0x45b   : > { %v2820_v27 = vsel %vm762_vm9, %v2797_v59, %v6604_v62  ;;  %v6611_v5 = vpop.f32.mrb[46].mxu0 }
 0x45c   : > { %3241 = vmatmul.mubr.bf16.gmra.mrb[92].mxu1 %v2820_v27  ;;  %v3022_v53 = vpop.f32.mrb[47].mxu0 }
 0x45d   : > { %3812 = vmatprep.mubr.bf16.mxu1 %v7222_v39 }
 0x461   : > { %v6613_v21 = vpop.f32.mrb[48].mxu0 }
 0x462   : > { %v3027_v0 = vpop.f32.mrb[49].mxu0 }
 0x463   : > { %v6615_v41 = vpop.f32.mrb[50].mxu0 }
 0x464   : > { %v3030_v20 = vpop.f32.mrb[51].mxu0 }
 0x469   : > { %v6617_v47 = vpop.f32.mrb[52].mxu0 }
 0x46a   : > { %v3035_v17 = vpop.f32.mrb[53].mxu0 }
 0x46b   : > { %v6619_v25 = vpop.f32.mrb[54].mxu0 }
 0x46c   : > { %v3038_v38 = vpop.f32.mrb[55].mxu0 }
 0x4d3   : > { %v3186_v50 = vpop.f32.mrb[64].mxu1 }
 0x4d4   : > { %v3187_v54 = vadd.f32 %v3186_v50, %v6573_v26  ;;  %v3188_v46 = vpop.f32.mrb[65].mxu1 }
 0x4d5   : > { %v3189_v56 = vpop.f32.mrb[66].mxu1 }
 0x4d6   : > { %v3255_v48 = vadd.f32 %v6624_v35, %v3187_v54  ;;  %v3190_v36 = vadd.f32 %v3189_v56, %v6577_v37  ;;  %v3191_v32 = vpop.f32.mrb[67].mxu1 }
 0x4d8   : > { %v3271_v16 = vsub.f32 0.0, %v3255_v48  ;;  %v3256_v19 = vadd.f32 %v6624_v35, %v3190_v36 }
 0x4da   : > { %v3287_v33 = vmul.f32 1.442695, %v3271_v16  ;;  %v3272_v28 = vsub.f32 0.0, %v3256_v19  ;;  %v3368_v19 = vpop.permute.xlu0 %3367 }
 0x4dc   : > { %4708 = vpow2.f32 %v3287_v33  ;;  %v3289_v42 = vmul.f32 1.442695, %v3272_v28  ;;  %v3370_v33 = vpop.permute.xlu1 %3369 }
 0x4de   : > { %4710 = vpow2.f32 %v3289_v42 }
 0x4e1   : > { %v3194_v11 = vpop.f32.mrb[68].mxu1 }
 0x4e2   : > { %v3195_v44 = vadd.f32 %v3194_v11, %v6585_v24  ;;  %v3196_v43 = vpop.f32.mrb[69].mxu1 }
 0x4e3   : > { %v3197_v30 = vpop.f32.mrb[70].mxu1 }
 0x4e4   : > { %v3257_v10 = vadd.f32 %v6624_v35, %v3195_v44  ;;  %v3198_v1 = vadd.f32 %v3197_v30, %v6587_v14  ;;  %v3199_v3 = vpop.f32.mrb[71].mxu1 }
 0x4e6   : > { %v4709_v58 = vpop.eup %4708  ;;  %v3273_v13 = vsub.f32 0.0, %v3257_v10  ;;  %v3258_v49 = vadd.f32 %v6624_v35, %v3198_v1 }
 0x4e7   : > { %v3319_v23 = vadd.f32 1.0, %v4709_v58 }
 0x4e8   : > { %v4711_v51 = vpop.eup %4710  ;;  %v3291_v59 = vmul.f32 1.442695, %v3273_v13  ;;  %v3274_v27 = vsub.f32 0.0, %v3258_v49 }
 0x4e9   : > { %4712 = vrcp.f32 %v3319_v23  ;;  %v3320_v18 = vadd.f32 1.0, %v4711_v51 }
 0x4ea   : > { %4714 = vpow2.f32 %v3291_v59  ;;  %v3293_v53 = vmul.f32 1.442695, %v3274_v27 }
 0x4eb   : > { %4716 = vrcp.f32 %v3320_v18 }
 0x4ec   : > { %4718 = vpow2.f32 %v3293_v53 }
 0x4ef   : > { %v3202_v0 = vpop.f32.mrb[72].mxu1 }
 0x4f0   : > { %v3203_v20 = vadd.f32 %v3202_v0, %v6594_v60  ;;  %v3204_v17 = vpop.f32.mrb[73].mxu1  ;;  %v3372_v0 = vpop.permute.xlu0 %3371 }
 0x4f1   : > { %v3205_v38 = vpop.f32.mrb[74].mxu1 }
 0x4f2   : > { %v3259_v50 = vadd.f32 %v6624_v35, %v3203_v20  ;;  %v3206_v54 = vadd.f32 %v3205_v38, %v6598_v45  ;;  %v3207_v46 = vpop.f32.mrb[75].mxu1 }
 0x4f3   : > { %v6637_v56 = vpop.eup %4712 }
 0x4f4   : > { %v4715_v48 = vpop.eup %4714  ;;  %v3275_v36 = vsub.f32 0.0, %v3259_v50  ;;  %v3260_v32 = vadd.f32 %v6624_v35, %v3206_v54  ;;  %v3415_v43 = vmul.f32 %v6637_v56, %v3368_v19  ;;  %v3374_v54 = vpop.permute.xlu1 %3373 }
 0x4f5   : > { %v6640_v16 = vpop.eup %4716  ;;  %v3321_v28 = vadd.f32 1.0, %v4715_v48 }
 0x4f6   : > { %v4719_v42 = vpop.eup %4718  ;;  %v3295_v11 = vmul.f32 1.442695, %v3275_v36  ;;  %v3276_v44 = vsub.f32 0.0, %v3260_v32  ;;  %v3416_v30 = vmul.f32 %v6640_v16, %v3370_v33 }
 0x4f7   : > { %4720 = vrcp.f32 %v3321_v28  ;;  %v3322_v10 = vadd.f32 1.0, %v4719_v42 }
 0x4f8   : > { %4722 = vpow2.f32 %v3295_v11  ;;  %v3297_v1 = vmul.f32 1.442695, %v3276_v44  ;;  %v3431_v3 = vpack.c.bf16 %v3416_v30, %v3415_v43 }
 0x4f9   : > { %4724 = vrcp.f32 %v3322_v10 }
 0x4fa   : > { %4726 = vpow2.f32 %v3297_v1  ;;  %3447 = vrot.lane.b32.xlu0 %v3431_v3, %s7235_s30 }
 0x4fd   : > { %v3210_v58 = vpop.f32.mrb[76].mxu1 }
 0x4fe   : > { %v3211_v13 = vadd.f32 %v3210_v58, %v6608_v12  ;;  %v3212_v49 = vpop.f32.mrb[77].mxu1 }
 0x4ff   : > { %v3213_v23 = vpop.f32.mrb[78].mxu1 }
 0x500   : > { %v3261_v51 = vadd.f32 %v6624_v35, %v3211_v13  ;;  %v3214_v59 = vadd.f32 %v3213_v23, %v6611_v5  ;;  %v3215_v27 = vpop.f32.mrb[79].mxu1 }
 0x501   : > { %v6648_v18 = vpop.eup %4720 }
 0x502   : > { %v4723_v53 = vpop.eup %4722  ;;  %v3277_v20 = vsub.f32 0.0, %v3261_v51  ;;  %v3262_v17 = vadd.f32 %v6624_v35, %v3214_v59  ;;  %v6651_v38 = vpop.f32.mrb[56].mxu0  ;;  %v3417_v28 = vmul.f32 %v6648_v18, %v3372_v0 }
 0x503   : > { %v6653_v50 = vpop.eup %4724  ;;  %v3323_v46 = vadd.f32 1.0, %v4723_v53  ;;  %v3043_v48 = vpop.f32.mrb[57].mxu0 }
 0x504   : > { %v4727_v36 = vpop.eup %4726  ;;  %v3299_v32 = vmul.f32 1.442695, %v3277_v20  ;;  %v3278_v19 = vsub.f32 0.0, %v3262_v17  ;;  %v6655_v33 = vpop.f32.mrb[58].mxu0  ;;  %v3418_v42 = vmul.f32 %v6653_v50, %v3374_v54 }
 0x505   : > { %4728 = vrcp.f32 %v3323_v46  ;;  %v3324_v11 = vadd.f32 1.0, %v4727_v36  ;;  %v3046_v44 = vpop.f32.mrb[59].mxu0  ;;  %v3376_v20 = vpop.permute.xlu0 %3375 }
 0x506   : > { %4730 = vpow2.f32 %v3299_v32  ;;  %v3301_v43 = vmul.f32 1.442695, %v3278_v19  ;;  %v3432_v30 = vpack.c.bf16 %v3418_v42, %v3417_v28  ;;  %v3378_v17 = vpop.permute.xlu1 %3377 }
 0x507   : > { %4732 = vrcp.f32 %v3324_v11 }
 0x508   : > { %4734 = vpow2.f32 %v3301_v43  ;;  %3449 = vrot.lane.b32.xlu1 %v3432_v30, %s7235_s30 }
 0x50b   : > { %v3218_v10 = vpop.f32.mrb[80].mxu1 }
 0x50c   : > { %v3219_v1 = vadd.f32 %v3218_v10, %v6613_v21  ;;  %v3220_v3 = vpop.f32.mrb[81].mxu1 }
 0x50d   : > { %v3221_v58 = vpop.f32.mrb[82].mxu1 }
 0x50e   : > { %v3263_v13 = vadd.f32 %v6624_v35, %v3219_v1  ;;  %v3222_v49 = vadd.f32 %v3221_v58, %v6615_v41  ;;  %v3223_v23 = vpop.f32.mrb[83].mxu1 }
 0x50f   : > { %v6663_v51 = vpop.eup %4728 }
 0x510   : > { %v4731_v59 = vpop.eup %4730  ;;  %v3279_v27 = vsub.f32 0.0, %v3263_v13  ;;  %v3264_v53 = vadd.f32 %v6624_v35, %v3222_v49  ;;  %v3419_v32 = vmul.f32 %v6663_v51, %v3376_v20  ;;  %v3382_v20 = vpop.permute.xlu1 %3381 }
 0x511   : > { %v6666_v0 = vpop.eup %4732  ;;  %v3325_v54 = vadd.f32 1.0, %v4731_v59 }
 0x512   : > { %v4735_v46 = vpop.eup %4734  ;;  %v3303_v48 = vmul.f32 1.442695, %v3279_v27  ;;  %v3280_v36 = vsub.f32 0.0, %v3264_v53  ;;  %v3420_v19 = vmul.f32 %v6666_v0, %v3378_v17  ;;  %v3380_v53 = vpop.permute.xlu0 %3379 }
 0x513   : > { %4736 = vrcp.f32 %v3325_v54  ;;  %v3326_v28 = vadd.f32 1.0, %v4735_v46 }
 0x514   : > { %4738 = vpow2.f32 %v3303_v48  ;;  %v3305_v42 = vmul.f32 1.442695, %v3280_v36  ;;  %v3433_v11 = vpack.c.bf16 %v3420_v19, %v3419_v32 }
 0x515   : > { %4740 = vrcp.f32 %v3326_v28 }
 0x516   : > { %4742 = vpow2.f32 %v3305_v42  ;;  %3451 = vrot.lane.b32.xlu0 %v3433_v11, %s7235_s30 }
 0x519   : > { %v3226_v44 = vpop.f32.mrb[84].mxu1 }
 0x51a   : > { %v3227_v43 = vadd.f32 %v3226_v44, %v6617_v47  ;;  %v3228_v30 = vpop.f32.mrb[85].mxu1 }
 0x51b   : > { %v3229_v10 = vpop.f32.mrb[86].mxu1 }
 0x51c   : > { %v3265_v1 = vadd.f32 %v6624_v35, %v3227_v43  ;;  %v3230_v3 = vadd.f32 %v3229_v10, %v6619_v25  ;;  %v3231_v58 = vpop.f32.mrb[87].mxu1 }
 0x51d   : > { %v6674_v13 = vpop.eup %4736 }
 0x51e   : > { %v4739_v49 = vpop.eup %4738  ;;  %v3281_v23 = vsub.f32 0.0, %v3265_v1  ;;  %v3266_v59 = vadd.f32 %v6624_v35, %v3230_v3  ;;  %v3421_v36 = vmul.f32 %v6674_v13, %v3380_v53 }
 0x51f   : > { %v6677_v27 = vpop.eup %4740  ;;  %v3327_v17 = vadd.f32 1.0, %v4739_v49 }
 0x520   : > { %v4743_v54 = vpop.eup %4742  ;;  %v3307_v46 = vmul.f32 1.442695, %v3281_v23  ;;  %v3282_v48 = vsub.f32 0.0, %v3266_v59  ;;  %v3422_v32 = vmul.f32 %v6677_v27, %v3382_v20  ;;  %v3384_v23 = vpop.permute.xlu0 %3383 }
 0x521   : > { %4744 = vrcp.f32 %v3327_v17  ;;  %v3328_v19 = vadd.f32 1.0, %v4743_v54  ;;  %v3386_v54 = vpop.permute.xlu1 %3385 }
 0x522   : > { %4746 = vpow2.f32 %v3307_v46  ;;  %v3309_v28 = vmul.f32 1.442695, %v3282_v48  ;;  %v3434_v42 = vpack.c.bf16 %v3422_v32, %v3421_v36 }
 0x523   : > { %4748 = vrcp.f32 %v3328_v19 }
 0x524   : > { %4750 = vpow2.f32 %v3309_v28  ;;  %3453 = vrot.lane.b32.xlu1 %v3434_v42, %s7235_s30 }
 0x527   : > { %v3234_v11 = vpop.f32.mrb[88].mxu1 }
 0x528   : > { %v3235_v44 = vadd.f32 %v3234_v11, %v6651_v38  ;;  %v3236_v43 = vpop.f32.mrb[89].mxu1 }
 0x529   : > { %v3237_v30 = vpop.f32.mrb[90].mxu1 }
 0x52a   : > { %v3267_v10 = vadd.f32 %v6624_v35, %v3235_v44  ;;  %v3238_v1 = vadd.f32 %v3237_v30, %v6655_v33  ;;  %v3239_v3 = vpop.f32.mrb[91].mxu1 }
 0x52b   : > { %v6685_v58 = vpop.eup %4744 }
 0x52c   : > { %v4747_v49 = vpop.eup %4746  ;;  %v3283_v59 = vsub.f32 0.0, %v3267_v10  ;;  %v3268_v53 = vadd.f32 %v6624_v35, %v3238_v1  ;;  %v6688_v20 = vpop.f32.mrb[60].mxu0  ;;  %v3423_v42 = vmul.f32 %v6685_v58, %v3384_v23 }
 0x52d   : > { %v6690_v17 = vpop.eup %4748  ;;  %v3329_v46 = vadd.f32 1.0, %v4747_v49  ;;  %v3051_v48 = vpop.f32.mrb[61].mxu0 }
 0x52e   : > { %v4751_v36 = vpop.eup %4750  ;;  %v3311_v32 = vmul.f32 1.442695, %v3283_v59  ;;  %v3284_v19 = vsub.f32 0.0, %v3268_v53  ;;  %v6692_v28 = vpop.f32.mrb[62].mxu0  ;;  %v3424_v11 = vmul.f32 %v6690_v17, %v3386_v54 }
 0x52f   : > { %4752 = vrcp.f32 %v3329_v46  ;;  %v3330_v44 = vadd.f32 1.0, %v4751_v36  ;;  %v3054_v43 = vpop.f32.mrb[63].mxu0  ;;  %v3242_v30 = vpop.f32.mrb[92].mxu1 }
 0x530   : > { %4754 = vpow2.f32 %v3311_v32  ;;  %v3313_v10 = vmul.f32 1.442695, %v3284_v19  ;;  %v3243_v1 = vadd.f32 %v3242_v30, %v6688_v20  ;;  %v3244_v3 = vpop.f32.mrb[93].mxu1  ;;  %v3435_v49 = vpack.c.bf16 %v3424_v11, %v3423_v42  ;;  %v3390_v30 = vpop.permute.xlu1 %3389 }
 0x531   : > { %4756 = vrcp.f32 %v3330_v44  ;;  %v3245_v48 = vpop.f32.mrb[94].mxu1  ;;  %v3388_v44 = vpop.permute.xlu0 %3387 }
 0x532   : > { %4758 = vpow2.f32 %v3313_v10  ;;  %v3269_v59 = vadd.f32 %v6624_v35, %v3243_v1  ;;  %v3246_v53 = vadd.f32 %v3245_v48, %v6692_v28  ;;  %v3247_v23 = vpop.f32.mrb[95].mxu1  ;;  %3455 = vrot.lane.b32.xlu0 %v3435_v49, %s7235_s30 }
 0x534   : > { %v3285_v54 = vsub.f32 0.0, %v3269_v59  ;;  %v3270_v46 = vadd.f32 %v6624_v35, %v3246_v53 }
 0x536   : > { %v3315_v36 = vmul.f32 1.442695, %v3285_v54  ;;  %v3286_v32 = vsub.f32 0.0, %v3270_v46 }
 0x538   : > { %4760 = vpow2.f32 %v3315_v36  ;;  %v3317_v19 = vmul.f32 1.442695, %v3286_v32  ;;  %v4602_v32 = vld [vmem:[%s7174_s8] sm:$0xff]  }
 0x539   : > { %v6701_v43 = vpop.eup %4752  ;;  %3725 = vmatpush1.bf16.msra.mxu0 %v4602_v32  ;;  %4485 = vmatpush1.bf16.msra.mxu1 %v4602_v32  ;;  %v4605_v32 = vld [vmem:[%s7174_s8 + $0x18] sm:$0xff]  }
 0x53a   : > { %v4755_v42 = vpop.eup %4754  ;;  %4762 = vpow2.f32 %v3317_v19  ;;  %v3425_v3 = vmul.f32 %v6701_v43, %v3388_v44  ;;  %v3394_v44 = vpop.permute.xlu1 %3393  ;;  %3726 = vmatprep.subr.bf16.mxu0 %v7222_v39  ;;  %4476 = vmatprep.subr.bf16.mxu1 %v7222_v39 }
 0x53b   : > { %v6703_v11 = vpop.eup %4756  ;;  %v3331_v10 = vadd.f32 1.0, %v4755_v42  ;;  %v3392_v42 = vpop.permute.xlu0 %3391 }
 0x53c   : > { %v4759_v1 = vpop.eup %4758  ;;  %v3426_v49 = vmul.f32 %v6703_v11, %v3390_v30 }
 0x53d   : > { %4764 = vrcp.f32 %v3331_v10  ;;  %v3332_v48 = vadd.f32 1.0, %v4759_v1  ;;  %v4603_v1 = vld [vmem:[%s7174_s8 + $0x8] sm:$0xff]  }
 0x53e   : > { %v3436_v59 = vpack.c.bf16 %v3426_v49, %v3425_v3  ;;  %3727 = vmatpush1.bf16.msra.mxu0 %v4603_v1  ;;  %v4604_v49 = vld [vmem:[%s7174_s8 + $0x10] sm:$0xff]   ;;  %4486 = vmatpush1.bf16.msra.mxu1 %v4603_v1  ;;  %v4609_v1 = vld [vmem:[%s7174_s8 + $0x38] sm:$0xff]  }
 0x53f   : > { %4766 = vrcp.f32 %v3332_v48  ;;  %3728 = vmatprep.subr.bf16.mxu0 %v7222_v39  ;;  %4477 = vmatprep.subr.bf16.mxu1 %v7222_v39 }
 0x540   : > { %3457 = vrot.lane.b32.xlu1 %v3436_v59, %s7235_s30 }
 0x542   : > { %v4761_v53 = vpop.eup %4760  ;;  %3729 = vmatpush1.bf16.msra.mxu0 %v4604_v49  ;;  %4487 = vmatpush1.bf16.msra.mxu1 %v4604_v49  ;;  %v4611_v49 = vld [vmem:[%s7174_s8 + $0x48] sm:$0xff]  }
 0x543   : > { %v3333_v23 = vadd.f32 1.0, %v4761_v53  ;;  %v3396_v53 = vpop.permute.xlu0 %3395  ;;  %3730 = vmatprep.subr.bf16.mxu0 %v7222_v39  ;;  %4478 = vmatprep.subr.bf16.mxu1 %v7222_v39 }
 0x544   : > { %v4763_v54 = vpop.eup %4762 }
 0x545   : > { %4768 = vrcp.f32 %v3333_v23  ;;  %v3334_v46 = vadd.f32 1.0, %v4763_v54  ;;  %v3398_v23 = vpop.permute.xlu1 %3397 }
 0x546   : > { %3731 = vmatpush1.bf16.msra.mxu0 %v4605_v32  ;;  %4488 = vmatpush1.bf16.msra.mxu1 %v4605_v32 }
 0x547   : > { %v6708_v36 = vpop.eup %4764  ;;  %4770 = vrcp.f32 %v3334_v46  ;;  %3732 = vmatprep.subr.bf16.mxu0 %v7222_v39  ;;  %4479 = vmatprep.subr.bf16.mxu1 %v7222_v39 }
 0x548   : > { %v3427_v30 = vmul.f32 %v6708_v36, %v3392_v42 }
 0x549   : > { %v6713_v19 = vpop.eup %4766 }
 0x54a   : > { %v3428_v10 = vmul.f32 %v6713_v19, %v3394_v44  ;;  %v4606_v44 = vld [vmem:[%s7174_s8 + $0x20] sm:$0xff]  }
 0x54b   : > { %3733 = vmatpush1.bf16.msra.mxu0 %v4606_v44  ;;  %4489 = vmatpush1.bf16.msra.mxu1 %v4606_v44 }
 0x54c   : > { %v3437_v3 = vpack.c.bf16 %v3428_v10, %v3427_v30  ;;  %v4607_v30 = vld [vmem:[%s7174_s8 + $0x28] sm:$0xff]   ;;  %3734 = vmatprep.subr.bf16.mxu0 %v7222_v39  ;;  %4480 = vmatprep.subr.bf16.mxu1 %v7222_v39  ;;  %v4608_v10 = vld [vmem:[%s7174_s8 + $0x30] sm:$0xff]  }
 0x54e   : > { %3459 = vrot.lane.b32.xlu0 %v3437_v3, %s7235_s30  ;;  %v4610_v3 = vld [vmem:[%s7174_s8 + $0x40] sm:$0xff]  }
 0x54f   : > { %v6726_v48 = vpop.eup %4768  ;;  %3735 = vmatpush1.bf16.msra.mxu0 %v4607_v30  ;;  %4490 = vmatpush1.bf16.msra.mxu1 %v4607_v30 }
 0x550   : > { %v3429_v54 = vmul.f32 %v6726_v48, %v3396_v53  ;;  %3736 = vmatprep.subr.bf16.mxu0 %v7222_v39  ;;  %4481 = vmatprep.subr.bf16.mxu1 %v7222_v39 }
 0x551   : > { %v6730_v59 = vpop.eup %4770 }
 0x552   : > { %v3430_v46 = vmul.f32 %v6730_v59, %v3398_v23 }
 0x553   : > { %3737 = vmatpush1.bf16.msra.mxu0 %v4608_v10  ;;  %4491 = vmatpush1.bf16.msra.mxu1 %v4608_v10 }
 0x554   : > { %v3438_v42 = vpack.c.bf16 %v3430_v46, %v3429_v54  ;;  %3738 = vmatprep.subr.bf16.mxu0 %v7222_v39  ;;  %4482 = vmatprep.subr.bf16.mxu1 %v7222_v39 }
 0x556   : > { %3461 = vrot.lane.b32.xlu1 %v3438_v42, %s7235_s30 }
 0x557   : > { %3739 = vmatpush1.bf16.msra.mxu0 %v4609_v1  ;;  %4492 = vmatpush1.bf16.msra.mxu1 %v4609_v1 }
 0x558   : > { %3740 = vmatprep.subr.bf16.mxu0 %v7222_v39  ;;  %4483 = vmatprep.subr.bf16.mxu1 %v7222_v39 }
 0x55b   : > { %3741 = vmatpush1.bf16.msra.mxu0 %v4610_v3  ;;  %4493 = vmatpush1.bf16.msra.mxu1 %v4610_v3 }
 0x55c   : > { %3742 = vmatprep.subr.bf16.mxu0 %v7222_v39  ;;  %4484 = vmatprep.subr.bf16.mxu1 %v7222_v39 }
 0x55f   : > { %3743 = vmatpush1.bf16.msra.mxu0 %v4611_v49  ;;  %4494 = vmatpush1.bf16.msra.mxu1 %v4611_v49 }
 0x56c   : > { %v6769_v53 = vpop.permute.xlu0 %3447 }
 0x56d   : > { %3477 = vrot.lane.b32.xlu0 %v6769_v53, %s7233_s18 }
 0x571   : > { %3463 = vrot.lane.b32.xlu0 %v6769_v53, %s7234_s28 }
 0x57a   : > { %v6776_v23 = vpop.permute.xlu1 %3449 }
 0x57b   : > { %3493 = vrot.lane.b32.xlu1 %v6776_v23, %s7235_s30 }
 0x57f   : > { %3479 = vrot.lane.b32.xlu1 %v6776_v23, %s7233_s18 }
 0x583   : > { %3465 = vrot.lane.b32.xlu1 %v6776_v23, %s7234_s28 }
 0x588   : > { %v6784_v54 = vpop.permute.xlu0 %3451 }
 0x589   : > { %4461 = vmatprep.mubr.msk.bf16.mxu0 %vm1133_vm5, %v6784_v54  ;;  %3495 = vrot.lane.b32.xlu0 %v6784_v54, %s7235_s30 }
 0x58d   : > { %3481 = vrot.lane.b32.xlu0 %v6784_v54, %s7233_s18 }
 0x591   : > { %3467 = vrot.lane.b32.xlu0 %v6784_v54, %s7234_s28 }
 0x596   : > { %v6794_v46 = vpop.permute.xlu1 %3453 }
 0x597   : > { %3497 = vrot.lane.b32.xlu1 %v6794_v46, %s7235_s30 }
 0x59b   : > { %3483 = vrot.lane.b32.xlu1 %v6794_v46, %s7233_s18 }
 0x59f   : > { %3469 = vrot.lane.b32.xlu1 %v6794_v46, %s7234_s28 }
 0x5a4   : > { %v6802_v32 = vpop.permute.xlu0 %3455 }
 0x5a5   : > { %3499 = vrot.lane.b32.xlu0 %v6802_v32, %s7235_s30 }
 0x5a9   : > { %3485 = vrot.lane.b32.xlu0 %v6802_v32, %s7233_s18 }
 0x5ad   : > { %3471 = vrot.lane.b32.xlu0 %v6802_v32, %s7234_s28 }
 0x5b2   : > { %v6810_v42 = vpop.permute.xlu1 %3457 }
 0x5b3   : > { %3501 = vrot.lane.b32.xlu1 %v6810_v42, %s7235_s30 }
 0x5b7   : > { %3487 = vrot.lane.b32.xlu1 %v6810_v42, %s7233_s18 }
 0x5bb   : > { %3473 = vrot.lane.b32.xlu1 %v6810_v42, %s7234_s28 }
 0x5c0   : > { %v3460_v44 = vpop.permute.xlu0 %3459 }
 0x5c1   : > { %3503 = vrot.lane.b32.xlu0 %v3460_v44, %s7235_s30  ;;  %3489 = vrot.lane.b32.xlu1 %v3460_v44, %s7233_s18 }
 0x5c5   : > { %3475 = vrot.lane.b32.xlu0 %v3460_v44, %s7234_s28 }
 0x5c8   : > { %v3462_v30 = vpop.permute.xlu1 %3461 }
 0x5c9   : > { %3505 = vrot.lane.b32.xlu1 %v3462_v30, %s7235_s30  ;;  %3491 = vrot.lane.b32.xlu0 %v3462_v30, %s7233_s18 }
 0x5cd   : > { %3664 = vrot.lane.b32.xlu1 %v6577_v37, %s7233_s18  ;;  %3662 = vrot.lane.b32.xlu0 %v6573_v26, %s7233_s18 }
 0x5d1   : > { %3668 = vrot.lane.b32.xlu1 %v6587_v14, %s7233_s18  ;;  %3666 = vrot.lane.b32.xlu0 %v6585_v24, %s7233_s18 }
 0x5d5   : > { %3672 = vrot.lane.b32.xlu1 %v6598_v45, %s7233_s18  ;;  %3670 = vrot.lane.b32.xlu0 %v6594_v60, %s7233_s18 }
 0x5d9   : > { %3676 = vrot.lane.b32.xlu1 %v6611_v5, %s7233_s18  ;;  %3674 = vrot.lane.b32.xlu0 %v6608_v12, %s7233_s18 }
 0x5dd   : > { %3680 = vrot.lane.b32.xlu1 %v6615_v41, %s7233_s18  ;;  %3678 = vrot.lane.b32.xlu0 %v6613_v21, %s7233_s18 }
 0x5df   : > { %v3478_v26 = vpop.permute.xlu0 %3477 }
 0x5e0   : > { %v3528_v37 = vsel %vm804_vm7, %v6525_v63, %v3478_v26 }
 0x5e1   : > { %3684 = vrot.lane.b32.xlu1 %v6619_v25, %s7233_s18  ;;  %3682 = vrot.lane.b32.xlu0 %v6617_v47, %s7233_s18 }
 0x5e3   : > { %v3464_v60 = vpop.permute.xlu0 %3463 }
 0x5e4   : > { %v3508_v12 = vsel %vm1133_vm5, 0, %v3464_v60 }
 0x5e5   : > { %3688 = vrot.lane.b32.xlu1 %v6655_v33, %s7233_s18  ;;  %3686 = vrot.lane.b32.xlu0 %v6651_v38, %s7233_s18 }
 0x5e9   : > { %3692 = vrot.lane.b32.xlu1 %v6692_v28, %s7233_s18  ;;  %3690 = vrot.lane.b32.xlu0 %v6688_v20, %s7233_s18 }
 0x5ed   : > { %v3494_v24 = vpop.permute.xlu1 %3493  ;;  %3821 = vrot.lane.b32.xlu0 %v6624_v35, %s7233_s18 }
 0x5ee   : > { %v3544_v14 = vsel %vm762_vm9, %v3528_v37, %v3494_v24 }
 0x5ef   : > { %3757 = vmatmul.mubr.bf16.vlgmr.msra.gmra.mrb[64].mxu0 %v3544_v14 }
 0x5f0   : > { %4462 = vmatprep.mubr.msk.bf16.mxu0 %vm1133_vm5, %v6794_v46 }
 0x5f1   : > { %v3480_v45 = vpop.permute.xlu1 %3479 }
 0x5f2   : > { %v3530_v5 = vsel %vm804_vm7, %v3508_v12, %v3480_v45 }
 0x5f5   : > { %v3466_v63 = vpop.permute.xlu1 %3465 }
 0x5f6   : > { %v3511_v25 = vsel %vm1133_vm5, %v6769_v53, %v3466_v63 }
 0x5fb   : > { %v3496_v21 = vpop.permute.xlu0 %3495 }
 0x5fc   : > { %v3547_v41 = vsel %vm762_vm9, %v3530_v5, %v3496_v21 }
 0x5fd   : > { %3765 = vmatmul.mubr.bf16.gmra.mrb[68].mxu0 %v3547_v41 }
 0x5fe   : > { %4463 = vmatprep.mubr.msk.bf16.mxu0 %vm1133_vm5, %v6802_v32 }
 0x5ff   : > { %v3482_v47 = vpop.permute.xlu0 %3481 }
 0x600   : > { %v3532_v35 = vsel %vm804_vm7, %v3511_v25, %v3482_v47 }
 0x603   : > { %v3468_v20 = vpop.permute.xlu0 %3467 }
 0x604   : > { %v3514_v10 = vsel %vm1133_vm5, %v6776_v23, %v3468_v20 }
 0x609   : > { %v3498_v38 = vpop.permute.xlu1 %3497 }
 0x60a   : > { %v3550_v33 = vsel %vm762_vm9, %v3532_v35, %v3498_v38 }
 0x60b   : > { %3773 = vmatmul.mubr.bf16.gmra.mrb[72].mxu0 %v3550_v33 }
 0x60c   : > { %4464 = vmatprep.mubr.msk.bf16.mxu0 %vm1133_vm5, %v6810_v42 }
 0x60d   : > { %v3484_v28 = vpop.permute.xlu1 %3483 }
 0x60e   : > { %v3534_v1 = vsel %vm804_vm7, %v3514_v10, %v3484_v28 }
 0x611   : > { %v3470_v53 = vpop.permute.xlu1 %3469 }
 0x612   : > { %v3517_v37 = vsel %vm1133_vm5, %v6784_v54, %v3470_v53 }
 0x617   : > { %v3500_v3 = vpop.permute.xlu0 %3499 }
 0x618   : > { %v3553_v49 = vsel %vm762_vm9, %v3534_v1, %v3500_v3 }
 0x619   : > { %3781 = vmatmul.mubr.bf16.gmra.mrb[76].mxu0 %v3553_v49 }
 0x61a   : > { %4465 = vmatprep.mubr.msk.bf16.mxu0 %vm1133_vm5, %v3460_v44 }
 0x61b   : > { %v3486_v26 = vpop.permute.xlu0 %3485 }
 0x61c   : > { %v3536_v24 = vsel %vm804_vm7, %v3517_v37, %v3486_v26 }
 0x61f   : > { %v3472_v45 = vpop.permute.xlu0 %3471 }
 0x620   : > { %v3520_v5 = vsel %vm1133_vm5, %v6794_v46, %v3472_v45 }
 0x625   : > { %v3502_v14 = vpop.permute.xlu1 %3501 }
 0x626   : > { %v3556_v60 = vsel %vm762_vm9, %v3536_v24, %v3502_v14 }
 0x627   : > { %3789 = vmatmul.mubr.bf16.gmra.mrb[80].mxu0 %v3556_v60 }
 0x628   : > { %4466 = vmatprep.mubr.msk.bf16.mxu0 %vm1133_vm5, %v3462_v30 }
 0x629   : > { %v3488_v23 = vpop.permute.xlu1 %3487 }
 0x62a   : > { %v3538_v44 = vsel %vm804_vm7, %v3520_v5, %v3488_v23 }
 0x62d   : > { %v3474_v12 = vpop.permute.xlu1 %3473 }
 0x62e   : > { %v3523_v47 = vsel %vm1133_vm5, %v6802_v32, %v3474_v12 }
 0x633   : > { %v3504_v21 = vpop.permute.xlu0 %3503  ;;  %v3490_v54 = vpop.permute.xlu1 %3489 }
 0x634   : > { %v3559_v41 = vsel %vm762_vm9, %v3538_v44, %v3504_v21  ;;  %v3540_v30 = vsel %vm804_vm7, %v3523_v47, %v3490_v54 }
 0x635   : > { %3797 = vmatmul.mubr.bf16.gmra.mrb[84].mxu0 %v3559_v41 }
 0x636   : > { %3804 = vmatprep.mubr.bf16.mxu0 %v7222_v39 }
 0x637   : > { %v3476_v63 = vpop.permute.xlu0 %3475 }
 0x638   : > { %v3526_v25 = vsel %vm1133_vm5, %v6810_v42, %v3476_v63 }
 0x63b   : > { %v3492_v35 = vpop.permute.xlu0 %3491  ;;  %v3506_v46 = vpop.permute.xlu1 %3505 }
 0x63c   : > { %v3542_v38 = vsel %vm804_vm7, %v3526_v25, %v3492_v35  ;;  %v3562_v33 = vsel %vm762_vm9, %v3540_v30, %v3506_v46 }
 0x63d   : > { %v3564_v20 = vsel %vm762_vm9, %v3542_v38, %v6604_v62  ;;  %3805 = vmatmul.mubr.bf16.gmra.mrb[88].mxu0 %v3562_v33 }
 0x63e   : > { %3813 = vmatmul.mubr.bf16.vlgmr.msra.gmra.mrb[96].mxu1 %v3564_v20 }
 0x63f   : > { %v3663_v39 = vpop.permute.xlu0 %3662  ;;  %v3665_v23 = vpop.permute.xlu1 %3664 }
 0x643   : > { %v3667_v28 = vpop.permute.xlu0 %3666  ;;  %v3669_v21 = vpop.permute.xlu1 %3668 }
 0x647   : > { %v3671_v10 = vpop.permute.xlu0 %3670  ;;  %v3673_v25 = vpop.permute.xlu1 %3672 }
 0x64b   : > { %v3675_v32 = vpop.permute.xlu0 %3674 }
 0x64f   : > { %v6897_v1 = vpop.permute.xlu0 %3678 }
 0x653   : > { %v6899_v26 = vpop.permute.xlu0 %3682 }
 0x657   : > { %v6901_v37 = vpop.permute.xlu0 %3686 }
 0x65b   : > { %v6903_v45 = vpop.permute.xlu0 %3690 }
 0x65f   : > { %v6905_v5 = vpop.permute.xlu0 %3821 }
 0x6c2   : > { %v3758_v3 = vpop.f32.mrb[64].mxu0 }
 0x6c3   : > { %v3760_v49 = vpop.f32.mrb[65].mxu0  ;;  %v3759_v12 = vadd.f32 %v3758_v3, %v3663_v39 }
 0x6c4   : > { %v3761_v42 = vpop.f32.mrb[66].mxu0 }
 0x6c5   : > { %v3763_v53 = vpop.f32.mrb[67].mxu0  ;;  %v3762_v44 = vadd.f32 %v3761_v42, %v3665_v23  ;;  %v3824_v41 = vadd.f32 %v6905_v5, %v3759_v12  ;;  %v3861_v12 = vsub.f32 1.0, %v6666_v0 }
 0x6c6   : > { %v3856_v53 = vsub.f32 1.0, %v6637_v56 }
 0x6c7   : > { %v3825_v54 = vadd.f32 %v6905_v5, %v3762_v44  ;;  %4772 = vtanh.f32 %v3824_v41 }
 0x6c9   : > { %4774 = vtanh.f32 %v3825_v54 }
 0x6d0   : > { %v3766_v24 = vpop.f32.mrb[68].mxu0 }
 0x6d1   : > { %v3768_v14 = vpop.f32.mrb[69].mxu0  ;;  %v3767_v39 = vadd.f32 %v3766_v24, %v3667_v28  ;;  %v4773_v49 = vpop.eup %4772 }
 0x6d2   : > { %v3769_v60 = vpop.f32.mrb[70].mxu0  ;;  %v3888_v41 = vmul.f32 %v4773_v49, %v6637_v56 }
 0x6d3   : > { %v3771_v62 = vpop.f32.mrb[71].mxu0  ;;  %v3770_v3 = vadd.f32 %v3769_v60, %v3669_v21  ;;  %v3826_v42 = vadd.f32 %v6905_v5, %v3767_v39  ;;  %v4775_v14 = vpop.eup %4774 }
 0x6d4   : > { %v3857_v62 = vsub.f32 1.0, %v6640_v16  ;;  %v3677_v21 = vpop.permute.xlu1 %3676  ;;  %v3889_v54 = vmul.f32 %v4775_v14, %v6640_v16  ;;  %v3925_v14 = vlaneseq }
 0x6d5   : > { %v3827_v23 = vadd.f32 %v6905_v5, %v3770_v3 }
 0x6de   : > { %v3774_v63 = vpop.f32.mrb[72].mxu0 }
 0x6df   : > { %v3775_v47 = vadd.f32 %v3774_v63, %v3671_v10  ;;  %v3776_v30 = vpop.f32.mrb[73].mxu0  ;;  %v3860_v10 = vsub.f32 1.0, %v6663_v51 }
 0x6e0   : > { %v3777_v35 = vpop.f32.mrb[74].mxu0 }
 0x6e1   : > { %v3828_v46 = vadd.f32 %v6905_v5, %v3775_v47  ;;  %v3778_v38 = vadd.f32 %v3777_v35, %v3673_v25  ;;  %v3779_v33 = vpop.f32.mrb[75].mxu0  ;;  %v3876_v63 = vmul.f32 %v3860_v10, %v6355_v9  ;;  %v3872_v25 = vmul.f32 %v3856_v53, %v6283_v8 }
 0x6e2   : > { %v4896_v10 = vmov 1983009808  }
 0x6e3   : > { %4776 = vtanh.f32 %v3828_v46  ;;  %v3829_v20 = vadd.f32 %v6905_v5, %v3778_v38  ;;  %v3873_v46 = vmul.f32 %v3857_v62, %v6285_v29  ;;  %v3904_v39 = vadd.f32 %v3888_v41, %v3872_v25 }
 0x6e4   : > { %v3923_v53 = vunpack.c.l.s4 %v4896_v10  ;;  %v6930_v41 = vshrl.u32 %v3925_v14, 7 }
 0x6e5   : > { %4778 = vtanh.f32 %v3829_v20  ;;  %v3877_v20 = vmul.f32 %v3861_v12, %v6357_v40  ;;  %v3862_v40 = vsub.f32 1.0, %v6674_v13  ;;  %v3859_v12 = vsub.f32 1.0, %v6653_v50 }
 0x6e6   : > { %4780 = vtanh.f32 %v3826_v42 }
 0x6e7   : > { %4782 = vtanh.f32 %v3827_v23  ;;  %v3858_v23 = vsub.f32 1.0, %v6648_v18 }
 0x6ec   : > { %v3782_v44 = vpop.f32.mrb[76].mxu0 }
 0x6ed   : > { %v4777_v28 = vpop.eup %4776  ;;  %v3783_v24 = vadd.f32 %v3782_v44, %v3675_v32  ;;  %v3784_v60 = vpop.f32.mrb[77].mxu0  ;;  %v3924_v44 = vunpack.c.0.s8 %v3923_v53 }
 0x6ee   : > { %v3892_v47 = vmul.f32 %v4777_v28, %v6663_v51  ;;  %v3785_v30 = vpop.f32.mrb[78].mxu0  ;;  %v3905_v51 = vadd.f32 %v3889_v54, %v3873_v46 }
 0x6ef   : > { %v4779_v35 = vpop.eup %4778  ;;  %v3830_v56 = vadd.f32 %v6905_v5, %v3783_v24  ;;  %v3786_v38 = vadd.f32 %v3785_v30, %v3677_v21  ;;  %v3787_v33 = vpop.f32.mrb[79].mxu0  ;;  %v3863_v24 = vsub.f32 1.0, %v6677_v27  ;;  %v3878_v30 = vmul.f32 %v3862_v40, %v6385_v57 }
 0x6f0   : > { %v3908_v32 = vadd.f32 %v3892_v47, %v3876_v63  ;;  %v3893_v16 = vmul.f32 %v4779_v35, %v6666_v0  ;;  %v4781_v62 = vpop.eup %4780  ;;  %v3874_v63 = vmul.f32 %v3858_v23, %v6321_v15  ;;  %v3681_v33 = vpop.permute.xlu1 %3680 }
 0x6f1   : > { %4784 = vtanh.f32 %v3830_v56  ;;  %v3831_v9 = vadd.f32 %v6905_v5, %v3786_v38  ;;  %v4783_v0 = vpop.eup %4782  ;;  %v3890_v28 = vmul.f32 %v4781_v62, %v6648_v18  ;;  %v3875_v56 = vmul.f32 %v3859_v12, %v6323_v6 }
 0x6f2   : > { %v3909_v3 = vadd.f32 %v3893_v16, %v3877_v20  ;;  %v3921_v8 = vcombine.high %v3904_v39, %v3908_v32  ;;  %v3920_v49 = vcombine.low %v3904_v39, %v3908_v32  ;;  %v3891_v47 = vmul.f32 %v4783_v0, %v6653_v50 }
 0x6f3   : > { %4786 = vtanh.f32 %v3831_v9  ;;  %v6940_v18 = vsub.s32 %v3924_v44, %v6930_v41  ;;  %v3906_v32 = vadd.f32 %v3890_v28, %v3874_v63  ;;  %v3879_v16 = vmul.f32 %v3863_v24, %v6387_v34 }
 0x6f4   : > { %v4057_v29 = vcombine.high %v3905_v51, %v3909_v3  ;;  %v4056_v42 = vcombine.low %v3905_v51, %v3909_v3  ;;  %v3907_v50 = vadd.f32 %v3891_v47, %v3875_v56  ;;  %v3685_v53 = vpop.permute.xlu1 %3684 }
 0x6f5   : > { %v6948_v6 = vrot.slane %v3920_v49, %v6940_v18 }
 0x6f6   : > { %v6965_v62 = vrot.slane %v4057_v29, %v6940_v18  ;;  %v6971_v40 = vrot.slane %v4056_v42, %v6940_v18 }
 0x6fa   : > { %v3790_v60 = vpop.f32.mrb[80].mxu0 }
 0x6fb   : > { %v4785_v21 = vpop.eup %4784  ;;  %v3792_v54 = vpop.f32.mrb[81].mxu0 }
 0x6fc   : > { %v3894_v25 = vmul.f32 %v4785_v21, %v6674_v13  ;;  %v3793_v35 = vpop.f32.mrb[82].mxu0  ;;  %v6945_v13 = vrot.slane %v3921_v8, %v6940_v18  ;;  %v3791_v21 = vadd.f32 %v3790_v60, %v6897_v1  ;;  %v3689_v54 = vpop.permute.xlu1 %3688 }
 0x6fd   : > { %v4787_v46 = vpop.eup %4786  ;;  %v3795_v38 = vpop.f32.mrb[83].mxu0 }
 0x6fe   : > { %v3910_v20 = vadd.f32 %v3894_v25, %v3878_v30  ;;  %v3895_v15 = vmul.f32 %v4787_v46, %v6677_v27  ;;  %v3794_v30 = vadd.f32 %v3793_v35, %v3681_v33  ;;  %v3832_v56 = vadd.f32 %v6905_v5, %v3791_v21 }
 0x6ff   : > { %v4897_v21 = vmov 1934713408  }
 0x700   : > { %v3911_v39 = vadd.f32 %v3895_v15, %v3879_v16  ;;  %v3937_v57 = vcombine.high %v3906_v32, %v3910_v20  ;;  %v3936_v9 = vcombine.low %v3906_v32, %v3910_v20  ;;  %v3833_v32 = vadd.f32 %v6905_v5, %v3794_v30  ;;  %v3693_v20 = vpop.permute.xlu1 %3692 }
 0x701   : > { %4788 = vtanh.f32 %v3832_v56  ;;  %v3866_v30 = vsub.f32 1.0, %v6701_v43  ;;  %v3868_v56 = vsub.f32 1.0, %v6708_v36 }
 0x702   : > { %v6951_v51 = vrot.slane %v3937_v57, %v6940_v18  ;;  %v6954_v3 = vrot.slane %v3936_v9, %v6940_v18  ;;  %v4073_v10 = vcombine.high %v3907_v50, %v3911_v39  ;;  %v4072_v34 = vcombine.low %v3907_v50, %v3911_v39 }
 0x704   : > { %v4000_v27 = vcombine.low %v6945_v13, %v6951_v51  ;;  %v3984_v14 = vcombine.low %v6948_v6, %v6954_v3  ;;  %v4001_v8 = vcombine.high %v6945_v13, %v6951_v51  ;;  %v3985_v49 = vcombine.high %v6948_v6, %v6954_v3 }
 0x705   : > { %v6968_v23 = vrot.slane %v4073_v10, %v6940_v18  ;;  %v6974_v0 = vrot.slane %v4072_v34, %v6940_v18 }
 0x707   : > { %v4136_v12 = vcombine.low %v6965_v62, %v6968_v23  ;;  %v4120_v44 = vcombine.low %v6971_v40, %v6974_v0  ;;  %v4137_v28 = vcombine.high %v6965_v62, %v6968_v23  ;;  %v4121_v29 = vcombine.high %v6971_v40, %v6974_v0 }
 0x708   : > { %v3798_v24 = vpop.f32.mrb[84].mxu0 }
 0x709   : > { %v3800_v42 = vpop.f32.mrb[85].mxu0  ;;  %v3799_v63 = vadd.f32 %v3798_v24, %v6899_v26 }
 0x70a   : > { %v3801_v47 = vpop.f32.mrb[86].mxu0  ;;  %v3987_v42 = vunpack.c.l.s4 %v4897_v21 }
 0x70b   : > { %v3803_v25 = vpop.f32.mrb[87].mxu0  ;;  %v3802_v46 = vadd.f32 %v3801_v47, %v3685_v53  ;;  %v3834_v38 = vadd.f32 %v6905_v5, %v3799_v63  ;;  %v3865_v47 = vsub.f32 1.0, %v6690_v17 }
 0x70c   : > { %v3988_v63 = vunpack.c.0.s8 %v3987_v42  ;;  %v4789_v25 = vpop.eup %4788 }
 0x70d   : > { %v3835_v16 = vadd.f32 %v6905_v5, %v3802_v46  ;;  %4790 = vtanh.f32 %v3834_v38  ;;  %v3867_v46 = vsub.f32 1.0, %v6703_v11  ;;  %v3869_v38 = vsub.f32 1.0, %v6713_v19 }
 0x70e   : > { %4792 = vtanh.f32 %v3833_v32 }
 0x70f   : > { %4794 = vtanh.f32 %v3835_v16 }
 0x710   : > { %v3806_v15 = vpop.f32.mrb[88].mxu0 }
 0x711   : > { %v3807_v1 = vadd.f32 %v3806_v15, %v6901_v37  ;;  %v3808_v60 = vpop.f32.mrb[89].mxu0  ;;  %v3814_v50 = vpop.f32.mrb[96].mxu1  ;;  %v7005_v15 = vsub.s32 %v3988_v63, %v6930_v41 }
 0x712   : > { %v3815_v26 = vadd.f32 %v3814_v50, %v6903_v45  ;;  %v3809_v35 = vpop.f32.mrb[90].mxu0  ;;  %v3816_v33 = vpop.f32.mrb[97].mxu1  ;;  %v3896_v50 = vmul.f32 %v4789_v25, %v6685_v58 }
 0x713   : > { %v3836_v39 = vadd.f32 %v6905_v5, %v3807_v1  ;;  %v3810_v57 = vadd.f32 %v3809_v35, %v3689_v54  ;;  %v3811_v9 = vpop.f32.mrb[91].mxu0  ;;  %v3817_v10 = vpop.f32.mrb[98].mxu1  ;;  %v3864_v54 = vsub.f32 1.0, %v6685_v58  ;;  %v3882_v35 = vmul.f32 %v3866_v30, %v6437_v2 }
 0x714   : > { %v3838_v34 = vadd.f32 %v6905_v5, %v3815_v26  ;;  %v3818_v53 = vadd.f32 %v3817_v10, %v3693_v20  ;;  %v3819_v24 = vpop.f32.mrb[99].mxu1  ;;  %v3870_v20 = vsub.f32 1.0, %v6726_v48  ;;  %v3881_v26 = vmul.f32 %v3865_v47, %v6413_v52 }
 0x715   : > { %4796 = vtanh.f32 %v3836_v39  ;;  %v3837_v37 = vadd.f32 %v6905_v5, %v3810_v57  ;;  %v3880_v60 = vmul.f32 %v3864_v54, %v6411_v31  ;;  %v3883_v57 = vmul.f32 %v3867_v46, %v6439_v22 }
 0x716   : > { %4798 = vtanh.f32 %v3838_v34  ;;  %v3839_v45 = vadd.f32 %v6905_v5, %v3818_v53  ;;  %v3871_v5 = vsub.f32 1.0, %v6730_v59  ;;  %v3884_v9 = vmul.f32 %v3868_v56, %v6463_v61 }
 0x717   : > { %4800 = vtanh.f32 %v3837_v37  ;;  %v4791_v32 = vpop.eup %4790  ;;  %v3885_v10 = vmul.f32 %v3869_v38, %v6465_v55  ;;  %v3886_v58 = vmul.f32 %v3870_v20, %v6485_v7  ;;  %v7025_v22 = vrot.slane %v4000_v27, %v7005_v15 }
 0x718   : > { %4802 = vtanh.f32 %v3839_v45  ;;  %v4793_v16 = vpop.eup %4792  ;;  %v3898_v39 = vmul.f32 %v4791_v32, %v6701_v43  ;;  %v3887_v52 = vmul.f32 %v3871_v5, %v6487_v4  ;;  %v7031_v61 = vrot.slane %v3984_v14, %v7005_v15 }
 0x719   : > { %v4795_v1 = vpop.eup %4794  ;;  %v3897_v34 = vmul.f32 %v4793_v16, %v6690_v17  ;;  %v3912_v7 = vadd.f32 %v3896_v50, %v3880_v60  ;;  %v3999_v14 = vrot.slane %v3985_v49, %v7005_v15  ;;  %v7054_v25 = vrot.slane %v4136_v12, %v7005_v15 }
 0x71a   : > { %v3899_v2 = vmul.f32 %v4795_v1, %v6703_v11  ;;  %v7038_v11 = vrot.slane %v4001_v8, %v7005_v15  ;;  %v7061_v56 = vrot.slane %v4120_v44, %v7005_v15  ;;  %v4151_v12 = vrot.slane %v4137_v28, %v7005_v15 }
 0x71b   : > { %v3913_v24 = vadd.f32 %v3897_v34, %v3881_v26  ;;  %v4135_v60 = vrot.slane %v4121_v29, %v7005_v15 }
 0x71f   : > { %v4797_v33 = vpop.eup %4796 }
 0x720   : > { %v4799_v41 = vpop.eup %4798  ;;  %v3900_v31 = vmul.f32 %v4797_v33, %v6708_v36  ;;  %v3914_v36 = vadd.f32 %v3898_v39, %v3882_v35 }
 0x721   : > { %v4801_v53 = vpop.eup %4800  ;;  %v3902_v43 = vmul.f32 %v4799_v41, %v6726_v48 }
 0x722   : > { %v4803_v55 = vpop.eup %4802  ;;  %v3916_v4 = vadd.f32 %v3900_v31, %v3884_v9  ;;  %v3901_v17 = vmul.f32 %v4801_v53, %v6713_v19  ;;  %v3915_v19 = vadd.f32 %v3899_v2, %v3883_v57 }
 0x723   : > { %v3918_v48 = vadd.f32 %v3902_v43, %v3886_v58  ;;  %v3903_v27 = vmul.f32 %v4803_v55, %v6730_v59 }
 0x724   : > { %v3917_v37 = vadd.f32 %v3901_v17, %v3885_v10  ;;  %v3953_v21 = vcombine.high %v3912_v7, %v3916_v4  ;;  %v3952_v42 = vcombine.low %v3912_v7, %v3916_v4 }
 0x725   : > { %v3919_v45 = vadd.f32 %v3903_v27, %v3887_v52  ;;  %v3969_v63 = vcombine.high %v3914_v36, %v3918_v48  ;;  %v3968_v54 = vcombine.low %v3914_v36, %v3918_v48 }
 0x726   : > { %v3967_v13 = vrot.slane %v3953_v21, %v6940_v18  ;;  %v3960_v51 = vrot.slane %v3952_v42, %v6940_v18  ;;  %v4089_v8 = vcombine.high %v3913_v24, %v3917_v37  ;;  %v4088_v47 = vcombine.low %v3913_v24, %v3917_v37 }
 0x727   : > { %v3983_v59 = vrot.slane %v3969_v63, %v6940_v18  ;;  %v3976_v30 = vrot.slane %v3968_v54, %v6940_v18  ;;  %v4105_v6 = vcombine.high %v3915_v19, %v3919_v45  ;;  %v4104_v3 = vcombine.low %v3915_v19, %v3919_v45 }
 0x728   : > { %v4103_v49 = vrot.slane %v4089_v8, %v6940_v18  ;;  %v4096_v46 = vrot.slane %v4088_v47, %v6940_v18 }
 0x729   : > { %v4032_v38 = vcombine.low %v3967_v13, %v3983_v59  ;;  %v4016_v32 = vcombine.low %v3960_v51, %v3976_v30  ;;  %v4033_v20 = vcombine.high %v3967_v13, %v3983_v59  ;;  %v4017_v5 = vcombine.high %v3960_v51, %v3976_v30 }
 0x72a   : > { %v4119_v16 = vrot.slane %v4105_v6, %v6940_v18  ;;  %v4112_v1 = vrot.slane %v4104_v3, %v6940_v18 }
 0x72b   : > { %v4040_v44 = vrot.slane %v4032_v38, %v7005_v15  ;;  %v4024_v50 = vrot.slane %v4016_v32, %v7005_v15  ;;  %v4047_v26 = vrot.slane %v4033_v20, %v7005_v15  ;;  %v4031_v35 = vrot.slane %v4017_v5, %v7005_v15 }
 0x72c   : > { %v4168_v33 = vcombine.low %v4103_v49, %v4119_v16  ;;  %v4152_v18 = vcombine.low %v4096_v46, %v4112_v1  ;;  %v4169_v39 = vcombine.high %v4103_v49, %v4119_v16  ;;  %v4153_v57 = vcombine.high %v4096_v46, %v4112_v1 }
 0x72d   : > { %v4053_v62 = vcombine.high %v7025_v22, %v4040_v44  ;;  %v4049_v23 = vcombine.high %v7031_v61, %v4024_v50  ;;  %v4054_v28 = vcombine.low %v7038_v11, %v4047_v26  ;;  %v4050_v40 = vcombine.low %v3999_v14, %v4031_v35 }
 0x72e   : > { %v4055_v0 = vcombine.high %v7038_v11, %v4047_v26  ;;  %v4051_v29 = vcombine.high %v3999_v14, %v4031_v35  ;;  %v4176_v9 = vrot.slane %v4168_v33, %v7005_v15  ;;  %v4160_v10 = vrot.slane %v4152_v18, %v7005_v15 }
 0x72f   : > { %4205 = vrot.lane.b32.xlu0 %v4053_v62, %s7234_s28  ;;  %4193 = vrot.lane.b32.xlu1 %v4049_v23, %s7234_s28  ;;  %v4183_v41 = vrot.slane %v4169_v39, %v7005_v15  ;;  %v4167_v34 = vrot.slane %v4153_v57, %v7005_v15  ;;  %v4052_v31 = vcombine.low %v7025_v22, %v4040_v44 }
 0x730   : > { %v4189_v58 = vcombine.high %v7054_v25, %v4176_v9  ;;  %v4185_v52 = vcombine.high %v7061_v56, %v4160_v10  ;;  %v4048_v53 = vcombine.low %v7031_v61, %v4024_v50  ;;  %v4188_v2 = vcombine.low %v7054_v25, %v4176_v9 }
 0x731   : > { %v4190_v43 = vcombine.low %v4151_v12, %v4183_v41  ;;  %v4186_v55 = vcombine.low %v4135_v60, %v4167_v34  ;;  %v4191_v7 = vcombine.high %v4151_v12, %v4183_v41  ;;  %v4187_v4 = vcombine.high %v4135_v60, %v4167_v34 }
 0x732   : > { %v4184_v17 = vcombine.low %v7061_v56, %v4160_v10 }
 0x733   : > { %4209 = vrot.lane.b32.xlu0 %v4054_v28, %s7233_s18  ;;  %4197 = vrot.lane.b32.xlu1 %v4050_v40, %s7233_s18 }
 0x737   : > { %4213 = vrot.lane.b32.xlu0 %v4055_v0, %s7235_s30  ;;  %4201 = vrot.lane.b32.xlu1 %v4051_v29, %s7235_s30 }
 0x73b   : > { %4229 = vrot.lane.b32.xlu0 %v4189_v58, %s7234_s28  ;;  %4217 = vrot.lane.b32.xlu1 %v4185_v52, %s7234_s28  ;;  %s4474_s28 = sshll.u32 %s4975_s17, 9  ;;  %s4257_s17 = scalar_lea.sflag [#allocation3], %s365_s11 }
 0x73c   : > { %s7120_s25 = scalar_lea.hbm %s7176_s10, %s4474_s28 }
 0x73f   : > { %4233 = vrot.lane.b32.xlu0 %v4190_v43, %s7233_s18  ;;  %4221 = vrot.lane.b32.xlu1 %v4186_v55, %s7233_s18  ;;  %s367_s18 = scalar_lea.vmem [#allocation2], %s4346_s21  ;;  %s4832_s21 = scalar_lea.vmem %s4831_s27, 1024 }
 0x743   : > { %4237 = vrot.lane.b32.xlu0 %v4191_v7, %s7235_s30  ;;  %4225 = vrot.lane.b32.xlu1 %v4187_v4, %s7235_s30  ;;  %s4271_s30 = sshll.u32 %s367_s18, 4  ;;  %s7122_s30 = int_to_ptr.vmem [resolvable:$true] %s4271_s30 }
 0x744   : > { %s4826_s29 = scalar_lea.vmem %s7122_s30, 512  ;;  %p4833_p0 = scmp.lt.s32.totalorder %s7122_s30, %s4831_s27 }
 0x745   : > { %p4827_p11 = scmp.ne.s32.totalorder %s7122_s30, %s4826_s29  ;;  %p4834_p1 = scmp.lt.s32.totalorder %s4832_s21, %s4826_s29 }
 0x747   : > { %p4828_p12 = pnand %p4827_p11, %p4992_p5  ;;  %p4835_p2 = por %p4834_p1, %p4833_p0 }
 0x749   : > { %p4829_p13 = pneg %p4828_p12 }
 0x74b   : > { %p4836_p3 = pnand %p4835_p2, %p4829_p13 }
 0x7a1   : > { %v4206_v15 = vpop.permute.xlu0 %4205  ;;  %v4194_v22 = vpop.permute.xlu1 %4193 }
 0x7a2   : > { %v4243_v36 = vsel %vm1133_vm5, %v4052_v31, %v4206_v15  ;;  %v4240_v48 = vsel %vm1133_vm5, %v4048_v53, %v4194_v22 }
 0x7a5   : > { %v4210_v61 = vpop.permute.xlu0 %4209  ;;  %v4198_v11 = vpop.permute.xlu1 %4197 }
 0x7a6   : > { %v4244_v27 = vsel %vm804_vm7, %v4243_v36, %v4210_v61  ;;  %v4241_v14 = vsel %vm804_vm7, %v4240_v48, %v4198_v11 }
 0x7a9   : > { %v4214_v24 = vpop.permute.xlu0 %4213  ;;  %v4202_v37 = vpop.permute.xlu1 %4201 }
 0x7aa   : > { %v4245_v21 = vsel %vm762_vm9, %v4244_v27, %v4214_v24  ;;  %v4242_v42 = vsel %vm762_vm9, %v4241_v14, %v4202_v37 }
 0x7ab   : > { %4253 = vst [vmem:[%s367_s18 + $0x8] sm:$0xff] %v4245_v21  ;;  %4252 = vst [vmem:[%s367_s18] sm:$0xff] %v4242_v42 }
 0x7ad   : > { %v4230_v19 = vpop.permute.xlu0 %4229  ;;  %v4218_v45 = vpop.permute.xlu1 %4217 }
 0x7ae   : > { %v4249_v13 = vsel %vm1133_vm5, %v4188_v2, %v4230_v19  ;;  %v4246_v51 = vsel %vm1133_vm5, %v4184_v17, %v4218_v45 }
 0x7b1   : > { %v4234_v63 = vpop.permute.xlu0 %4233  ;;  %v4222_v54 = vpop.permute.xlu1 %4221 }
 0x7b2   : > { %v4250_v8 = vsel %vm804_vm7, %v4249_v13, %v4234_v63  ;;  %v4247_v47 = vsel %vm804_vm7, %v4246_v51, %v4222_v54 }
 0x7b5   : > { %v4238_v59 = vpop.permute.xlu0 %4237  ;;  %v4226_v30 = vpop.permute.xlu1 %4225 }
 0x7b6   : > { %v4251_v6 = vsel %vm762_vm9, %v4250_v8, %v4238_v59  ;;  %v4248_v3 = vsel %vm762_vm9, %v4247_v47, %v4226_v30 }
 0x7b7   : > { %4255 = vst [vmem:[%s367_s18 + $0x18] sm:$0xff] %v4251_v6  ;;  %4254 = vst [vmem:[%s367_s18 + $0x10] sm:$0xff] %v4248_v3 }
 0x7b8   : > { %4839 = shalt.err (!%p4836_p3)
}
 0x7b9   : > { %s4840_s11 = scalar_lea.hbm %s7120_s25, 512  ;;  %s4844_s26 = scalar_lea.hbm %s7176_s10, 1024 }
 0x7ba   : > { %p4841_p4 = scmp.ne.s32.totalorder %s7120_s25, %s4840_s11  ;;  %p4845_p9 = scmp.lt.u32.totalorder %s7120_s25, %s7176_s10 }
 0x7bb   : > { %p4846_p10 = scmp.lt.u32.totalorder %s4844_s26, %s4840_s11  ;;  %p4848_p12 = scmp.lt.u32.totalorder %s4840_s11, %s7120_s25 }
 0x7bc   : > { %p4842_p7 = pnand %p4841_p4, %p4992_p5 }
 0x7bd   : > { %p4847_p11 = por %p4846_p10, %p4845_p9 }
 0x7be   : > { %p4843_p8 = pneg %p4842_p7 }
 0x7bf   : > { %p4849_p13 = por %p4848_p12, %p4847_p11 }
 0x7c1   : > { %p4850_p0 = pnand %p4849_p13, %p4843_p8 }
 0x7c3   : > { %4853 = shalt.err (!%p4850_p0)
}
 0x7c4   : > { %4495 = dma.vmem_to_hbm [thread:$0]  (%p4992_p5), %s7122_s30, 512, %s7120_s25, %s4257_s17  }
 0x7c5 PF: > { %p4501_p1 = scmp.ge.s32.totalorder %s4888_s16, 2  ;;  %s4283_s29 = sand.u32 1, %s4876_s13  }
 0x7c6   : > { %s4284_s27 = scalar_lea.sflag [#allocation3], %s4283_s29 }
 0x7c7   : > { %p4498_p2 = pnand %p4501_p1, %p4996_p6 }
 0x7c9   : > { %4871 = dma.done.wait (!%p4498_p2), %s4284_s27, 512  }
 0x7ca   : > { %4873 = vsyncadd (!%p4498_p2), %s4284_s27, 4294966784  ;;  %p20_p3 = scmp.ge.s32.totalorder %s4979_s19, 4   ;;  %s7241_s13 = smov %s4880_s14 }
 0x7cb   : > { %s7242_s14 = smov %s4884_s15  ;;  %s7243_s15 = smov %s4990_s22 }
 0x7cc   : > { %s7244_s16 = smov %s4979_s19  ;;  %22 = sbr.rel (!%p20_p3) target bundleno = 3 (0x3), region = 98 }
 0x7d3   :  { %4289 = vsyncpa [#allocation3], 1 }
 0x7d4   :  { %4291 = vsyncpa [#allocation3 + $0x1], 1 }

</bundles_post_ra>
